<compile_context>
chip_gen: v7x
topology: tpu7x:2x2x1
jax: 0.10.0
libtpu: 0.0.40
codegen_flags: <defaults>
</compile_context>

<pallas_src>
import numpy as np
import jax
import jax.numpy as jnp
from jax import lax
from jax.experimental import pallas as pl
from jax.experimental.pallas import tpu as pltpu

BN_EPS = 1e-5


def _softplus(x):
    # PyTorch nn.Softplus (beta=1, threshold=20): log(1+exp(x)), linear above 20.
    return jnp.where(x > 20.0, x, jnp.log1p(jnp.exp(jnp.minimum(x, 20.0))))


def _round_up(x, m):
    return ((x + m - 1) // m) * m


def _make_kernel(approx_recip):
    def conv_layer_kernel(self_ref, nbr_ref, ws_ref, wn_ref, b_ref, s2_ref,
                          sh2_ref, out_ref):
        m, tn, k = nbr_ref.shape
        a = self_ref.shape[1]

        # Self-atom contribution of fc_full (+ BN1-folded bias), once per tile.
        # The filter-half column sign is pre-folded, so z = [-filter | core].
        zs = jnp.dot(self_ref[...].astype(ws_ref.dtype), ws_ref[...],
                     preferred_element_type=jnp.float32) + b_ref[...]      # (tn, 2A)

        wn = wn_ref[...]                                                   # (K, 2A)
        acc = jnp.zeros((tn, 2 * a), jnp.float32)

        # Stream over neighbors: one K=128 MXU matmul per neighbor, gate fused,
        # accumulate.  M is small and static -> fully unrolled Python loop.
        for j in range(m):
            z = jnp.dot(nbr_ref[j], wn, preferred_element_type=jnp.float32) + zs
            # Full 128-lane gate: filter lanes hold -f, core lanes hold c.
            e = jnp.exp(jnp.minimum(z, 20.0))
            denom = 1.0 + e
            # sigmoid(f) = 1/(1+exp(-f)) valid on filter lanes.
            sig = pl.reciprocal(denom, approx=True) if approx_recip else 1.0 / denom
            # softplus(c) = log1p(exp(c)) (linear above 20) valid on core lanes.
            sp = jnp.where(z > 20.0, z, jnp.log1p(e))
            # Align softplus(core) onto the sigmoid(filter) lanes; lanes [A,2A)
            # of the product are don't-care (finite) and sliced off at the end.
            acc = acc + sig * pltpu.roll(sp, shift=a, axis=1)

        nbr_sumed = acc[:, :a] * s2_ref[...] + sh2_ref[...]   # BN2 folded affine
        pre = self_ref[...] + nbr_sumed
        out_ref[...] = _softplus(pre).astype(out_ref.dtype)

    return conv_layer_kernel


def conv_layer_forward(atom_in_fea, nbr_fea, nbr_fea_idx, params, *,
                       tile_n=256, compute_dtype=jnp.bfloat16):
    N, A = atom_in_fea.shape
    M = nbr_fea_idx.shape[1]
    B = nbr_fea.shape[2]
    K = A + B
    cdt = np.dtype(compute_dtype)
    exact = cdt == np.dtype(np.float32)

    # --- Fold BN1 (eval mode) into fc_full; negate the filter-half output
    #     columns so the kernel's z is [-filter | core] (one full-width exp).
    inv1 = params["g1"] * lax.rsqrt(params["v1"] + BN_EPS)
    col_sign = jnp.concatenate([-jnp.ones((A,), jnp.float32),
                                jnp.ones((A,), jnp.float32)])
    Wf = params["W"] * (inv1 * col_sign)[None, :]                 # (2A+B, 2A)
    bf = ((params["b"] - params["m1"]) * inv1 + params["be1"]) * col_sign
    W_self = Wf[:A].astype(cdt)                                   # (A,   2A)
    W_nb = Wf[A:].astype(cdt)                                     # (A+B, 2A)

    # --- Fold BN2 into a scale/shift pair.
    inv2 = params["g2"] * lax.rsqrt(params["v2"] + BN_EPS)
    shift2 = params["be2"] - params["m2"] * inv2

    # --- Glue: cast first (dominant HBM tensor is 2 B/elem on the bf16 path),
    #     then gather + concat into a NEIGHBOR-MAJOR (M, N, K) layout so the
    #     kernel streams dense contiguous (tile, 128) slabs per neighbor.
    atom_c = atom_in_fea.astype(cdt)
    nbr_c = nbr_fea.astype(cdt)
    nbr_cat = jnp.concatenate(
        [atom_c[nbr_fea_idx.T], jnp.transpose(nbr_c, (1, 0, 2))], axis=2)   # (M,N,K)

    # --- Tile: multiple of 16 (bf16 sublane tile), capped so the parallel grid
    #     has >= 2 steps whenever N allows it (v7x megacore sharding).
    tile = max(16, min(_round_up(tile_n, 16), _round_up(-(-N // 2), 16)))
    n_pad = _round_up(N, tile)
    if n_pad != N:
        atom_p = jnp.pad(atom_in_fea, ((0, n_pad - N), (0, 0)))
        nbr_cat = jnp.pad(nbr_cat, ((0, 0), (0, n_pad - N), (0, 0)))
    else:
        atom_p = atom_in_fea

    row = lambda v: v.reshape(1, -1).astype(jnp.float32)
    full2d = lambda shape: pl.BlockSpec(shape, lambda i: (0, 0))

    cost = pl.CostEstimate(
        flops=2 * n_pad * (A + M * K) * 2 * A,
        transcendentals=n_pad * (4 * M * A + 2 * A),
        bytes_accessed=(atom_p.size * 4
                        + nbr_cat.size * nbr_cat.dtype.itemsize
                        + (W_self.size + W_nb.size) * cdt.itemsize
                        + n_pad * A * 4))

    kernel = _make_kernel(approx_recip=not exact)

    out = pl.pallas_call(
        kernel,
        out_shape=jax.ShapeDtypeStruct((n_pad, A), jnp.float32),
        grid_spec=pltpu.PrefetchScalarGridSpec(
            num_scalar_prefetch=0,
            grid=(n_pad // tile,),
            in_specs=[
                pl.BlockSpec((tile, A), lambda i: (i, 0)),        # self feats (f32)
                pl.BlockSpec((M, tile, K), lambda i: (0, i, 0)),  # [nbr_atom|bond], nbr-major
                full2d((A, 2 * A)),                               # W_self (BN1+sign fold)
                full2d((K, 2 * A)),                               # W_nb   (BN1+sign fold)
                full2d((1, 2 * A)),                               # bias   (BN1+sign fold)
                full2d((1, A)),                                   # BN2 scale
                full2d((1, A)),                                   # BN2 shift
            ],
            out_specs=pl.BlockSpec((tile, A), lambda i: (i, 0)),
        ),
        compiler_params=pltpu.CompilerParams(dimension_semantics=("parallel",)),
        cost_estimate=cost,
    )(atom_p, nbr_cat, W_self, W_nb, row(bf), row(inv2), row(shift2))

    return out[:N]


def conv_layer_reference(atom_in_fea, nbr_fea, nbr_fea_idx, params):
    """Pure-JAX reference mirroring the PyTorch forward (eval-mode BN)."""
    N, M = nbr_fea_idx.shape
    A = atom_in_fea.shape[1]
    atom_nbr = atom_in_fea[nbr_fea_idx]
    total = jnp.concatenate(
        [jnp.broadcast_to(atom_in_fea[:, None, :], (N, M, A)), atom_nbr, nbr_fea], axis=2)
    z = total @ params["W"] + params["b"]
    z = (z - params["m1"]) / jnp.sqrt(params["v1"] + BN_EPS) * params["g1"] + params["be1"]
    nbr_filter, nbr_core = z[..., :A], z[..., A:]
    nbr_sumed = jnp.sum(jax.nn.sigmoid(nbr_filter) * _softplus(nbr_core), axis=1)
    nbr_sumed = (nbr_sumed - params["m2"]) / jnp.sqrt(params["v2"] + BN_EPS) * params["g2"] + params["be2"]
    return _softplus(atom_in_fea + nbr_sumed)


def init_params(key, atom_fea_len, nbr_fea_len):
    A, B = atom_fea_len, nbr_fea_len
    fan_in = 2 * A + B
    bound = 1.0 / jnp.sqrt(fan_in)
    ks = jax.random.split(key, 10)
    return {
        "W": jax.random.uniform(ks[0], (2 * A + B, 2 * A), jnp.float32, -bound, bound),
        "b": jax.random.uniform(ks[1], (2 * A,), jnp.float32, -bound, bound),
        # bn1 (2A features), inference-mode stats
        "g1": 1.0 + 0.1 * jax.random.normal(ks[2], (2 * A,), jnp.float32),
        "be1": 0.1 * jax.random.normal(ks[3], (2 * A,), jnp.float32),
        "m1": 0.1 * jax.random.normal(ks[4], (2 * A,), jnp.float32),
        "v1": jax.random.uniform(ks[5], (2 * A,), jnp.float32, 0.5, 1.5),
        # bn2 (A features)
        "g2": 1.0 + 0.1 * jax.random.normal(ks[6], (A,), jnp.float32),
        "be2": 0.1 * jax.random.normal(ks[7], (A,), jnp.float32),
        "m2": 0.1 * jax.random.normal(ks[8], (A,), jnp.float32),
        "v2": jax.random.uniform(ks[9], (A,), jnp.float32, 0.5, 1.5),
    }


if __name__ == "__main__":
    ATOM_FEA_LEN = 64   # A
    NBR_FEA_LEN = 64    # B
    N, M = 200, 8       # atoms (not a multiple of the tile), max neighbors

    key = jax.random.PRNGKey(0)
    k_x, k_nbr, k_idx, k_p = jax.random.split(key, 4)

    atom_in_fea = jax.random.normal(k_x, (N, ATOM_FEA_LEN), jnp.float32)
    nbr_fea = jax.random.normal(k_nbr, (N, M, NBR_FEA_LEN), jnp.float32)
    nbr_fea_idx = jax.random.randint(k_idx, (N, M), 0, N, dtype=jnp.int32)
    params = init_params(k_p, ATOM_FEA_LEN, NBR_FEA_LEN)

    ref = jax.block_until_ready(
        conv_layer_reference(atom_in_fea, nbr_fea, nbr_fea_idx, params))

    # Exact f32 path (BN affine fold + exact divide): tight tolerance.
    out_f32 = jax.block_until_ready(conv_layer_forward(
        atom_in_fea, nbr_fea, nbr_fea_idx, params,
        tile_n=128, compute_dtype=jnp.float32))
    assert out_f32.shape == (N, ATOM_FEA_LEN) and out_f32.dtype == jnp.float32
    assert jnp.allclose(out_f32, ref, atol=5e-4, rtol=5e-4), (
        f"f32 max abs err {jnp.max(jnp.abs(out_f32 - ref))}")

    # Default bf16-operand fast path (MXU + approx EUP reciprocal): relaxed tol.
    out_bf16 = jax.block_until_ready(conv_layer_forward(
        atom_in_fea, nbr_fea, nbr_fea_idx, params))
    assert out_bf16.shape == (N, ATOM_FEA_LEN) and out_bf16.dtype == jnp.float32
    assert jnp.allclose(out_bf16, ref, atol=5e-2, rtol=5e-2), (
        f"bf16 max abs err {jnp.max(jnp.abs(out_bf16 - ref))}")

    print("KERNEL_OK")
</pallas_src>

<mosaic_0001>
module attributes {stable_mosaic.version = 11 : i64} {
  func.func @conv_layer_kernel(%arg0: i32, %arg1: memref<112x64xf32, #tpu.memory_space<vmem>>, %arg2: memref<8x112x128xf32, #tpu.memory_space<vmem>>, %arg3: memref<64x128xf32, #tpu.memory_space<vmem>>, %arg4: memref<128x128xf32, #tpu.memory_space<vmem>>, %arg5: memref<1x128xf32, #tpu.memory_space<vmem>>, %arg6: memref<1x64xf32, #tpu.memory_space<vmem>>, %arg7: memref<1x64xf32, #tpu.memory_space<vmem>>, %arg8: memref<112x64xf32, #tpu.memory_space<vmem>>) attributes {dimension_semantics = [#tpu.dimension_semantics<parallel>], iteration_bounds = array<i64: 2>, scalar_prefetch = 0 : i64, scratch_operands = 0 : i64, tpu.core_type = #tpu.core_type<tc>, window_params = [{transform_indices = @transform_0, window_bounds = array<i64: 112, 64>}, {transform_indices = @transform_1, window_bounds = array<i64: 8, 112, 128>}, {pipeline_mode = #tpu.pipeline_mode<synchronous>, transform_indices = @transform_2, window_bounds = array<i64: 64, 128>}, {pipeline_mode = #tpu.pipeline_mode<synchronous>, transform_indices = @transform_3, window_bounds = array<i64: 128, 128>}, {pipeline_mode = #tpu.pipeline_mode<synchronous>, transform_indices = @transform_4, window_bounds = array<i64: 1, 128>}, {pipeline_mode = #tpu.pipeline_mode<synchronous>, transform_indices = @transform_5, window_bounds = array<i64: 1, 64>}, {pipeline_mode = #tpu.pipeline_mode<synchronous>, transform_indices = @transform_6, window_bounds = array<i64: 1, 64>}, {transform_indices = @transform_7, window_bounds = array<i64: 112, 64>}]} {
    %c0 = arith.constant 0 : index
    %c0_0 = arith.constant 0 : index
    %0 = vector.load %arg1[%c0, %c0_0] : memref<112x64xf32, #tpu.memory_space<vmem>>, vector<112x64xf32>
    %c0_1 = arith.constant 0 : index
    %c0_2 = arith.constant 0 : index
    %1 = vector.load %arg3[%c0_1, %c0_2] : memref<64x128xf32, #tpu.memory_space<vmem>>, vector<64x128xf32>
    %cst = arith.constant dense<0.000000e+00> : vector<112x128xf32>
    %2 = tpu.matmul %0, %1, %cst {dimension_numbers = #tpu.dot_dimension_numbers<[1], [0], [0], [1], [0, 0, 1, 1], [], []>} : vector<112x64xf32>, vector<64x128xf32>, vector<112x128xf32> -> vector<112x128xf32>
    %c0_3 = arith.constant 0 : index
    %c0_4 = arith.constant 0 : index
    %3 = vector.load %arg5[%c0_3, %c0_4] : memref<1x128xf32, #tpu.memory_space<vmem>>, vector<1x128xf32>
    %4 = vector.broadcast %3 : vector<1x128xf32> to vector<112x128xf32>
    %5 = arith.addf %2, %4 : vector<112x128xf32>
    %c0_5 = arith.constant 0 : index
    %c0_6 = arith.constant 0 : index
    %6 = vector.load %arg4[%c0_5, %c0_6] : memref<128x128xf32, #tpu.memory_space<vmem>>, vector<128x128xf32>
    %cst_7 = arith.constant 0.000000e+00 : f32
    %7 = vector.broadcast %cst_7 : f32 to vector<112x128xf32>
    %c0_8 = arith.constant 0 : index
    %c0_9 = arith.constant 0 : index
    %c0_10 = arith.constant 0 : index
    %8 = vector.load %arg2[%c0_8, %c0_9, %c0_10] : memref<8x112x128xf32, #tpu.memory_space<vmem>>, vector<1x112x128xf32>
    %9 = vector.shape_cast %8 : vector<1x112x128xf32> to vector<112x128xf32>
    %cst_11 = arith.constant dense<0.000000e+00> : vector<112x128xf32>
    %10 = tpu.matmul %9, %6, %cst_11 {dimension_numbers = #tpu.dot_dimension_numbers<[1], [0], [0], [1], [0, 0, 1, 1], [], []>} : vector<112x128xf32>, vector<128x128xf32>, vector<112x128xf32> -> vector<112x128xf32>
    %11 = arith.addf %10, %5 : vector<112x128xf32>
    %cst_12 = arith.constant 2.000000e+01 : f32
    %12 = vector.broadcast %cst_12 : f32 to vector<112x128xf32>
    %13 = arith.minimumf %11, %12 : vector<112x128xf32>
    %14 = math.exp %13 : vector<112x128xf32>
    %cst_13 = arith.constant 1.000000e+00 : f32
    %15 = vector.broadcast %cst_13 : f32 to vector<112x128xf32>
    %16 = arith.addf %15, %14 : vector<112x128xf32>
    %cst_14 = arith.constant 1.000000e+00 : f32
    %17 = vector.broadcast %cst_14 : f32 to vector<112x128xf32>
    %18 = arith.divf %17, %16 : vector<112x128xf32>
    %cst_15 = arith.constant 2.000000e+01 : f32
    %19 = vector.broadcast %cst_15 : f32 to vector<112x128xf32>
    %20 = arith.cmpf ogt, %11, %19 : vector<112x128xf32>
    %21 = math.log1p %14 : vector<112x128xf32>
    %22 = arith.select %20, %11, %21 : vector<112x128xi1>, vector<112x128xf32>
    %c64_i32 = arith.constant 64 : i32
    %23 = tpu.dynamic_rotate %22 by %c64_i32 dim 1 : vector<112x128xf32>, i32 -> vector<112x128xf32>
    %24 = arith.mulf %18, %23 : vector<112x128xf32>
    %25 = arith.addf %7, %24 : vector<112x128xf32>
    %c1 = arith.constant 1 : index
    %c0_16 = arith.constant 0 : index
    %c0_17 = arith.constant 0 : index
    %26 = vector.load %arg2[%c1, %c0_16, %c0_17] : memref<8x112x128xf32, #tpu.memory_space<vmem>>, vector<1x112x128xf32>
    %27 = vector.shape_cast %26 : vector<1x112x128xf32> to vector<112x128xf32>
    %cst_18 = arith.constant dense<0.000000e+00> : vector<112x128xf32>
    %28 = tpu.matmul %27, %6, %cst_18 {dimension_numbers = #tpu.dot_dimension_numbers<[1], [0], [0], [1], [0, 0, 1, 1], [], []>} : vector<112x128xf32>, vector<128x128xf32>, vector<112x128xf32> -> vector<112x128xf32>
    %29 = arith.addf %28, %5 : vector<112x128xf32>
    %cst_19 = arith.constant 2.000000e+01 : f32
    %30 = vector.broadcast %cst_19 : f32 to vector<112x128xf32>
    %31 = arith.minimumf %29, %30 : vector<112x128xf32>
    %32 = math.exp %31 : vector<112x128xf32>
    %cst_20 = arith.constant 1.000000e+00 : f32
    %33 = vector.broadcast %cst_20 : f32 to vector<112x128xf32>
    %34 = arith.addf %33, %32 : vector<112x128xf32>
    %cst_21 = arith.constant 1.000000e+00 : f32
    %35 = vector.broadcast %cst_21 : f32 to vector<112x128xf32>
    %36 = arith.divf %35, %34 : vector<112x128xf32>
    %cst_22 = arith.constant 2.000000e+01 : f32
    %37 = vector.broadcast %cst_22 : f32 to vector<112x128xf32>
    %38 = arith.cmpf ogt, %29, %37 : vector<112x128xf32>
    %39 = math.log1p %32 : vector<112x128xf32>
    %40 = arith.select %38, %29, %39 : vector<112x128xi1>, vector<112x128xf32>
    %c64_i32_23 = arith.constant 64 : i32
    %41 = tpu.dynamic_rotate %40 by %c64_i32_23 dim 1 : vector<112x128xf32>, i32 -> vector<112x128xf32>
    %42 = arith.mulf %36, %41 : vector<112x128xf32>
    %43 = arith.addf %25, %42 : vector<112x128xf32>
    %c2 = arith.constant 2 : index
    %c0_24 = arith.constant 0 : index
    %c0_25 = arith.constant 0 : index
    %44 = vector.load %arg2[%c2, %c0_24, %c0_25] : memref<8x112x128xf32, #tpu.memory_space<vmem>>, vector<1x112x128xf32>
    %45 = vector.shape_cast %44 : vector<1x112x128xf32> to vector<112x128xf32>
    %cst_26 = arith.constant dense<0.000000e+00> : vector<112x128xf32>
    %46 = tpu.matmul %45, %6, %cst_26 {dimension_numbers = #tpu.dot_dimension_numbers<[1], [0], [0], [1], [0, 0, 1, 1], [], []>} : vector<112x128xf32>, vector<128x128xf32>, vector<112x128xf32> -> vector<112x128xf32>
    %47 = arith.addf %46, %5 : vector<112x128xf32>
    %cst_27 = arith.constant 2.000000e+01 : f32
    %48 = vector.broadcast %cst_27 : f32 to vector<112x128xf32>
    %49 = arith.minimumf %47, %48 : vector<112x128xf32>
    %50 = math.exp %49 : vector<112x128xf32>
    %cst_28 = arith.constant 1.000000e+00 : f32
    %51 = vector.broadcast %cst_28 : f32 to vector<112x128xf32>
    %52 = arith.addf %51, %50 : vector<112x128xf32>
    %cst_29 = arith.constant 1.000000e+00 : f32
    %53 = vector.broadcast %cst_29 : f32 to vector<112x128xf32>
    %54 = arith.divf %53, %52 : vector<112x128xf32>
    %cst_30 = arith.constant 2.000000e+01 : f32
    %55 = vector.broadcast %cst_30 : f32 to vector<112x128xf32>
    %56 = arith.cmpf ogt, %47, %55 : vector<112x128xf32>
    %57 = math.log1p %50 : vector<112x128xf32>
    %58 = arith.select %56, %47, %57 : vector<112x128xi1>, vector<112x128xf32>
    %c64_i32_31 = arith.constant 64 : i32
    %59 = tpu.dynamic_rotate %58 by %c64_i32_31 dim 1 : vector<112x128xf32>, i32 -> vector<112x128xf32>
    %60 = arith.mulf %54, %59 : vector<112x128xf32>
    %61 = arith.addf %43, %60 : vector<112x128xf32>
    %c3 = arith.constant 3 : index
    %c0_32 = arith.constant 0 : index
    %c0_33 = arith.constant 0 : index
    %62 = vector.load %arg2[%c3, %c0_32, %c0_33] : memref<8x112x128xf32, #tpu.memory_space<vmem>>, vector<1x112x128xf32>
    %63 = vector.shape_cast %62 : vector<1x112x128xf32> to vector<112x128xf32>
    %cst_34 = arith.constant dense<0.000000e+00> : vector<112x128xf32>
    %64 = tpu.matmul %63, %6, %cst_34 {dimension_numbers = #tpu.dot_dimension_numbers<[1], [0], [0], [1], [0, 0, 1, 1], [], []>} : vector<112x128xf32>, vector<128x128xf32>, vector<112x128xf32> -> vector<112x128xf32>
    %65 = arith.addf %64, %5 : vector<112x128xf32>
    %cst_35 = arith.constant 2.000000e+01 : f32
    %66 = vector.broadcast %cst_35 : f32 to vector<112x128xf32>
    %67 = arith.minimumf %65, %66 : vector<112x128xf32>
    %68 = math.exp %67 : vector<112x128xf32>
    %cst_36 = arith.constant 1.000000e+00 : f32
    %69 = vector.broadcast %cst_36 : f32 to vector<112x128xf32>
    %70 = arith.addf %69, %68 : vector<112x128xf32>
    %cst_37 = arith.constant 1.000000e+00 : f32
    %71 = vector.broadcast %cst_37 : f32 to vector<112x128xf32>
    %72 = arith.divf %71, %70 : vector<112x128xf32>
    %cst_38 = arith.constant 2.000000e+01 : f32
    %73 = vector.broadcast %cst_38 : f32 to vector<112x128xf32>
    %74 = arith.cmpf ogt, %65, %73 : vector<112x128xf32>
    %75 = math.log1p %68 : vector<112x128xf32>
    %76 = arith.select %74, %65, %75 : vector<112x128xi1>, vector<112x128xf32>
    %c64_i32_39 = arith.constant 64 : i32
    %77 = tpu.dynamic_rotate %76 by %c64_i32_39 dim 1 : vector<112x128xf32>, i32 -> vector<112x128xf32>
    %78 = arith.mulf %72, %77 : vector<112x128xf32>
    %79 = arith.addf %61, %78 : vector<112x128xf32>
    %c4 = arith.constant 4 : index
    %c0_40 = arith.constant 0 : index
    %c0_41 = arith.constant 0 : index
    %80 = vector.load %arg2[%c4, %c0_40, %c0_41] : memref<8x112x128xf32, #tpu.memory_space<vmem>>, vector<1x112x128xf32>
    %81 = vector.shape_cast %80 : vector<1x112x128xf32> to vector<112x128xf32>
    %cst_42 = arith.constant dense<0.000000e+00> : vector<112x128xf32>
    %82 = tpu.matmul %81, %6, %cst_42 {dimension_numbers = #tpu.dot_dimension_numbers<[1], [0], [0], [1], [0, 0, 1, 1], [], []>} : vector<112x128xf32>, vector<128x128xf32>, vector<112x128xf32> -> vector<112x128xf32>
    %83 = arith.addf %82, %5 : vector<112x128xf32>
    %cst_43 = arith.constant 2.000000e+01 : f32
    %84 = vector.broadcast %cst_43 : f32 to vector<112x128xf32>
    %85 = arith.minimumf %83, %84 : vector<112x128xf32>
    %86 = math.exp %85 : vector<112x128xf32>
    %cst_44 = arith.constant 1.000000e+00 : f32
    %87 = vector.broadcast %cst_44 : f32 to vector<112x128xf32>
    %88 = arith.addf %87, %86 : vector<112x128xf32>
    %cst_45 = arith.constant 1.000000e+00 : f32
    %89 = vector.broadcast %cst_45 : f32 to vector<112x128xf32>
    %90 = arith.divf %89, %88 : vector<112x128xf32>
    %cst_46 = arith.constant 2.000000e+01 : f32
    %91 = vector.broadcast %cst_46 : f32 to vector<112x128xf32>
    %92 = arith.cmpf ogt, %83, %91 : vector<112x128xf32>
    %93 = math.log1p %86 : vector<112x128xf32>
    %94 = arith.select %92, %83, %93 : vector<112x128xi1>, vector<112x128xf32>
    %c64_i32_47 = arith.constant 64 : i32
    %95 = tpu.dynamic_rotate %94 by %c64_i32_47 dim 1 : vector<112x128xf32>, i32 -> vector<112x128xf32>
    %96 = arith.mulf %90, %95 : vector<112x128xf32>
    %97 = arith.addf %79, %96 : vector<112x128xf32>
    %c5 = arith.constant 5 : index
    %c0_48 = arith.constant 0 : index
    %c0_49 = arith.constant 0 : index
    %98 = vector.load %arg2[%c5, %c0_48, %c0_49] : memref<8x112x128xf32, #tpu.memory_space<vmem>>, vector<1x112x128xf32>
    %99 = vector.shape_cast %98 : vector<1x112x128xf32> to vector<112x128xf32>
    %cst_50 = arith.constant dense<0.000000e+00> : vector<112x128xf32>
    %100 = tpu.matmul %99, %6, %cst_50 {dimension_numbers = #tpu.dot_dimension_numbers<[1], [0], [0], [1], [0, 0, 1, 1], [], []>} : vector<112x128xf32>, vector<128x128xf32>, vector<112x128xf32> -> vector<112x128xf32>
    %101 = arith.addf %100, %5 : vector<112x128xf32>
    %cst_51 = arith.constant 2.000000e+01 : f32
    %102 = vector.broadcast %cst_51 : f32 to vector<112x128xf32>
    %103 = arith.minimumf %101, %102 : vector<112x128xf32>
    %104 = math.exp %103 : vector<112x128xf32>
    %cst_52 = arith.constant 1.000000e+00 : f32
    %105 = vector.broadcast %cst_52 : f32 to vector<112x128xf32>
    %106 = arith.addf %105, %104 : vector<112x128xf32>
    %cst_53 = arith.constant 1.000000e+00 : f32
    %107 = vector.broadcast %cst_53 : f32 to vector<112x128xf32>
    %108 = arith.divf %107, %106 : vector<112x128xf32>
    %cst_54 = arith.constant 2.000000e+01 : f32
    %109 = vector.broadcast %cst_54 : f32 to vector<112x128xf32>
    %110 = arith.cmpf ogt, %101, %109 : vector<112x128xf32>
    %111 = math.log1p %104 : vector<112x128xf32>
    %112 = arith.select %110, %101, %111 : vector<112x128xi1>, vector<112x128xf32>
    %c64_i32_55 = arith.constant 64 : i32
    %113 = tpu.dynamic_rotate %112 by %c64_i32_55 dim 1 : vector<112x128xf32>, i32 -> vector<112x128xf32>
    %114 = arith.mulf %108, %113 : vector<112x128xf32>
    %115 = arith.addf %97, %114 : vector<112x128xf32>
    %c6 = arith.constant 6 : index
    %c0_56 = arith.constant 0 : index
    %c0_57 = arith.constant 0 : index
    %116 = vector.load %arg2[%c6, %c0_56, %c0_57] : memref<8x112x128xf32, #tpu.memory_space<vmem>>, vector<1x112x128xf32>
    %117 = vector.shape_cast %116 : vector<1x112x128xf32> to vector<112x128xf32>
    %cst_58 = arith.constant dense<0.000000e+00> : vector<112x128xf32>
    %118 = tpu.matmul %117, %6, %cst_58 {dimension_numbers = #tpu.dot_dimension_numbers<[1], [0], [0], [1], [0, 0, 1, 1], [], []>} : vector<112x128xf32>, vector<128x128xf32>, vector<112x128xf32> -> vector<112x128xf32>
    %119 = arith.addf %118, %5 : vector<112x128xf32>
    %cst_59 = arith.constant 2.000000e+01 : f32
    %120 = vector.broadcast %cst_59 : f32 to vector<112x128xf32>
    %121 = arith.minimumf %119, %120 : vector<112x128xf32>
    %122 = math.exp %121 : vector<112x128xf32>
    %cst_60 = arith.constant 1.000000e+00 : f32
    %123 = vector.broadcast %cst_60 : f32 to vector<112x128xf32>
    %124 = arith.addf %123, %122 : vector<112x128xf32>
    %cst_61 = arith.constant 1.000000e+00 : f32
    %125 = vector.broadcast %cst_61 : f32 to vector<112x128xf32>
    %126 = arith.divf %125, %124 : vector<112x128xf32>
    %cst_62 = arith.constant 2.000000e+01 : f32
    %127 = vector.broadcast %cst_62 : f32 to vector<112x128xf32>
    %128 = arith.cmpf ogt, %119, %127 : vector<112x128xf32>
    %129 = math.log1p %122 : vector<112x128xf32>
    %130 = arith.select %128, %119, %129 : vector<112x128xi1>, vector<112x128xf32>
    %c64_i32_63 = arith.constant 64 : i32
    %131 = tpu.dynamic_rotate %130 by %c64_i32_63 dim 1 : vector<112x128xf32>, i32 -> vector<112x128xf32>
    %132 = arith.mulf %126, %131 : vector<112x128xf32>
    %133 = arith.addf %115, %132 : vector<112x128xf32>
    %c7 = arith.constant 7 : index
    %c0_64 = arith.constant 0 : index
    %c0_65 = arith.constant 0 : index
    %134 = vector.load %arg2[%c7, %c0_64, %c0_65] : memref<8x112x128xf32, #tpu.memory_space<vmem>>, vector<1x112x128xf32>
    %135 = vector.shape_cast %134 : vector<1x112x128xf32> to vector<112x128xf32>
    %cst_66 = arith.constant dense<0.000000e+00> : vector<112x128xf32>
    %136 = tpu.matmul %135, %6, %cst_66 {dimension_numbers = #tpu.dot_dimension_numbers<[1], [0], [0], [1], [0, 0, 1, 1], [], []>} : vector<112x128xf32>, vector<128x128xf32>, vector<112x128xf32> -> vector<112x128xf32>
    %137 = arith.addf %136, %5 : vector<112x128xf32>
    %cst_67 = arith.constant 2.000000e+01 : f32
    %138 = vector.broadcast %cst_67 : f32 to vector<112x128xf32>
    %139 = arith.minimumf %137, %138 : vector<112x128xf32>
    %140 = math.exp %139 : vector<112x128xf32>
    %cst_68 = arith.constant 1.000000e+00 : f32
    %141 = vector.broadcast %cst_68 : f32 to vector<112x128xf32>
    %142 = arith.addf %141, %140 : vector<112x128xf32>
    %cst_69 = arith.constant 1.000000e+00 : f32
    %143 = vector.broadcast %cst_69 : f32 to vector<112x128xf32>
    %144 = arith.divf %143, %142 : vector<112x128xf32>
    %cst_70 = arith.constant 2.000000e+01 : f32
    %145 = vector.broadcast %cst_70 : f32 to vector<112x128xf32>
    %146 = arith.cmpf ogt, %137, %145 : vector<112x128xf32>
    %147 = math.log1p %140 : vector<112x128xf32>
    %148 = arith.select %146, %137, %147 : vector<112x128xi1>, vector<112x128xf32>
    %c64_i32_71 = arith.constant 64 : i32
    %149 = tpu.dynamic_rotate %148 by %c64_i32_71 dim 1 : vector<112x128xf32>, i32 -> vector<112x128xf32>
    %150 = arith.mulf %144, %149 : vector<112x128xf32>
    %151 = arith.addf %133, %150 : vector<112x128xf32>
    %152 = vector.extract_strided_slice %151 {offsets = [0, 0], sizes = [112, 64], strides = [1, 1]} : vector<112x128xf32> to vector<112x64xf32>
    %c0_72 = arith.constant 0 : index
    %c0_73 = arith.constant 0 : index
    %153 = vector.load %arg6[%c0_72, %c0_73] : memref<1x64xf32, #tpu.memory_space<vmem>>, vector<1x64xf32>
    %154 = vector.broadcast %153 : vector<1x64xf32> to vector<112x64xf32>
    %155 = arith.mulf %152, %154 : vector<112x64xf32>
    %c0_74 = arith.constant 0 : index
    %c0_75 = arith.constant 0 : index
    %156 = vector.load %arg7[%c0_74, %c0_75] : memref<1x64xf32, #tpu.memory_space<vmem>>, vector<1x64xf32>
    %157 = vector.broadcast %156 : vector<1x64xf32> to vector<112x64xf32>
    %158 = arith.addf %155, %157 : vector<112x64xf32>
    %c0_76 = arith.constant 0 : index
    %c0_77 = arith.constant 0 : index
    %159 = vector.load %arg1[%c0_76, %c0_77] : memref<112x64xf32, #tpu.memory_space<vmem>>, vector<112x64xf32>
    %160 = arith.addf %159, %158 : vector<112x64xf32>
    %cst_78 = arith.constant 2.000000e+01 : f32
    %161 = vector.broadcast %cst_78 : f32 to vector<112x64xf32>
    %162 = arith.cmpf ogt, %160, %161 : vector<112x64xf32>
    %cst_79 = arith.constant 2.000000e+01 : f32
    %163 = vector.broadcast %cst_79 : f32 to vector<112x64xf32>
    %164 = arith.minimumf %160, %163 : vector<112x64xf32>
    %165 = math.exp %164 : vector<112x64xf32>
    %166 = math.log1p %165 : vector<112x64xf32>
    %167 = arith.select %162, %160, %166 : vector<112x64xi1>, vector<112x64xf32>
    %c0_80 = arith.constant 0 : index
    %c0_81 = arith.constant 0 : index
    %168 = vector.load %arg8[%c0_80, %c0_81] : memref<112x64xf32, #tpu.memory_space<vmem>>, vector<112x64xf32>
    tpu.vector_store %arg8[%c0_80, %c0_81], %167 {strides = array<i32>} : memref<112x64xf32, #tpu.memory_space<vmem>>, vector<112x64xf32>,
    return
  }
  func.func @transform_0(%arg0: i32) -> (i32, i32) {
    %c0_i32 = arith.constant 0 : i32
    %c0_i32_0 = arith.constant 0 : i32
    return %arg0, %c0_i32 : i32, i32
  }
  func.func @transform_1(%arg0: i32) -> (i32, i32, i32) {
    %c0_i32 = arith.constant 0 : i32
    %c0_i32_0 = arith.constant 0 : i32
    %c0_i32_1 = arith.constant 0 : i32
    return %c0_i32, %arg0, %c0_i32_0 : i32, i32, i32
  }
  func.func @transform_2(%arg0: i32) -> (i32, i32) {
    %c0_i32 = arith.constant 0 : i32
    %c0_i32_0 = arith.constant 0 : i32
    %c0_i32_1 = arith.constant 0 : i32
    return %c0_i32, %c0_i32_0 : i32, i32
  }
  func.func @transform_3(%arg0: i32) -> (i32, i32) {
    %c0_i32 = arith.constant 0 : i32
    %c0_i32_0 = arith.constant 0 : i32
    %c0_i32_1 = arith.constant 0 : i32
    return %c0_i32, %c0_i32_0 : i32, i32
  }
  func.func @transform_4(%arg0: i32) -> (i32, i32) {
    %c0_i32 = arith.constant 0 : i32
    %c0_i32_0 = arith.constant 0 : i32
    %c0_i32_1 = arith.constant 0 : i32
    return %c0_i32, %c0_i32_0 : i32, i32
  }
  func.func @transform_5(%arg0: i32) -> (i32, i32) {
    %c0_i32 = arith.constant 0 : i32
    %c0_i32_0 = arith.constant 0 : i32
    %c0_i32_1 = arith.constant 0 : i32
    return %c0_i32, %c0_i32_0 : i32, i32
  }
  func.func @transform_6(%arg0: i32) -> (i32, i32) {
    %c0_i32 = arith.constant 0 : i32
    %c0_i32_0 = arith.constant 0 : i32
    %c0_i32_1 = arith.constant 0 : i32
    return %c0_i32, %c0_i32_0 : i32, i32
  }
  func.func @transform_7(%arg0: i32) -> (i32, i32) {
    %c0_i32 = arith.constant 0 : i32
    %c0_i32_0 = arith.constant 0 : i32
    return %arg0, %c0_i32 : i32, i32
  }
}

</mosaic_0001>

<bundles_post_ra>
// kernel: tpu_custom_call.1
= control target key start
LH: loop header
LB: loop body
LE: loop exit
PB: predicated region body
PF: predicated region fallthrough
CT: control target
= control target key end

     0   :  { %12 = vsyncpa [#allocation3], 0  ;;  %s9947_s0 = inlined_call_operand.vmem [shape: f32[224,64], index: 0, kind: input, shape index: {}]   ;;  %s9948_s1 = inlined_call_operand.hbm [shape: f32[8,224,128], index: 1, kind: input, shape index: {}]   ;;  %s9949_s2 = inlined_call_operand.vmem [shape: f32[64,128], index: 2, kind: input, shape index: {}]   ;;  %s9950_s3 = inlined_call_operand.vmem [shape: f32[128,128], index: 3, kind: input, shape index: {}]   ;;  %s9951_s4 = inlined_call_operand.vmem [shape: f32[1,128], index: 4, kind: input, shape index: {}]   ;;  %s9952_s5 = inlined_call_operand.vmem [shape: f32[1,64], index: 5, kind: input, shape index: {}]   ;;  %s9953_s6 = inlined_call_operand.vmem [shape: f32[1,64], index: 6, kind: input, shape index: {}]   ;;  %s9954_s7 = inlined_call_operand.vmem [shape: f32[224,64], index: 7, kind: output, shape index: {}]  }
   0x1   :  { %14 = vsyncpa [#allocation3 + $0x1], 0  ;;  %s6481_s24 = smov 0   ;;  %s6483_s25 = smov 0  }
   0x2   :  { %s6485_s26 = smov 0   ;;  %s6487_s27 = smov 0  }
   0x3 LB: > { %s4467_s28 = sadd.s32 4294967295, %s6432_s27   ;;  %s6501_s29 = sadd.s32 1, %s6432_s27   ;;  %s6432_s27 = sphi %s6487_s27, %s10993_s27   ;;  %s6428_s26 = sphi %s6485_s26, %s10992_s26   ;;  %s6424_s25 = sphi %s6483_s25, %s10991_s25   ;;  %s6420_s24 = sphi %s6481_s24, %s10990_s24  }
   0x4   : > { %s50_s30 = ssub.s32 %s6432_s27, %s6501_s29  ;;  %s53_s8 = sadd.s32 1, %s6428_s26 }
   0x5   : > { %p51_p0 = scmp.eq.s32.totalorder %s50_s30, 0  ;;  %p60_p1 = scmp.ne.s32.totalorder %s6428_s26, %s6424_s25 }
   0x6   : > { %p61_p2 = scmp.eq.s32.totalorder %s6432_s27, 0  ;;  %p66_p3 = scmp.ne.s32.totalorder %s6424_s25, %s6420_s24 }
   0x7   : > { %s6511_s9 = scalar_select %p51_p0, %s6428_s26, %s53_s8  }
   0x8   : > { %p6513_p4 = por %p61_p2, %p60_p1  ;;  %p67_p5 = scmp.eq.s32.totalorder %s4467_s28, 0 }
   0x9   : > { %p4470_p7 = scmp.ge.s32.totalorder %s6432_s27, 2 }
   0xa   : > { %p6519_p6 = por %p67_p5, %p66_p3 }
   0xb   : > { %232 = sbr.rel (%p4470_p7) target bundleno = 32 (0x20), region = 36 }
  0x12   : > { %s245_s12 = sand.u32 1, %s6428_s26   ;;  %s4594_s13 = smul.u32 1792, %s6432_s27 }
  0x13   : > { %s5606_s14 = smul.u32 896, %s245_s12  ;;  %s6434_s15 = smov 3584  }
  0x14   : > { %5609 = sst [smem:[#allocation5]] (%p6513_p4), %s6434_s15  ;;  %s255_s19 = scalar_lea.hbm %s9948_s1, %s4594_s13 }
  0x15   : > { %s5608_s16 = scalar_select %p6513_p4, [#allocation0], [#allocation6] }
  0x16   : > { %s249_s21 = scalar_lea.vmem [#allocation2], %s5606_s14  ;;  %s6435_s23 = smov 1792  }
  0x17   : > { %s260_s20 = sld [smem:[%s5608_s16]]   ;;  %s268_s22 = sshll.u32 %s249_s21, 4  ;;  %s269_s22 = int_to_ptr.vmem [resolvable:$true] %s268_s22 }
  0x18   : > { %5610 = sst [smem:[#allocation5 + $0x1]] (%p6513_p4), %s6435_s23  ;;  %s6436_s24 = smov 14  }
  0x19   : > { %5611 = sst [smem:[#allocation5 + $0x2]] (%p6513_p4), %s6436_s24  ;;  %s6437_s30 = smov 128  }
  0x1a   : > { %5612 = sst [smem:[#allocation5 + $0x3]] (%p6513_p4), %s6437_s30  ;;  %s6438_s8 = smov 8  }
  0x1b   : > { %5613 = sst [smem:[#allocation5 + $0x4]] (%p6513_p4), %s6437_s30  ;;  %s246_s14 = scalar_lea.sflag [#allocation3], %s245_s12 }
  0x1c   : > { %5614 = sst [smem:[#allocation5 + $0x5]] (%p6513_p4), %s6438_s8  ;;  %s6439_s16 = smov [#allocation4]  }
  0x1d   : > { %s4472_s13 = sshll.u32 %s260_s20, 26 }
  0x1e   : > { %s4473_s15 = sadd.s32 134217728, %s4472_s13 }
  0x1f   : > { %5615 = dma.general (%p6513_p4), %s255_s19, 14336, %s269_s22, %s246_s14, %s6439_s16, [#allocation5], %s4473_s15, 0  }
  0x20 PF: > { %p4474_p8 = scmp.ge.s32.totalorder %s6432_s27, 1  ;;  %p289_p9 = scmp.lt.s32.totalorder %s6432_s27, 3 }
  0x22   : > { %p290_p10 = pnand %p4474_p8, %p289_p9 }
  0x24   : > { %293 = sbr.rel (%p290_p10) target bundleno = 926 (0x39e), region = 48 }
  0x2b   : > { %s295_s17 = sand.u32 1, %s6424_s25  }
  0x2c   : > { %s5607_s18 = smul.u32 896, %s295_s17  ;;  %s296_s21 = scalar_lea.sflag [#allocation3], %s295_s17 }
  0x2e   : > { %s6548_s23 = scalar_lea.vmem [#allocation2], %s5607_s18 }
  0x2f   : > { %6415 = dma.done.wait (%p6519_p6), %s296_s21, 14336  }
  0x30   : > { %6417 = vsyncadd (%p6519_p6), %s296_s21, 4294952960  ;;  %s335_s10 = smul.u32 14, %s4467_s28  ;;  %v362_v0 = vld [vmem:[%s9949_s2] sm:$0xff]  ;;  %v363_v1 = vld [vmem:[%s9949_s2 + $0x8] sm:$0xff]  ;;  %vm377_vm0 = vcmask 523264  }
  0x31   : > { %v555_v2 = vld [vmem:[%s9950_s3] sm:$0xff]  ;;  %v5318_v3 = vpack.c.bf16 %v363_v1, %v362_v0  ;;  %v556_v4 = vld [vmem:[%s9950_s3 + $0x8] sm:$0xff]  ;;  %v364_v5 = vld [vmem:[%s9949_s2 + $0x10] sm:$0xff] }
  0x32   : > { %p336_p11 = scmp.lt.s32.totalorder %s335_s10, 27  ;;  %v365_v6 = vld [vmem:[%s9949_s2 + $0x18] sm:$0xff]  ;;  %v6577_v7 = vpack.c.bf16 %v556_v4, %v555_v2  ;;  %v557_v9 = vld [vmem:[%s9950_s3 + $0x10] sm:$0xff]  ;;  %v366_v11 = vld [vmem:[%s9949_s2 + $0x20] sm:$0xff] }
  0x33   : > { %v5322_v8 = vpack.c.bf16 %v365_v6, %v364_v5  ;;  %v558_v10 = vld [vmem:[%s9950_s3 + $0x18] sm:$0xff]  ;;  %5319 = vmatprep.subr.bf16.mxu0 %v5318_v3  ;;  %v367_v13 = vld [vmem:[%s9949_s2 + $0x28] sm:$0xff]  ;;  %v559_v14 = vld [vmem:[%s9950_s3 + $0x20] sm:$0xff] }
  0x34   : > { %s10995_s10 = smov (!%p336_p11, %s335_s10), 27  ;;  %v6595_v12 = vpack.c.bf16 %v558_v10, %v557_v9  ;;  %v560_v15 = vld [vmem:[%s9950_s3 + $0x28] sm:$0xff]  ;;  %5335 = vmatprep.subr.bf16.mxu1 %v6577_v7  ;;  %5321 = vmatpush3.bf16.msra.mxu0 %v5318_v3  ;;  %v5326_v16 = vpack.c.bf16 %v367_v13, %v366_v11  ;;  %v368_v19 = vld [vmem:[%s9949_s2 + $0x30] sm:$0xff]  ;;  %v369_v20 = vld [vmem:[%s9949_s2 + $0x38] sm:$0xff] }
  0x35   : > { %s4475_s12 = sshll.u32 %s10995_s10, 3  ;;  %5337 = vmatpush3.bf16.msra.mxu1 %v6577_v7  ;;  %5323 = vmatprep.subr.bf16.mxu0 %v5322_v8  ;;  %v6610_v18 = vpack.c.bf16 %v560_v15, %v559_v14  ;;  %v561_v21 = vld [vmem:[%s9950_s3 + $0x30] sm:$0xff]  ;;  %v562_v22 = vld [vmem:[%s9950_s3 + $0x38] sm:$0xff]  ;;  %v5330_v23 = vpack.c.bf16 %v369_v20, %v368_v19  ;;  %v571_v25 = vld [vmem:[%s6548_s23] sm:$0xff] }
  0x36   : > { %s6593_s30 = scalar_lea.vmem %s9947_s0, %s4475_s12  ;;  %5339 = vmatprep.subr.bf16.mxu1 %v6595_v12  ;;  %v6627_v24 = vpack.c.bf16 %v562_v22, %v561_v21  ;;  %v563_v26 = vld [vmem:[%s9950_s3 + $0x40] sm:$0xff]  ;;  %v564_v27 = vld [vmem:[%s9950_s3 + $0x48] sm:$0xff]  ;;  %4926 = vmatprep.mubr.f32.mxu1 %v571_v25  ;;  %v565_v29 = vld [vmem:[%s9950_s3 + $0x50] sm:$0xff]  ;;  %s9754_s17 = scalar_lea.vmem %s9954_s7, %s4475_s12 }
  0x37   : > { %v348_v17 = vld [vmem:[%s6593_s30] sm:$0xff]  ;;  %v6638_v28 = vpack.c.bf16 %v564_v27, %v563_v26  ;;  %v566_v30 = vld [vmem:[%s9950_s3 + $0x58] sm:$0xff]  ;;  %v349_v31 = vld [vmem:[%s6593_s30 + $0x8] sm:$0xff] }
  0x38   : > { %4873 = vmatprep.mubr.msk.f32.mxu0 %vm377_vm0, %v348_v17  ;;  %5325 = vmatpush3.bf16.msra.mxu0 %v5322_v8  ;;  %v350_v32 = vld [vmem:[%s6593_s30 + $0x10] sm:$0xff]  ;;  %v6651_v33 = vpack.c.bf16 %v566_v30, %v565_v29  ;;  %v567_v34 = vld [vmem:[%s9950_s3 + $0x60] sm:$0xff]  ;;  %v568_v35 = vld [vmem:[%s9950_s3 + $0x68] sm:$0xff] }
  0x39   : > { %5341 = vmatpush3.bf16.msra.mxu1 %v6595_v12  ;;  %5327 = vmatprep.subr.bf16.mxu0 %v5326_v16  ;;  %v351_v36 = vld [vmem:[%s6593_s30 + $0x18] sm:$0xff]  ;;  %v352_v37 = vld [vmem:[%s6593_s30 + $0x20] sm:$0xff]  ;;  %v6667_v38 = vpack.c.bf16 %v568_v35, %v567_v34  ;;  %v569_v39 = vld [vmem:[%s9950_s3 + $0x70] sm:$0xff] }
  0x3a   : > { %5343 = vmatprep.subr.bf16.mxu1 %v6610_v18  ;;  %v570_v40 = vld [vmem:[%s9950_s3 + $0x78] sm:$0xff]  ;;  %v353_v41 = vld [vmem:[%s6593_s30 + $0x28] sm:$0xff]  ;;  %v354_v42 = vld [vmem:[%s6593_s30 + $0x30] sm:$0xff] }
  0x3b   : > { %v6683_v43 = vpack.c.bf16 %v570_v40, %v569_v39  ;;  %v355_v44 = vld [vmem:[%s6593_s30 + $0x38] sm:$0xff]  ;;  %v356_v45 = vld [vmem:[%s6593_s30 + $0x40] sm:$0xff]  ;;  %v357_v46 = vld [vmem:[%s6593_s30 + $0x48] sm:$0xff] }
  0x3c   : > { %5329 = vmatpush3.bf16.msra.mxu0 %v5326_v16  ;;  %v572_v47 = vld [vmem:[%s6548_s23 + $0x8] sm:$0xff]  ;;  %v573_v48 = vld [vmem:[%s6548_s23 + $0x10] sm:$0xff]  ;;  %v574_v50 = vld [vmem:[%s6548_s23 + $0x18] sm:$0xff] }
  0x3d   : > { %5345 = vmatpush3.bf16.msra.mxu1 %v6610_v18  ;;  %5331 = vmatprep.subr.bf16.mxu0 %v5330_v23  ;;  %v358_v49 = vld [vmem:[%s6593_s30 + $0x50] sm:$0xff]  ;;  %v575_v51 = vld [vmem:[%s6548_s23 + $0x20] sm:$0xff]  ;;  %v359_v52 = vld [vmem:[%s6593_s30 + $0x58] sm:$0xff] }
  0x3e   : > { %5347 = vmatprep.subr.bf16.mxu1 %v6627_v24  ;;  %v360_v53 = vld [vmem:[%s6593_s30 + $0x60] sm:$0xff]  ;;  %v576_v54 = vld [vmem:[%s6548_s23 + $0x28] sm:$0xff]  ;;  %v577_v55 = vld [vmem:[%s6548_s23 + $0x30] sm:$0xff] }
  0x3f   : > { %v361_v56 = vld [vmem:[%s6593_s30 + $0x68] sm:$0xff]  ;;  %v4492_v57 = vld [vmem:[%s6548_s23 + $0x70] sm:$0xff]  ;;  %v578_v58 = vld [vmem:[%s6548_s23 + $0x38] sm:$0xff] }
  0x40   : > { %5333 = vmatpush3.bf16.msra.mxu0 %v5330_v23  ;;  %v579_v59 = vld [vmem:[%s6548_s23 + $0x40] sm:$0xff]  ;;  %v4493_v60 = vld [vmem:[%s6548_s23 + $0x78] sm:$0xff]  ;;  %v580_v61 = vld [vmem:[%s6548_s23 + $0x48] sm:$0xff] }
  0x41   : > { %5349 = vmatpush3.bf16.msra.mxu1 %v6627_v24  ;;  %5367 = vmatprep.subr.bf16.mxu0 %v6577_v7  ;;  %v581_v62 = vld [vmem:[%s6548_s23 + $0x50] sm:$0xff]  ;;  %v4494_v63 = vld [vmem:[%s6548_s23 + $0x80] sm:$0xff]  ;;  %v4495_v0 = vld [vmem:[%s6548_s23 + $0x88] sm:$0xff] }
  0x42   : > { %5351 = vmatprep.subr.bf16.mxu1 %v6638_v28  ;;  %v582_v1 = vld [vmem:[%s6548_s23 + $0x58] sm:$0xff]  ;;  %v583_v2 = vld [vmem:[%s6548_s23 + $0x60] sm:$0xff]  ;;  %v4496_v3 = vld [vmem:[%s6548_s23 + $0x90] sm:$0xff] }
  0x43   : > { %4874 = vmatmul.mubr.msk.f32.vlgmr.msra.gmra.mrb[0].mxu0 %vm377_vm0, %v349_v31  ;;  %v4497_v4 = vld [vmem:[%s6548_s23 + $0x98] sm:$0xff]  ;;  %v584_v5 = vld [vmem:[%s6548_s23 + $0x68] sm:$0xff]  ;;  %v4498_v6 = vld [vmem:[%s6548_s23 + $0xa0] sm:$0xff] }
  0x44   : > { %5369 = vmatpush3.bf16.msra.mxu0 %v6577_v7  ;;  %4876 = vmatprep.mubr.msk.f32.mxu0 %vm377_vm0, %v350_v32  ;;  %v4499_v8 = vld [vmem:[%s6548_s23 + $0xa8] sm:$0xff]  ;;  %v4506_v9 = vld [vmem:[%s6548_s23 + $0xe0] sm:$0xff]  ;;  %v4500_v10 = vld [vmem:[%s6548_s23 + $0xb0] sm:$0xff] }
  0x45   : > { %5353 = vmatpush3.bf16.msra.mxu1 %v6638_v28  ;;  %5371 = vmatprep.subr.bf16.mxu0 %v6595_v12  ;;  %v4501_v11 = vld [vmem:[%s6548_s23 + $0xb8] sm:$0xff]  ;;  %v4507_v13 = vld [vmem:[%s6548_s23 + $0xe8] sm:$0xff]  ;;  %v4502_v14 = vld [vmem:[%s6548_s23 + $0xc0] sm:$0xff] }
  0x46   : > { %5355 = vmatprep.subr.bf16.mxu1 %v6651_v33  ;;  %v4508_v15 = vld [vmem:[%s6548_s23 + $0xf0] sm:$0xff]  ;;  %v4503_v16 = vld [vmem:[%s6548_s23 + $0xc8] sm:$0xff]  ;;  %v4509_v17 = vld [vmem:[%s6548_s23 + $0xf8] sm:$0xff] }
  0x47   : > { %4877 = vmatmul.mubr.msk.f32.gmra.mrb[2].mxu0 %vm377_vm0, %v351_v36  ;;  %v4504_v19 = vld [vmem:[%s6548_s23 + $0xd0] sm:$0xff]  ;;  %v4510_v20 = vld [vmem:[%s6548_s23 + $0x100] sm:$0xff]  ;;  %v4505_v21 = vld [vmem:[%s6548_s23 + $0xd8] sm:$0xff] }
  0x48   : > { %5373 = vmatpush3.bf16.msra.mxu0 %v6595_v12  ;;  %4879 = vmatprep.mubr.msk.f32.mxu0 %vm377_vm0, %v352_v37  ;;  %v4511_v22 = vld [vmem:[%s6548_s23 + $0x108] sm:$0xff]  ;;  %v4512_v23 = vld [vmem:[%s6548_s23 + $0x110] sm:$0xff]  ;;  %v4513_v26 = vld [vmem:[%s6548_s23 + $0x118] sm:$0xff] }
  0x49   : > { %5357 = vmatpush3.bf16.msra.mxu1 %v6651_v33  ;;  %5375 = vmatprep.subr.bf16.mxu0 %v6610_v18  ;;  %v4520_v25 = vld [vmem:[%s6548_s23 + $0x150] sm:$0xff]  ;;  %v4514_v27 = vld [vmem:[%s6548_s23 + $0x120] sm:$0xff]  ;;  %v4521_v29 = vld [vmem:[%s6548_s23 + $0x158] sm:$0xff] }
  0x4a   : > { %5359 = vmatprep.subr.bf16.mxu1 %v6667_v38  ;;  %v4515_v30 = vld [vmem:[%s6548_s23 + $0x128] sm:$0xff]  ;;  %v4516_v31 = vld [vmem:[%s6548_s23 + $0x130] sm:$0xff]  ;;  %v4522_v32 = vld [vmem:[%s6548_s23 + $0x160] sm:$0xff] }
  0x4b   : > { %4880 = vmatmul.mubr.msk.f32.gmra.mrb[4].mxu0 %vm377_vm0, %v353_v41  ;;  %v4523_v34 = vld [vmem:[%s6548_s23 + $0x168] sm:$0xff]  ;;  %v4517_v35 = vld [vmem:[%s6548_s23 + $0x138] sm:$0xff]  ;;  %v4518_v36 = vld [vmem:[%s6548_s23 + $0x140] sm:$0xff] }
  0x4c   : > { %5377 = vmatpush3.bf16.msra.mxu0 %v6610_v18  ;;  %4882 = vmatprep.mubr.msk.f32.mxu0 %vm377_vm0, %v354_v42  ;;  %v4524_v37 = vld [vmem:[%s6548_s23 + $0x170] sm:$0xff]  ;;  %v4525_v39 = vld [vmem:[%s6548_s23 + $0x178] sm:$0xff]  ;;  %v4519_v40 = vld [vmem:[%s6548_s23 + $0x148] sm:$0xff] }
  0x4d   : > { %5361 = vmatpush3.bf16.msra.mxu1 %v6667_v38  ;;  %5379 = vmatprep.subr.bf16.mxu0 %v6627_v24  ;;  %v4526_v41 = vld [vmem:[%s6548_s23 + $0x180] sm:$0xff]  ;;  %v4527_v42 = vld [vmem:[%s6548_s23 + $0x188] sm:$0xff] }
  0x4e   : > { %5363 = vmatprep.subr.bf16.mxu1 %v6683_v43 }
  0x4f   : > { %4883 = vmatmul.mubr.msk.f32.gmra.mrb[6].mxu0 %vm377_vm0, %v355_v44  ;;  %v4534_v44 = vld [vmem:[%s6548_s23 + $0x1c0] sm:$0xff] }
  0x50   : > { %5381 = vmatpush3.bf16.msra.mxu0 %v6627_v24  ;;  %4885 = vmatprep.mubr.msk.f32.mxu0 %vm377_vm0, %v356_v45  ;;  %v4528_v45 = vld [vmem:[%s6548_s23 + $0x190] sm:$0xff] }
  0x51   : > { %5365 = vmatpush3.bf16.msra.mxu1 %v6683_v43  ;;  %5383 = vmatprep.subr.bf16.mxu0 %v6638_v28 }
  0x52   : > { %5399 = vmatprep.subr.bf16.mxu1 %v6577_v7 }
  0x53   : > { %4886 = vmatmul.mubr.msk.f32.gmra.mrb[8].mxu0 %vm377_vm0, %v357_v46  ;;  %v4529_v46 = vld [vmem:[%s6548_s23 + $0x198] sm:$0xff] }
  0x54   : > { %4927 = vmatmul.mubr.f32.vlgmr.msra.gmra.mrb[0].mxu1 %v572_v47  ;;  %5385 = vmatpush3.bf16.msra.mxu0 %v6638_v28  ;;  %v4535_v47 = vld [vmem:[%s6548_s23 + $0x1c8] sm:$0xff] }
  0x55   : > { %5401 = vmatpush3.bf16.msra.mxu1 %v6577_v7  ;;  %4929 = vmatprep.mubr.f32.mxu1 %v573_v48  ;;  %v4530_v48 = vld [vmem:[%s6548_s23 + $0x1a0] sm:$0xff] }
  0x56   : > { %5387 = vmatprep.subr.bf16.mxu0 %v6651_v33  ;;  %5403 = vmatprep.subr.bf16.mxu1 %v6595_v12 }
  0x57   : > { %4888 = vmatprep.mubr.msk.f32.mxu0 %vm377_vm0, %v358_v49  ;;  %v4536_v49 = vld [vmem:[%s6548_s23 + $0x1d0] sm:$0xff] }
  0x58   : > { %4930 = vmatmul.mubr.f32.gmra.mrb[2].mxu1 %v574_v50  ;;  %5389 = vmatpush3.bf16.msra.mxu0 %v6651_v33  ;;  %v4531_v50 = vld [vmem:[%s6548_s23 + $0x1a8] sm:$0xff] }
  0x59   : > { %5405 = vmatpush3.bf16.msra.mxu1 %v6595_v12  ;;  %4932 = vmatprep.mubr.f32.mxu1 %v575_v51  ;;  %v4537_v51 = vld [vmem:[%s6548_s23 + $0x1d8] sm:$0xff] }
  0x5a   : > { %4889 = vmatmul.mubr.msk.f32.gmra.mrb[10].mxu0 %vm377_vm0, %v359_v52  ;;  %5391 = vmatprep.subr.bf16.mxu0 %v6667_v38  ;;  %v4532_v52 = vld [vmem:[%s6548_s23 + $0x1b0] sm:$0xff] }
  0x5b   : > { %5407 = vmatprep.subr.bf16.mxu1 %v6610_v18  ;;  %4891 = vmatprep.mubr.msk.f32.mxu0 %vm377_vm0, %v360_v53  ;;  %v4538_v53 = vld [vmem:[%s6548_s23 + $0x1e0] sm:$0xff] }
  0x5c   : > { %4933 = vmatmul.mubr.f32.gmra.mrb[4].mxu1 %v576_v54  ;;  %5393 = vmatpush3.bf16.msra.mxu0 %v6667_v38  ;;  %v4533_v54 = vld [vmem:[%s6548_s23 + $0x1b8] sm:$0xff] }
  0x5d   : > { %5409 = vmatpush3.bf16.msra.mxu1 %v6610_v18  ;;  %4935 = vmatprep.mubr.f32.mxu1 %v577_v55  ;;  %v4539_v55 = vld [vmem:[%s6548_s23 + $0x1e8] sm:$0xff] }
  0x5e   : > { %4892 = vmatmul.mubr.msk.f32.gmra.mrb[12].mxu0 %vm377_vm0, %v361_v56  ;;  %5395 = vmatprep.subr.bf16.mxu0 %v6683_v43  ;;  %v4540_v56 = vld [vmem:[%s6548_s23 + $0x1f0] sm:$0xff] }
  0x5f   : > { %5411 = vmatprep.subr.bf16.mxu1 %v6627_v24  ;;  %4979 = vmatprep.mubr.f32.mxu0 %v4492_v57  ;;  %v4548_v57 = vld [vmem:[%s6548_s23 + $0x230] sm:$0xff] }
  0x60   : > { %4936 = vmatmul.mubr.f32.gmra.mrb[6].mxu1 %v578_v58  ;;  %5397 = vmatpush3.bf16.msra.mxu0 %v6683_v43  ;;  %v4541_v58 = vld [vmem:[%s6548_s23 + $0x1f8] sm:$0xff] }
  0x61   : > { %5413 = vmatpush3.bf16.msra.mxu1 %v6627_v24  ;;  %4938 = vmatprep.mubr.f32.mxu1 %v579_v59  ;;  %v4542_v59 = vld [vmem:[%s6548_s23 + $0x200] sm:$0xff] }
  0x62   : > { %5415 = vmatprep.subr.bf16.mxu1 %v6638_v28  ;;  %5431 = vmatprep.subr.bf16.mxu0 %v6577_v7 }
  0x63   : > { %4980 = vmatmul.mubr.f32.vlgmr.msra.gmra.mrb[14].mxu0 %v4493_v60  ;;  %v4549_v60 = vld [vmem:[%s6548_s23 + $0x238] sm:$0xff] }
  0x64   : > { %4939 = vmatmul.mubr.f32.gmra.mrb[8].mxu1 %v580_v61  ;;  %5433 = vmatpush3.bf16.msra.mxu0 %v6577_v7  ;;  %v4543_v61 = vld [vmem:[%s6548_s23 + $0x208] sm:$0xff] }
  0x65   : > { %5417 = vmatpush3.bf16.msra.mxu1 %v6638_v28  ;;  %4941 = vmatprep.mubr.f32.mxu1 %v581_v62  ;;  %v4544_v62 = vld [vmem:[%s6548_s23 + $0x210] sm:$0xff] }
  0x66   : > { %4982 = vmatprep.mubr.f32.mxu0 %v4494_v63  ;;  %5419 = vmatprep.subr.bf16.mxu1 %v6651_v33  ;;  %v4550_v63 = vld [vmem:[%s6548_s23 + $0x240] sm:$0xff] }
  0x67   : > { %4983 = vmatmul.mubr.f32.gmra.mrb[16].mxu0 %v4495_v0  ;;  %5435 = vmatprep.subr.bf16.mxu0 %v6595_v12  ;;  %v4551_v0 = vld [vmem:[%s6548_s23 + $0x248] sm:$0xff] }
  0x68   : > { %4942 = vmatmul.mubr.f32.gmra.mrb[10].mxu1 %v582_v1  ;;  %5437 = vmatpush3.bf16.msra.mxu0 %v6595_v12  ;;  %v4545_v1 = vld [vmem:[%s6548_s23 + $0x218] sm:$0xff] }
  0x69   : > { %5421 = vmatpush3.bf16.msra.mxu1 %v6651_v33  ;;  %4944 = vmatprep.mubr.f32.mxu1 %v583_v2  ;;  %v4546_v2 = vld [vmem:[%s6548_s23 + $0x220] sm:$0xff] }
  0x6a   : > { %4985 = vmatprep.mubr.f32.mxu0 %v4496_v3  ;;  %5423 = vmatprep.subr.bf16.mxu1 %v6667_v38  ;;  %v4552_v3 = vld [vmem:[%s6548_s23 + $0x250] sm:$0xff] }
  0x6b   : > { %4986 = vmatmul.mubr.f32.gmra.mrb[18].mxu0 %v4497_v4  ;;  %5439 = vmatprep.subr.bf16.mxu0 %v6610_v18  ;;  %v4553_v4 = vld [vmem:[%s6548_s23 + $0x258] sm:$0xff] }
  0x6c   : > { %4945 = vmatmul.mubr.f32.gmra.mrb[12].mxu1 %v584_v5  ;;  %5441 = vmatpush3.bf16.msra.mxu0 %v6610_v18  ;;  %v4547_v5 = vld [vmem:[%s6548_s23 + $0x228] sm:$0xff] }
  0x6d   : > { %5425 = vmatpush3.bf16.msra.mxu1 %v6667_v38  ;;  %4988 = vmatprep.mubr.f32.mxu0 %v4498_v6  ;;  %v4554_v6 = vld [vmem:[%s6548_s23 + $0x260] sm:$0xff] }
  0x6e   : > { %5427 = vmatprep.subr.bf16.mxu1 %v6683_v43  ;;  %5443 = vmatprep.subr.bf16.mxu0 %v6627_v24 }
  0x6f   : > { %4989 = vmatmul.mubr.f32.gmra.mrb[20].mxu0 %v4499_v8  ;;  %5032 = vmatprep.mubr.f32.mxu1 %v4506_v9  ;;  %v4555_v8 = vld [vmem:[%s6548_s23 + $0x268] sm:$0xff]  ;;  %v4562_v9 = vld [vmem:[%s6548_s23 + $0x2a0] sm:$0xff] }
  0x70   : > { %5445 = vmatpush3.bf16.msra.mxu0 %v6627_v24  ;;  %4991 = vmatprep.mubr.f32.mxu0 %v4500_v10  ;;  %v4556_v10 = vld [vmem:[%s6548_s23 + $0x270] sm:$0xff] }
  0x71   : > { %5429 = vmatpush3.bf16.msra.mxu1 %v6683_v43  ;;  %5447 = vmatprep.subr.bf16.mxu0 %v6638_v28 }
  0x72   : > { %5463 = vmatprep.subr.bf16.mxu1 %v6577_v7 }
  0x73   : > { %4992 = vmatmul.mubr.f32.gmra.mrb[22].mxu0 %v4501_v11  ;;  %v4557_v11 = vld [vmem:[%s6548_s23 + $0x278] sm:$0xff] }
  0x74   : > { %5033 = vmatmul.mubr.f32.vlgmr.msra.gmra.mrb[14].mxu1 %v4507_v13  ;;  %5449 = vmatpush3.bf16.msra.mxu0 %v6638_v28  ;;  %v4563_v13 = vld [vmem:[%s6548_s23 + $0x2a8] sm:$0xff] }
  0x75   : > { %5465 = vmatpush3.bf16.msra.mxu1 %v6577_v7  ;;  %4994 = vmatprep.mubr.f32.mxu0 %v4502_v14  ;;  %v4558_v14 = vld [vmem:[%s6548_s23 + $0x280] sm:$0xff] }
  0x76   : > { %5035 = vmatprep.mubr.f32.mxu1 %v4508_v15  ;;  %5451 = vmatprep.subr.bf16.mxu0 %v6651_v33  ;;  %v4564_v15 = vld [vmem:[%s6548_s23 + $0x2b0] sm:$0xff] }
  0x77   : > { %4995 = vmatmul.mubr.f32.gmra.mrb[24].mxu0 %v4503_v16  ;;  %5467 = vmatprep.subr.bf16.mxu1 %v6595_v12  ;;  %v4559_v16 = vld [vmem:[%s6548_s23 + $0x288] sm:$0xff] }
  0x78   : > { %5036 = vmatmul.mubr.f32.gmra.mrb[16].mxu1 %v4509_v17  ;;  %5453 = vmatpush3.bf16.msra.mxu0 %v6651_v33  ;;  %v4565_v17 = vld [vmem:[%s6548_s23 + $0x2b8] sm:$0xff] }
  0x79   : > { %5469 = vmatpush3.bf16.msra.mxu1 %v6595_v12  ;;  %4997 = vmatprep.mubr.f32.mxu0 %v4504_v19  ;;  %v4560_v19 = vld [vmem:[%s6548_s23 + $0x290] sm:$0xff] }
  0x7a   : > { %5038 = vmatprep.mubr.f32.mxu1 %v4510_v20  ;;  %5455 = vmatprep.subr.bf16.mxu0 %v6667_v38  ;;  %v4566_v20 = vld [vmem:[%s6548_s23 + $0x2c0] sm:$0xff] }
  0x7b   : > { %4998 = vmatmul.mubr.f32.gmra.mrb[26].mxu0 %v4505_v21  ;;  %5471 = vmatprep.subr.bf16.mxu1 %v6610_v18  ;;  %v4561_v21 = vld [vmem:[%s6548_s23 + $0x298] sm:$0xff] }
  0x7c   : > { %5039 = vmatmul.mubr.f32.gmra.mrb[18].mxu1 %v4511_v22  ;;  %5457 = vmatpush3.bf16.msra.mxu0 %v6667_v38  ;;  %v4568_v22 = vld [vmem:[%s6548_s23 + $0x2d0] sm:$0xff] }
  0x7d   : > { %5473 = vmatpush3.bf16.msra.mxu1 %v6610_v18  ;;  %5041 = vmatprep.mubr.f32.mxu1 %v4512_v23  ;;  %v4576_v23 = vld [vmem:[%s6548_s23 + $0x310] sm:$0xff] }
  0x7e   : > { %5459 = vmatprep.subr.bf16.mxu0 %v6683_v43  ;;  %5475 = vmatprep.subr.bf16.mxu1 %v6627_v24 }
  0x7f   : > { %5085 = vmatprep.mubr.f32.mxu0 %v4520_v25  ;;  %v4570_v25 = vld [vmem:[%s6548_s23 + $0x2e0] sm:$0xff] }
  0x80   : > { %5042 = vmatmul.mubr.f32.gmra.mrb[20].mxu1 %v4513_v26  ;;  %5461 = vmatpush3.bf16.msra.mxu0 %v6683_v43  ;;  %v4577_v26 = vld [vmem:[%s6548_s23 + $0x318] sm:$0xff] }
  0x81   : > { %5477 = vmatpush3.bf16.msra.mxu1 %v6627_v24  ;;  %5044 = vmatprep.mubr.f32.mxu1 %v4514_v27  ;;  %v4578_v27 = vld [vmem:[%s6548_s23 + $0x320] sm:$0xff] }
  0x82   : > { %5479 = vmatprep.subr.bf16.mxu1 %v6638_v28  ;;  %5495 = vmatprep.subr.bf16.mxu0 %v6577_v7 }
  0x83   : > { %5086 = vmatmul.mubr.f32.vlgmr.msra.gmra.mrb[28].mxu0 %v4521_v29  ;;  %v4572_v29 = vld [vmem:[%s6548_s23 + $0x2f0] sm:$0xff] }
  0x84   : > { %5045 = vmatmul.mubr.f32.gmra.mrb[22].mxu1 %v4515_v30  ;;  %5497 = vmatpush3.bf16.msra.mxu0 %v6577_v7  ;;  %v4579_v30 = vld [vmem:[%s6548_s23 + $0x328] sm:$0xff] }
  0x85   : > { %5481 = vmatpush3.bf16.msra.mxu1 %v6638_v28  ;;  %5047 = vmatprep.mubr.f32.mxu1 %v4516_v31  ;;  %v4573_v31 = vld [vmem:[%s6548_s23 + $0x2f8] sm:$0xff] }
  0x86   : > { %5088 = vmatprep.mubr.f32.mxu0 %v4522_v32  ;;  %5483 = vmatprep.subr.bf16.mxu1 %v6651_v33  ;;  %v4580_v32 = vld [vmem:[%s6548_s23 + $0x330] sm:$0xff] }
  0x87   : > { %5089 = vmatmul.mubr.f32.gmra.mrb[30].mxu0 %v4523_v34  ;;  %5499 = vmatprep.subr.bf16.mxu0 %v6595_v12  ;;  %v4581_v34 = vld [vmem:[%s6548_s23 + $0x338] sm:$0xff] }
  0x88   : > { %5048 = vmatmul.mubr.f32.gmra.mrb[24].mxu1 %v4517_v35  ;;  %5501 = vmatpush3.bf16.msra.mxu0 %v6595_v12  ;;  %v4575_v35 = vld [vmem:[%s6548_s23 + $0x308] sm:$0xff] }
  0x89   : > { %5485 = vmatpush3.bf16.msra.mxu1 %v6651_v33  ;;  %5050 = vmatprep.mubr.f32.mxu1 %v4518_v36  ;;  %v4582_v36 = vld [vmem:[%s6548_s23 + $0x340] sm:$0xff] }
  0x8a   : > { %5091 = vmatprep.mubr.f32.mxu0 %v4524_v37  ;;  %5487 = vmatprep.subr.bf16.mxu1 %v6667_v38  ;;  %v4583_v37 = vld [vmem:[%s6548_s23 + $0x348] sm:$0xff] }
  0x8b   : > { %5092 = vmatmul.mubr.f32.gmra.mrb[32].mxu0 %v4525_v39  ;;  %5503 = vmatprep.subr.bf16.mxu0 %v6610_v18  ;;  %v4584_v39 = vld [vmem:[%s6548_s23 + $0x350] sm:$0xff] }
  0x8c   : > { %5051 = vmatmul.mubr.f32.gmra.mrb[26].mxu1 %v4519_v40  ;;  %5505 = vmatpush3.bf16.msra.mxu0 %v6610_v18  ;;  %v4589_v40 = vld [vmem:[%s6548_s23 + $0x378] sm:$0xff] }
  0x8d   : > { %5489 = vmatpush3.bf16.msra.mxu1 %v6667_v38  ;;  %5094 = vmatprep.mubr.f32.mxu0 %v4526_v41  ;;  %v4586_v41 = vld [vmem:[%s6548_s23 + $0x360] sm:$0xff] }
  0x8e   : > { %5491 = vmatprep.subr.bf16.mxu1 %v6683_v43  ;;  %5507 = vmatprep.subr.bf16.mxu0 %v6627_v24 }
  0x8f   : > { %5095 = vmatmul.mubr.f32.gmra.mrb[34].mxu0 %v4527_v42  ;;  %5138 = vmatprep.mubr.f32.mxu1 %v4534_v44  ;;  %v4587_v42 = vld [vmem:[%s6548_s23 + $0x368] sm:$0xff] }
  0x90   : > { %5509 = vmatpush3.bf16.msra.mxu0 %v6627_v24  ;;  %5097 = vmatprep.mubr.f32.mxu0 %v4528_v45 }
  0x91   : > { %5493 = vmatpush3.bf16.msra.mxu1 %v6683_v43  ;;  %5511 = vmatprep.subr.bf16.mxu0 %v6638_v28 }
  0x92   : > { %5527 = vmatprep.subr.bf16.mxu1 %v6577_v7 }
  0x93   : > { %5098 = vmatmul.mubr.f32.gmra.mrb[36].mxu0 %v4529_v46 }
  0x94   : > { %5139 = vmatmul.mubr.f32.vlgmr.msra.gmra.mrb[28].mxu1 %v4535_v47  ;;  %5513 = vmatpush3.bf16.msra.mxu0 %v6638_v28 }
  0x95   : > { %5529 = vmatpush3.bf16.msra.mxu1 %v6577_v7  ;;  %5100 = vmatprep.mubr.f32.mxu0 %v4530_v48 }
  0x96   : > { %5141 = vmatprep.mubr.f32.mxu1 %v4536_v49  ;;  %5515 = vmatprep.subr.bf16.mxu0 %v6651_v33 }
  0x97   : > { %5101 = vmatmul.mubr.f32.gmra.mrb[38].mxu0 %v4531_v50  ;;  %5531 = vmatprep.subr.bf16.mxu1 %v6595_v12 }
  0x98   : > { %5142 = vmatmul.mubr.f32.gmra.mrb[30].mxu1 %v4537_v51  ;;  %5517 = vmatpush3.bf16.msra.mxu0 %v6651_v33 }
  0x99   : > { %5533 = vmatpush3.bf16.msra.mxu1 %v6595_v12  ;;  %5103 = vmatprep.mubr.f32.mxu0 %v4532_v52 }
  0x9a   : > { %5144 = vmatprep.mubr.f32.mxu1 %v4538_v53  ;;  %5519 = vmatprep.subr.bf16.mxu0 %v6667_v38 }
  0x9b   : > { %5104 = vmatmul.mubr.f32.gmra.mrb[40].mxu0 %v4533_v54  ;;  %5535 = vmatprep.subr.bf16.mxu1 %v6610_v18 }
  0x9c   : > { %5145 = vmatmul.mubr.f32.gmra.mrb[32].mxu1 %v4539_v55  ;;  %5521 = vmatpush3.bf16.msra.mxu0 %v6667_v38 }
  0x9d   : > { %5537 = vmatpush3.bf16.msra.mxu1 %v6610_v18  ;;  %5147 = vmatprep.mubr.f32.mxu1 %v4540_v56 }
  0x9e   : > { %5523 = vmatprep.subr.bf16.mxu0 %v6683_v43  ;;  %5539 = vmatprep.subr.bf16.mxu1 %v6627_v24 }
  0x9f   : > { %5191 = vmatprep.mubr.f32.mxu0 %v4548_v57 }
  0xa0   : > { %5148 = vmatmul.mubr.f32.gmra.mrb[34].mxu1 %v4541_v58  ;;  %5525 = vmatpush3.bf16.msra.mxu0 %v6683_v43 }
  0xa1   : > { %5541 = vmatpush3.bf16.msra.mxu1 %v6627_v24  ;;  %5150 = vmatprep.mubr.f32.mxu1 %v4542_v59 }
  0xa2   : > { %5543 = vmatprep.subr.bf16.mxu1 %v6638_v28  ;;  %5559 = vmatprep.subr.bf16.mxu0 %v6577_v7 }
  0xa3   : > { %5192 = vmatmul.mubr.f32.vlgmr.msra.gmra.mrb[42].mxu0 %v4549_v60 }
  0xa4   : > { %5151 = vmatmul.mubr.f32.gmra.mrb[36].mxu1 %v4543_v61  ;;  %5561 = vmatpush3.bf16.msra.mxu0 %v6577_v7 }
  0xa5   : > { %5545 = vmatpush3.bf16.msra.mxu1 %v6638_v28  ;;  %5153 = vmatprep.mubr.f32.mxu1 %v4544_v62 }
  0xa6   : > { %5194 = vmatprep.mubr.f32.mxu0 %v4550_v63  ;;  %5547 = vmatprep.subr.bf16.mxu1 %v6651_v33 }
  0xa7   : > { %5195 = vmatmul.mubr.f32.gmra.mrb[44].mxu0 %v4551_v0  ;;  %5563 = vmatprep.subr.bf16.mxu0 %v6595_v12 }
  0xa8   : > { %5154 = vmatmul.mubr.f32.gmra.mrb[38].mxu1 %v4545_v1  ;;  %5565 = vmatpush3.bf16.msra.mxu0 %v6595_v12 }
  0xa9   : > { %5549 = vmatpush3.bf16.msra.mxu1 %v6651_v33  ;;  %5156 = vmatprep.mubr.f32.mxu1 %v4546_v2 }
  0xaa   : > { %5197 = vmatprep.mubr.f32.mxu0 %v4552_v3  ;;  %5551 = vmatprep.subr.bf16.mxu1 %v6667_v38 }
  0xab   : > { %5198 = vmatmul.mubr.f32.gmra.mrb[46].mxu0 %v4553_v4  ;;  %5567 = vmatprep.subr.bf16.mxu0 %v6610_v18 }
  0xac   : > { %5157 = vmatmul.mubr.f32.gmra.mrb[40].mxu1 %v4547_v5  ;;  %5569 = vmatpush3.bf16.msra.mxu0 %v6610_v18 }
  0xad   : > { %5553 = vmatpush3.bf16.msra.mxu1 %v6667_v38  ;;  %5200 = vmatprep.mubr.f32.mxu0 %v4554_v6 }
  0xae   : > { %5555 = vmatprep.subr.bf16.mxu1 %v6683_v43  ;;  %5571 = vmatprep.subr.bf16.mxu0 %v6627_v24 }
  0xaf   : > { %5201 = vmatmul.mubr.f32.gmra.mrb[48].mxu0 %v4555_v8  ;;  %5244 = vmatprep.mubr.f32.mxu1 %v4562_v9 }
  0xb0   : > { %5573 = vmatpush3.bf16.msra.mxu0 %v6627_v24  ;;  %5203 = vmatprep.mubr.f32.mxu0 %v4556_v10 }
  0xb1   : > { %5557 = vmatpush3.bf16.msra.mxu1 %v6683_v43  ;;  %5575 = vmatprep.subr.bf16.mxu0 %v6638_v28 }
  0xb2   : > { %5590 = vmatprep.subr.bf16.mxu1 %v6577_v7 }
  0xb3   : > { %5204 = vmatmul.mubr.f32.gmra.mrb[50].mxu0 %v4557_v11 }
  0xb4   : > { %5245 = vmatmul.mubr.f32.vlgmr.msra.gmra.mrb[42].mxu1 %v4563_v13  ;;  %5577 = vmatpush3.bf16.msra.mxu0 %v6638_v28 }
  0xb5   : > { %5598 = vmatpush3.bf16.msra.mxu1 %v6577_v7  ;;  %5206 = vmatprep.mubr.f32.mxu0 %v4558_v14  ;;  %v4567_v7 = vld [vmem:[%s6548_s23 + $0x2c8] sm:$0xff] }
  0xb6   : > { %5247 = vmatprep.mubr.f32.mxu1 %v4564_v15  ;;  %5591 = vmatprep.subr.bf16.mxu1 %v6595_v12 }
  0xb7   : > { %5207 = vmatmul.mubr.f32.gmra.mrb[52].mxu0 %v4559_v16  ;;  %5579 = vmatprep.subr.bf16.mxu0 %v6651_v33 }
  0xb8   : > { %5248 = vmatmul.mubr.f32.gmra.mrb[44].mxu1 %v4565_v17  ;;  %5581 = vmatpush3.bf16.msra.mxu0 %v6651_v33 }
  0xb9   : > { %5599 = vmatpush3.bf16.msra.mxu1 %v6595_v12  ;;  %5209 = vmatprep.mubr.f32.mxu0 %v4560_v19  ;;  %v4569_v12 = vld [vmem:[%s6548_s23 + $0x2d8] sm:$0xff] }
  0xba   : > { %5250 = vmatprep.mubr.f32.mxu1 %v4566_v20  ;;  %5592 = vmatprep.subr.bf16.mxu1 %v6610_v18 }
  0xbb   : > { %5210 = vmatmul.mubr.f32.gmra.mrb[54].mxu0 %v4561_v21  ;;  %5583 = vmatprep.subr.bf16.mxu0 %v6667_v38 }
  0xbc   : > { %5251 = vmatmul.mubr.f32.gmra.mrb[46].mxu1 %v4567_v7  ;;  %5585 = vmatpush3.bf16.msra.mxu0 %v6667_v38 }
  0xbd   : > { %5600 = vmatpush3.bf16.msra.mxu1 %v6610_v18  ;;  %5253 = vmatprep.mubr.f32.mxu1 %v4568_v22  ;;  %v4571_v18 = vld [vmem:[%s6548_s23 + $0x2e8] sm:$0xff] }
  0xbe   : > { %5593 = vmatprep.subr.bf16.mxu1 %v6627_v24  ;;  %5587 = vmatprep.subr.bf16.mxu0 %v6683_v43 }
  0xbf   : > { %5297 = vmatprep.mubr.f32.mxu0 %v4576_v23 }
  0xc0   : > { %5254 = vmatmul.mubr.f32.gmra.mrb[48].mxu1 %v4569_v12  ;;  %5589 = vmatpush3.bf16.msra.mxu0 %v6683_v43 }
  0xc1   : > { %5601 = vmatpush3.bf16.msra.mxu1 %v6627_v24  ;;  %5256 = vmatprep.mubr.f32.mxu1 %v4570_v25  ;;  %v4574_v24 = vld [vmem:[%s6548_s23 + $0x300] sm:$0xff] }
  0xc2   : > { %5594 = vmatprep.subr.bf16.mxu1 %v6638_v28 }
  0xc3   : > { %5298 = vmatmul.mubr.f32.vlgmr.msra.gmra.mrb[56].mxu0 %v4577_v26 }
  0xc4   : > { %5257 = vmatmul.mubr.f32.gmra.mrb[50].mxu1 %v4571_v18  ;;  %5300 = vmatprep.mubr.f32.mxu0 %v4578_v27 }
  0xc5   : > { %5602 = vmatpush3.bf16.msra.mxu1 %v6638_v28  ;;  %5259 = vmatprep.mubr.f32.mxu1 %v4572_v29  ;;  %v4588_v28 = vld [vmem:[%s6548_s23 + $0x370] sm:$0xff] }
  0xc6   : > { %5595 = vmatprep.subr.bf16.mxu1 %v6651_v33 }
  0xc7   : > { %5301 = vmatmul.mubr.f32.gmra.mrb[58].mxu0 %v4579_v30 }
  0xc8   : > { %5260 = vmatmul.mubr.f32.gmra.mrb[52].mxu1 %v4573_v31  ;;  %5303 = vmatprep.mubr.f32.mxu0 %v4580_v32 }
  0xc9   : > { %5603 = vmatpush3.bf16.msra.mxu1 %v6651_v33  ;;  %5262 = vmatprep.mubr.f32.mxu1 %v4574_v24  ;;  %v4585_v33 = vld [vmem:[%s6548_s23 + $0x358] sm:$0xff]  ;;  %s6440_s23 = smov 64  }
  0xca   : > { %5596 = vmatprep.subr.bf16.mxu1 %v6667_v38 }
  0xcb   : > { %5304 = vmatmul.mubr.f32.gmra.mrb[60].mxu0 %v4581_v34 }
  0xcc   : > { %5263 = vmatmul.mubr.f32.gmra.mrb[54].mxu1 %v4575_v35  ;;  %5306 = vmatprep.mubr.f32.mxu0 %v4582_v36 }
  0xcd   : > { %5604 = vmatpush3.bf16.msra.mxu1 %v6667_v38  ;;  %5315 = vmatprep.mubr.f32.mxu1 %v4588_v28 }
  0xce   : > { %5597 = vmatprep.subr.bf16.mxu1 %v6683_v43 }
  0xcf   : > { %5307 = vmatmul.mubr.f32.gmra.mrb[62].mxu0 %v4583_v37 }
  0xd0   : > { %5309 = vmatprep.mubr.f32.mxu0 %v4584_v39 }
  0xd1   : > { %5605 = vmatpush3.bf16.msra.mxu1 %v6683_v43  ;;  %v6941_v43 = vld [vmem:[%s9951_s4] ss:$0 sm:$0xff] }
  0xd3   : > { %5310 = vmatmul.mubr.f32.gmra.mrb[64].mxu0 %v4585_v33 }
  0xd4   : > { %5316 = vmatmul.mubr.f32.vlgmr.msra.gmra.mrb[56].mxu1 %v4589_v40  ;;  %5312 = vmatprep.mubr.f32.mxu0 %v4586_v41 }
  0xd7   : > { %5313 = vmatmul.mubr.f32.gmra.mrb[66].mxu0 %v4587_v42 }
 0x116   : > { %v4875_v44 = vpop.f32.mrb[0].mxu0 }
 0x117   : > { %v486_v45 = vpop.f32.mrb[1].mxu0  ;;  %v6944_v56 = vadd.f32 %v4875_v44, %v6941_v43 }
 0x118   : > { %v6950_v0 = vadd.f32 %v6941_v43, %v486_v45 }
 0x11a   : > { %v4878_v46 = vpop.f32.mrb[2].mxu0 }
 0x11b   : > { %v496_v38 = vpop.f32.mrb[3].mxu0  ;;  %v6960_v6 = vadd.f32 %v4878_v46, %v6941_v43 }
 0x11c   : > { %v6966_v10 = vadd.f32 %v6941_v43, %v496_v38 }
 0x11d   : > { %10278 = vst [vmem:[#allocation8_spill] sm:$0xff] %v6960_v6 }
 0x11e   : > { %v4881_v47 = vpop.f32.mrb[4].mxu0  ;;  %10279 = vst [vmem:[#allocation9_spill] sm:$0xff] %v6966_v10 }
 0x11f   : > { %v506_v48 = vpop.f32.mrb[5].mxu0  ;;  %v6969_v13 = vadd.f32 %v4881_v47, %v6941_v43 }
 0x120   : > { %v6975_v16 = vadd.f32 %v6941_v43, %v506_v48 }
 0x122   : > { %v4884_v49 = vpop.f32.mrb[6].mxu0 }
 0x123   : > { %v516_v50 = vpop.f32.mrb[7].mxu0  ;;  %v6982_v7 = vadd.f32 %v4884_v49, %v6941_v43 }
 0x124   : > { %v6988_v12 = vadd.f32 %v6941_v43, %v516_v50 }
 0x126   : > { %v4887_v51 = vpop.f32.mrb[8].mxu0 }
 0x127   : > { %v4928_v52 = vpop.f32.mrb[0].mxu1  ;;  %v526_v53 = vpop.f32.mrb[9].mxu0  ;;  %v6999_v30 = vadd.f32 %v4887_v51, %v6941_v43 }
 0x128   : > { %v651_v54 = vpop.f32.mrb[1].mxu1  ;;  %v6947_v59 = vadd.f32 %v4928_v52, %v6944_v56  ;;  %v7006_v36 = vadd.f32 %v6941_v43, %v526_v53 }
 0x129   : > { %v6963_v8 = vadd.f32 %v651_v54, %v6950_v0 }
 0x12a   : > { %v721_v1 = vmin.f32 %v6947_v59, 20.0  ;;  %vm805_vm1 = vcmp.gt.f32.partialorder %v6947_v59, 20.0 }
 0x12b   : > { %v4931_v55 = vpop.f32.mrb[2].mxu1  ;;  %v720_v21 = vmin.f32 %v6963_v8, 20.0  ;;  %vm804_vm3 = vcmp.gt.f32.partialorder %v6963_v8, 20.0 }
 0x12c   : > { %v661_v57 = vpop.f32.mrb[3].mxu1  ;;  %v736_v11 = vmul.f32 1.442695, %v721_v1  ;;  %v6972_v14 = vadd.f32 %v4931_v55, %v6960_v6 }
 0x12d   : > { %v4890_v58 = vpop.f32.mrb[10].mxu0  ;;  %v6978_v17 = vadd.f32 %v661_v57, %v6966_v10  ;;  %v734_v34 = vmul.f32 1.442695, %v720_v21 }
 0x12e   : > { %v536_v60 = vpop.f32.mrb[11].mxu0  ;;  %5656 = vpow2.f32 %v736_v11  ;;  %v723_v26 = vmin.f32 %v6972_v14, 20.0  ;;  %v7020_v46 = vadd.f32 %v4890_v58, %v6941_v43  ;;  %vm807_vm4 = vcmp.gt.f32.partialorder %v6972_v14, 20.0 }
 0x12f   : > { %v4934_v61 = vpop.f32.mrb[4].mxu1  ;;  %v722_v29 = vmin.f32 %v6978_v17, 20.0  ;;  %5658 = vpow2.f32 %v734_v34  ;;  %v7028_v54 = vadd.f32 %v6941_v43, %v536_v60  ;;  %vm806_vm6 = vcmp.gt.f32.partialorder %v6978_v17, 20.0 }
 0x130   : > { %v671_v62 = vpop.f32.mrb[5].mxu1  ;;  %v6985_v22 = vadd.f32 %v4934_v61, %v6969_v13  ;;  %v740_v40 = vmul.f32 1.442695, %v723_v26  ;;  %10281 = vst [vmem:[#allocation11_spill] sm:$0xff] %v7020_v46 }
 0x131   : > { %v4893_v63 = vpop.f32.mrb[12].mxu0  ;;  %v6991_v25 = vadd.f32 %v671_v62, %v6975_v16  ;;  %v738_v45 = vmul.f32 1.442695, %v722_v29  ;;  %10283 = vst [vmem:[#allocation13_spill] sm:$0xff] %v7028_v54 }
 0x132   : > { %v6954_v2 = vadd.f32 %v4893_v63, %v6941_v43  ;;  %v546_v3 = vpop.f32.mrb[13].mxu0  ;;  %v725_v35 = vmin.f32 %v6985_v22, 20.0  ;;  %5660 = vpow2.f32 %v740_v40  ;;  %vm809_vm9 = vcmp.gt.f32.partialorder %v6985_v22, 20.0 }
 0x133   : > { %v4937_v4 = vpop.f32.mrb[6].mxu1  ;;  %v6957_v5 = vadd.f32 %v6941_v43, %v546_v3  ;;  %v724_v39 = vmin.f32 %v6991_v25, 20.0  ;;  %5662 = vpow2.f32 %v738_v45  ;;  %vm808_vm8 = vcmp.gt.f32.partialorder %v6991_v25, 20.0 }
 0x134   : > { %v681_v9 = vpop.f32.mrb[7].mxu1  ;;  %v6995_v18 = vadd.f32 %v4937_v4, %v6982_v7  ;;  %v744_v49 = vmul.f32 1.442695, %v725_v35 }
 0x135   : > { %v7002_v31 = vadd.f32 %v681_v9, %v6988_v12  ;;  %v742_v53 = vmul.f32 1.442695, %v724_v39 }
 0x136   : > { %v4981_v15 = vpop.f32.mrb[14].mxu0  ;;  %v727_v41 = vmin.f32 %v6995_v18, 20.0  ;;  %5664 = vpow2.f32 %v744_v49  ;;  %vm811_vm15 = vcmp.gt.f32.partialorder %v6995_v18, 20.0 }
 0x137   : > { %v4940_v19 = vpop.f32.mrb[8].mxu1  ;;  %v1095_v20 = vpop.f32.mrb[15].mxu0  ;;  %v7009_v28 = vadd.f32 %v4981_v15, %v6944_v56  ;;  %v726_v38 = vmin.f32 %v7002_v31, 20.0  ;;  %5666 = vpow2.f32 %v742_v53  ;;  %vm810_vm11 = vcmp.gt.f32.partialorder %v7002_v31, 20.0 }
 0x138   : > { %v691_v23 = vpop.f32.mrb[9].mxu1  ;;  %v7013_v33 = vadd.f32 %v4940_v19, %v6999_v30  ;;  %v7025_v51 = vadd.f32 %v1095_v20, %v6950_v0  ;;  %v748_v58 = vmul.f32 1.442695, %v727_v41  ;;  %v7041_v60 = vpop.eup %5656 }
 0x139   : > { %10280 = vst [vmem:[#allocation10_spill] sm:$0xff] %v7009_v28  ;;  %v7017_v42 = vadd.f32 %v691_v23, %v7006_v36  ;;  %v1165_v50 = vmin.f32 %v7009_v28, 20.0  ;;  %v746_v1 = vmul.f32 1.442695, %v726_v38  ;;  %v7060_v35 = vadd.f32 1.0, %v7041_v60  ;;  %v7067_v38 = vpop.eup %5658 }
 0x13a   : > { %v4984_v27 = vpop.f32.mrb[16].mxu0  ;;  %10282 = vst [vmem:[#allocation12_spill] sm:$0xff] %v7025_v51  ;;  %v729_v55 = vmin.f32 %v7013_v33, 20.0  ;;  %v1164_v9 = vmin.f32 %v7025_v51, 20.0  ;;  %5668 = vpow2.f32 %v748_v58 }
 0x13b   : > { %v4943_v32 = vpop.f32.mrb[10].mxu1  ;;  %v1105_v24 = vpop.f32.mrb[17].mxu0  ;;  %v7032_v57 = vadd.f32 %v4984_v27, %v6960_v6  ;;  %v728_v61 = vmin.f32 %v7017_v42, 20.0  ;;  %v1180_v4 = vmul.f32 1.442695, %v1165_v50  ;;  %5670 = vpow2.f32 %v746_v1  ;;  %10291 = vst [vmem:[#allocation21_spill] sm:$0xff] %v7060_v35 }
 0x13c   : > { %v701_v37 = vpop.f32.mrb[11].mxu1  ;;  %v7036_v62 = vadd.f32 %v4943_v32, %v7020_v46  ;;  %v7045_v11 = vadd.f32 %v1105_v24, %v6966_v10  ;;  %v752_v15 = vmul.f32 1.442695, %v729_v55 }
 0x13d   : > { %10284 = vst [vmem:[#allocation14_spill] sm:$0xff] %v7032_v57  ;;  %v7039_v3 = vadd.f32 %v701_v37, %v7028_v54  ;;  %v1167_v19 = vmin.f32 %v7032_v57, 20.0  ;;  %v750_v21 = vmul.f32 1.442695, %v728_v61  ;;  %5672 = vpow2.f32 %v1180_v4  ;;  %v7081_v61 = vpop.eup %5660 }
 0x13e   : > { %v4987_v44 = vpop.f32.mrb[18].mxu0  ;;  %10285 = vst [vmem:[#allocation15_spill] sm:$0xff] %v7036_v62  ;;  %10287 = vst [vmem:[#allocation17_spill] sm:$0xff] %v7045_v11  ;;  %v731_v23 = vmin.f32 %v7036_v62, 20.0  ;;  %v1178_v37 = vmul.f32 1.442695, %v1164_v9  ;;  %5674 = vpow2.f32 %v752_v15 }
 0x13f   : > { %v4946_v47 = vpop.f32.mrb[12].mxu1  ;;  %v1115_v48 = vpop.f32.mrb[19].mxu0  ;;  %10286 = vst [vmem:[#allocation16_spill] sm:$0xff] %v7039_v3  ;;  %v7049_v20 = vadd.f32 %v4987_v44, %v6969_v13  ;;  %v730_v29 = vmin.f32 %v7039_v3, 20.0  ;;  %v1166_v39 = vmin.f32 %v7045_v11, 20.0  ;;  %5676 = vpow2.f32 %v750_v21 }
 0x140   : > { %v711_v52 = vpop.f32.mrb[13].mxu1  ;;  %v7053_v26 = vadd.f32 %v4946_v47, %v6954_v2  ;;  %v7064_v40 = vadd.f32 %v1115_v48, %v6975_v16  ;;  %v1184_v44 = vmul.f32 1.442695, %v1167_v19  ;;  %v756_v47 = vmul.f32 1.442695, %v731_v23  ;;  %v7089_v19 = vpop.eup %5662 }
 0x141   : > { %10288 = vst [vmem:[#allocation18_spill] sm:$0xff] %v7049_v20  ;;  %v7057_v32 = vadd.f32 %v711_v52, %v6957_v5  ;;  %v1169_v45 = vmin.f32 %v7049_v20, 20.0  ;;  %v754_v52 = vmul.f32 1.442695, %v730_v29  ;;  %5678 = vlog2.f32 %v7060_v35  ;;  %v7092_v23 = vpop.eup %5664 }
 0x142   : > { %v4990_v63 = vpop.f32.mrb[20].mxu0  ;;  %10289 = vst [vmem:[#allocation19_spill] sm:$0xff] %v7053_v26  ;;  %10292 = vst [vmem:[#allocation22_spill] sm:$0xff] %v7064_v40  ;;  %v733_v49 = vmin.f32 %v7053_v26, 20.0  ;;  %5680 = vpow2.f32 %v1178_v37  ;;  %v1182_v1 = vmul.f32 1.442695, %v1166_v39  ;;  %v7099_v35 = vpop.eup %5666 }
 0x143   : > { %v1125_v43 = vpop.f32.mrb[21].mxu0  ;;  %10290 = vst [vmem:[#allocation20_spill] sm:$0xff] %v7057_v32  ;;  %v732_v53 = vmin.f32 %v7057_v32, 20.0  ;;  %v7074_v55 = vadd.f32 %v4990_v63, %v6982_v7  ;;  %v1168_v4 = vmin.f32 %v7064_v40, 20.0  ;;  %5682 = vpow2.f32 %v1184_v44 }
 0x144   : > { %v7085_v9 = vadd.f32 %v1125_v43, %v6988_v12  ;;  %v1188_v63 = vmul.f32 1.442695, %v1169_v45  ;;  %v830_v21 = vmul.f32 -0.5, %v7041_v60  ;;  %5684 = vpow2.f32 %v756_v47  ;;  %v7107_v40 = vpop.eup %5668 }
 0x145   : > { %10293 = vst [vmem:[#allocation23_spill] sm:$0xff] %v7074_v55  ;;  %v760_v29 = vmul.f32 1.442695, %v733_v49  ;;  %5686 = vpow2.f32 %v754_v52  ;;  %v758_v43 = vmul.f32 1.442695, %v732_v53  ;;  %v1171_v20 = vmin.f32 %v7074_v55, 20.0  ;;  %v7114_v32 = vpop.eup %5670 }
 0x146   : > { %v4993_v27 = vpop.f32.mrb[22].mxu0  ;;  %10294 = vst [vmem:[#allocation24_spill] sm:$0xff] %v7085_v9  ;;  %5688 = vpow2.f32 %v1182_v1  ;;  %v1186_v47 = vmul.f32 1.442695, %v1168_v4  ;;  %v831_v52 = vadd.f32 1.0, %v830_v21  ;;  %v7117_v53 = vadd.f32 1.0, %v7081_v61 }
 0x147   : > { %v5034_v24 = vpop.f32.mrb[14].mxu1  ;;  %v1135_v34 = vpop.f32.mrb[23].mxu0  ;;  %v7095_v37 = vadd.f32 %v4993_v27, %v6999_v30  ;;  %v1170_v27 = vmin.f32 %v7085_v9, 20.0  ;;  %5690 = vpow2.f32 %v1188_v63  ;;  %v7126_v4 = vadd.f32 1.0, %v7067_v38 }
 0x148   : > { %v1539_v41 = vpop.f32.mrb[15].mxu1  ;;  %v7103_v44 = vadd.f32 %v5034_v24, %v6944_v56  ;;  %10297 = vst [vmem:[#allocation27_spill] sm:$0xff] %v7117_v53  ;;  %v7119_v24 = vpop.eup %5672  ;;  %5692 = vpow2.f32 %v760_v29  ;;  %v7123_v1 = vadd.f32 %v1135_v34, %v7006_v36  ;;  %v1192_v57 = vmul.f32 1.442695, %v1171_v20 }
 0x149   : > { %10295 = vst [vmem:[#allocation25_spill] sm:$0xff] %v7095_v37  ;;  %v1173_v55 = vmin.f32 %v7095_v37, 20.0  ;;  %10299 = vst [vmem:[#allocation29_spill] sm:$0xff] %v7126_v4  ;;  %v7128_v9 = vpop.eup %5674  ;;  %5694 = vpow2.f32 %v758_v43  ;;  %v833_v21 = vand.u32 2147483647, %v7041_v60  ;;  %v7139_v3 = vadd.f32 %v1539_v41, %v6950_v0 }
 0x14a   : > { %v7070_v50 = vpop.f32.mrb[24].mxu0  ;;  %10296 = vst [vmem:[#allocation26_spill] sm:$0xff] %v7103_v44  ;;  %10298 = vst [vmem:[#allocation28_spill] sm:$0xff] %v7123_v1  ;;  %v1609_v63 = vmin.f32 %v7103_v44, 20.0  ;;  %v7134_v62 = vpop.eup %5676  ;;  %5696 = vpow2.f32 %v1186_v47  ;;  %v1190_v29 = vmul.f32 1.442695, %v1170_v27  ;;  %v832_v20 = vmul.f32 %v7041_v60, %v831_v52 }
 0x14b   : > { %v7077_v48 = vpop.f32.mrb[16].mxu1  ;;  %v7079_v58 = vpop.f32.mrb[25].mxu0  ;;  %10300 = vst [vmem:[#allocation30_spill] sm:$0xff] %v7139_v3  ;;  %5698 = vlog2.f32 %v7117_v53  ;;  %v1196_v44 = vmul.f32 1.442695, %v1173_v55  ;;  %v1172_v28 = vmin.f32 %v7123_v1, 20.0  ;;  %v7152_v41 = vadd.f32 %v7070_v50, %v7020_v46 }
 0x14c   : > { %v7087_v15 = vpop.f32.mrb[17].mxu1  ;;  %v5679_v34 = vpop.eup %5678  ;;  %5700 = vlog2.f32 %v7126_v4  ;;  %v1624_v27 = vmul.f32 1.442695, %v1609_v63  ;;  %vm834_vm2 = vcmp.lt.f32.partialorder %v833_v21, 0.0004427343  ;;  %v848_v55 = vmul.f32 -0.5, %v7081_v61 }
 0x14d   : > { %v7144_v43 = vpop.eup %5680  ;;  %v829_v51 = vmul.f32 0.6931472, %v5679_v34  ;;  %5702 = vpow2.f32 %v1192_v57  ;;  %10302 = vst [vmem:[#allocation32_spill] sm:$0xff] %v7152_v41  ;;  %v7158_v53 = vadd.f32 1.0, %v7089_v19  ;;  %v1608_v63 = vmin.f32 %v7139_v3, 20.0 }
 0x14e   : > { %v7097_v39 = vpop.f32.mrb[26].mxu0  ;;  %v7148_v47 = vpop.eup %5682  ;;  %5704 = vpow2.f32 %v1190_v29  ;;  %v821_v21 = vmul.f32 -0.5, %v7067_v38  ;;  %v7183_v3 = vadd.f32 %v7077_v48, %v6960_v6  ;;  %v1175_v46 = vmin.f32 %v7152_v41, 20.0 }
 0x14f   : > { %v7105_v45 = vpop.f32.mrb[18].mxu1  ;;  %v7110_v49 = vpop.f32.mrb[27].mxu0  ;;  %10301 = vst [vmem:[#allocation31_spill] sm:$0xff] %v7148_v47  ;;  %v835_v52 = vsel %vm834_vm2, %v832_v20, %v829_v51  ;;  %10304 = vst [vmem:[#allocation34_spill] sm:$0xff] %v7158_v53  ;;  %v7172_v51 = vadd.f32 1.0, %v7099_v35  ;;  %5706 = vpow2.f32 %v1196_v44  ;;  %v849_v48 = vadd.f32 1.0, %v848_v55 }
 0x150   : > { %v7112_v26 = vpop.f32.mrb[19].mxu1  ;;  %v7154_v60 = vpop.eup %5684  ;;  %v945_v50 = vsel %vm805_vm1, %v6947_v59, %v835_v52  ;;  %v1194_v47 = vmul.f32 1.442695, %v1172_v28  ;;  %10306 = vst [vmem:[#allocation36_spill] sm:$0xff] %v7183_v3  ;;  %5708 = vpow2.f32 %v1624_v27  ;;  %v7204_v27 = vadd.f32 1.0, %v7092_v23 }
 0x151   : > { %10303 = vst [vmem:[#allocation33_spill] sm:$0xff] %v7154_v60  ;;  %v7164_v57 = vpop.eup %5686  ;;  %10305 = vst [vmem:[#allocation35_spill] sm:$0xff] %v7172_v51  ;;  %960 = vrot.lane.b32.xlu0 %v945_v50, %s6440_s23  ;;  %v7192_v60 = vadd.f32 %v7079_v58, %v7028_v54  ;;  %5710 = vlog2.f32 %v7158_v53  ;;  %v851_v54 = vand.u32 2147483647, %v7081_v61  ;;  %v1611_v55 = vmin.f32 %v7183_v3, 20.0 }
 0x152   : > { %v7178_v1 = vpop.eup %5688  ;;  %10313 = vst [vmem:[#allocation43_spill] sm:$0xff] %v7204_v27  ;;  %5712 = vlog2.f32 %v7172_v51  ;;  %v7217_v53 = vadd.f32 %v7087_v15, %v6966_v10  ;;  %v850_v15 = vmul.f32 %v7081_v61, %v849_v48  ;;  %v857_v10 = vmul.f32 -0.5, %v7099_v35 }
 0x153   : > { %v7132_v11 = vpop.f32.mrb[20].mxu1  ;;  %v7187_v52 = vpop.eup %5690  ;;  %10309 = vst [vmem:[#allocation39_spill] sm:$0xff] %v7192_v60  ;;  %5714 = vpow2.f32 %v1194_v47  ;;  %v1174_v6 = vmin.f32 %v7192_v60, 20.0  ;;  %vm852_vm5 = vcmp.lt.f32.partialorder %v851_v54, 0.0004427343 }
 0x154   : > { %v7136_v37 = vpop.f32.mrb[21].mxu1  ;;  %10308 = vst [vmem:[#allocation38_spill] sm:$0xff] %v7187_v52  ;;  %v7199_v50 = vpop.eup %5692  ;;  %v1622_v52 = vmul.f32 1.442695, %v1608_v63  ;;  %10317 = vst [vmem:[#allocation47_spill] sm:$0xff] %v7217_v53  ;;  %5716 = vlog2.f32 %v7204_v27  ;;  %v866_v27 = vmul.f32 -0.5, %v7092_v23 }
 0x155   : > { %10312 = vst [vmem:[#allocation42_spill] sm:$0xff] %v7199_v50  ;;  %v7208_v58 = vpop.eup %5694  ;;  %v824_v50 = vand.u32 2147483647, %v7067_v38  ;;  %v1200_v63 = vmul.f32 1.442695, %v1175_v46 }
 0x156   : > { %v7162_v4 = vpop.f32.mrb[28].mxu0  ;;  %10315 = vst [vmem:[#allocation45_spill] sm:$0xff] %v7208_v58  ;;  %v842_v48 = vand.u32 2147483647, %v7089_v19 }
 0x157   : > { %v7160_v34 = vpop.f32.mrb[22].mxu1  ;;  %v7176_v20 = vpop.f32.mrb[29].mxu0  ;;  %vm825_vm7 = vcmp.lt.f32.partialorder %v824_v50, 0.0004427343 }
 0x158   : > { %v7174_v29 = vpop.f32.mrb[23].mxu1  ;;  %vm7273_vm10 = vcmp.lt.f32.partialorder %v842_v48, 0.0004427343  ;;  %v7291_v48 = vadd.f32 %v7105_v45, %v6969_v13 }
 0x15a   : > { %v7185_v59 = vpop.f32.mrb[30].mxu0  ;;  %10332 = vst [vmem:[#allocation60_spill] sm:$0xff] %v7291_v48 }
 0x15b   : > { %10307 = vst [vmem:[#allocation37_spill] sm:$0xff] %v7185_v59  ;;  %v7195_v28 = vpop.f32.mrb[24].mxu1  ;;  %v7197_v44 = vpop.f32.mrb[31].mxu0  ;;  %v822_v59 = vadd.f32 1.0, %v821_v21  ;;  %v839_v21 = vmul.f32 -0.5, %v7089_v19 }
 0x15c   : > { %10310 = vst [vmem:[#allocation40_spill] sm:$0xff] %v7195_v28  ;;  %10311 = vst [vmem:[#allocation41_spill] sm:$0xff] %v7197_v44  ;;  %v7206_v41 = vpop.f32.mrb[25].mxu1  ;;  %v7212_v44 = vpop.eup %5696 }
 0x15d   : > { %10314 = vst [vmem:[#allocation44_spill] sm:$0xff] %v7206_v41  ;;  %10316 = vst [vmem:[#allocation46_spill] sm:$0xff] %v7212_v44  ;;  %v5699_v58 = vpop.eup %5698  ;;  %v823_v28 = vmul.f32 %v7067_v38, %v822_v59 }
 0x15e   : > { %v7220_v41 = vpop.f32.mrb[32].mxu0  ;;  %v5701_v3 = vpop.eup %5700  ;;  %v847_v44 = vmul.f32 0.6931472, %v5699_v58 }
 0x15f   : > { %10318 = vst [vmem:[#allocation48_spill] sm:$0xff] %v7220_v41  ;;  %v7225_v51 = vpop.f32.mrb[26].mxu1  ;;  %v7227_v47 = vpop.f32.mrb[33].mxu0  ;;  %v7232_v41 = vadd.f32 1.0, %v7114_v32  ;;  %v820_v60 = vmul.f32 0.6931472, %v5701_v3 }
 0x160   : > { %10319 = vst [vmem:[#allocation49_spill] sm:$0xff] %v7227_v47  ;;  %v7234_v46 = vpop.eup %5702  ;;  %v7239_v47 = vpop.f32.mrb[27].mxu1  ;;  %v853_v61 = vsel %vm852_vm5, %v850_v15, %v847_v44  ;;  %v1610_v3 = vmin.f32 %v7217_v53, 20.0  ;;  %v858_v15 = vadd.f32 1.0, %v857_v10  ;;  %v7314_v10 = vadd.f32 %v7110_v49, %v6957_v5 }
 0x161   : > { %10320 = vst [vmem:[#allocation50_spill] sm:$0xff] %v7232_v41  ;;  %10321 = vst [vmem:[#allocation51_spill] sm:$0xff] %v7234_v46  ;;  %v7241_v58 = vpop.eup %5704  ;;  %5718 = vlog2.f32 %v7232_v41  ;;  %v947_v38 = vsel %vm807_vm4, %v6972_v14, %v853_v61  ;;  %v826_v59 = vsel %vm825_vm7, %v823_v28, %v820_v60  ;;  %v840_v46 = vadd.f32 1.0, %v839_v21 }
 0x162   : > { %10322 = vst [vmem:[#allocation52_spill] sm:$0xff] %v7239_v47  ;;  %10323 = vst [vmem:[#allocation53_spill] sm:$0xff] %v7241_v58  ;;  %v7246_v54 = vpop.f32.mrb[34].mxu0  ;;  %v7254_v44 = vpop.eup %5706  ;;  %5720 = vpow2.f32 %v1622_v52  ;;  %964 = vrot.lane.b32.xlu1 %v947_v38, %s6440_s23  ;;  %v944_v50 = vsel %vm804_vm3, %v6963_v8, %v826_v59  ;;  %v860_v41 = vand.u32 2147483647, %v7099_v35  ;;  %v867_v14 = vadd.f32 1.0, %v866_v27 }
 0x163   : > { %v7252_v47 = vpop.f32.mrb[35].mxu0  ;;  %10324 = vst [vmem:[#allocation54_spill] sm:$0xff] %v7254_v44  ;;  %v7261_v53 = vpop.eup %5708  ;;  %v1628_v58 = vmul.f32 1.442695, %v1611_v55  ;;  %958 = vrot.lane.b32.xlu0 %v944_v50, %s6440_s23  ;;  %v875_v60 = vmul.f32 -0.5, %v7114_v32  ;;  %v7267_v52 = vadd.f32 1.0, %v7107_v40  ;;  %5722 = vpow2.f32 %v1200_v63 }
 0x164   : > { %10325 = vst [vmem:[#allocation55_spill] sm:$0xff] %v7261_v53  ;;  %v5711_v28 = vpop.eup %5710  ;;  %v1198_v21 = vmul.f32 1.442695, %v1174_v6  ;;  %v7271_v8 = vadd.f32 %v7097_v39, %v6954_v2  ;;  %v841_v38 = vmul.f32 %v7089_v19, %v840_v46  ;;  %v869_v59 = vand.u32 2147483647, %v7092_v23  ;;  %10336 = vst [vmem:[#allocation62_spill] sm:$0xff] %v7314_v10 }
 0x165   : > { %10326 = vst [vmem:[#allocation56_spill] sm:$0xff] %v7267_v52  ;;  %v5713_v61 = vpop.eup %5712  ;;  %v838_v27 = vmul.f32 0.6931472, %v5711_v28  ;;  %5724 = vlog2.f32 %v7267_v52  ;;  %v859_v28 = vmul.f32 %v7099_v35, %v858_v15  ;;  %vm7294_vm12 = vcmp.lt.f32.partialorder %v860_v41, 0.0004427343 }
 0x166   : > { %10327 = vst [vmem:[#allocation57_spill] sm:$0xff] %v7271_v8  ;;  %v7277_v55 = vpop.f32.mrb[36].mxu0  ;;  %v7287_v63 = vpop.eup %5714  ;;  %v856_v50 = vmul.f32 0.6931472, %v5713_v61  ;;  %v868_v44 = vmul.f32 %v7092_v23, %v867_v14  ;;  %v884_v15 = vmul.f32 -0.5, %v7107_v40  ;;  %v7331_v49 = vadd.f32 %v7112_v26, %v6975_v16 }
 0x167   : > { %v7283_v6 = vpop.f32.mrb[28].mxu1  ;;  %v7285_v39 = vpop.f32.mrb[37].mxu0  ;;  %10331 = vst [vmem:[#allocation59_spill] sm:$0xff] %v7287_v63  ;;  %v844_v53 = vsel %vm7273_vm10, %v841_v38, %v838_v27  ;;  %v878_v63 = vand.u32 2147483647, %v7114_v32  ;;  %5726 = vpow2.f32 %v1628_v58  ;;  %v1613_v38 = vmin.f32 %v7291_v48, 20.0 }
 0x168   : > { %10330 = vst [vmem:[#allocation58_spill] sm:$0xff] %v7285_v39  ;;  %v7298_v46 = vpop.f32.mrb[29].mxu1  ;;  %v5717_v52 = vpop.eup %5716  ;;  %v876_v39 = vadd.f32 1.0, %v875_v60  ;;  %v946_v45 = vsel %vm806_vm6, %v6978_v17, %v844_v53  ;;  %v862_v35 = vsel %vm7294_vm12, %v859_v28, %v856_v50  ;;  %vm7320_vm13 = vcmp.lt.f32.partialorder %v869_v59, 0.0004427343  ;;  %10339 = vst [vmem:[#allocation63_spill] sm:$0xff] %v7331_v49 }
 0x169   : > { %10335 = vst [vmem:[#allocation61_spill] sm:$0xff] %v7298_v46  ;;  %v865_v41 = vmul.f32 0.6931472, %v5717_v52  ;;  %v1626_v46 = vmul.f32 1.442695, %v1610_v3  ;;  %962 = vrot.lane.b32.xlu1 %v946_v45, %s6440_s23  ;;  %v948_v23 = vsel %vm808_vm8, %v6991_v25, %v862_v35  ;;  %v1177_v3 = vmin.f32 %v7271_v8, 20.0 }
 0x16a   : > { %v7310_v61 = vpop.f32.mrb[38].mxu0  ;;  %966 = vrot.lane.b32.xlu0 %v948_v23, %s6440_s23  ;;  %v7337_v52 = vadd.f32 1.0, %v7134_v62  ;;  %v877_v50 = vmul.f32 %v7114_v32, %v876_v39  ;;  %vm7348_vm14 = vcmp.lt.f32.partialorder %v878_v63, 0.0004427343  ;;  %v1176_v58 = vmin.f32 %v7314_v10, 20.0  ;;  %v10372_v10 = vld [vmem:[#allocation11_spill] sm:$0xff] }
 0x16b   : > { %v7324_v53 = vpop.f32.mrb[30].mxu1  ;;  %v7326_v14 = vpop.f32.mrb[39].mxu0  ;;  %v871_v25 = vsel %vm7320_vm13, %v868_v44, %v865_v41  ;;  %v885_v44 = vadd.f32 1.0, %v884_v15  ;;  %v887_v39 = vand.u32 2147483647, %v7107_v40  ;;  %v1612_v23 = vmin.f32 %v7331_v49, 20.0 }
 0x16c   : > { %v5719_v60 = vpop.eup %5718  ;;  %10340 = vst [vmem:[#allocation64_spill] sm:$0xff] %v7337_v52  ;;  %v7339_v27 = vpop.f32.mrb[31].mxu1  ;;  %v949_v26 = vsel %vm809_vm9, %v6985_v22, %v871_v25  ;;  %5728 = vlog2.f32 %v7337_v52  ;;  %v7361_v22 = vadd.f32 1.0, %v7128_v9  ;;  %v1204_v15 = vmul.f32 1.442695, %v1177_v3 }
 0x16d   : > { %v874_v59 = vmul.f32 0.6931472, %v5719_v60  ;;  %v7343_v28 = vpop.eup %5720  ;;  %968 = vrot.lane.b32.xlu1 %v949_v26, %s6440_s23  ;;  %5730 = vpow2.f32 %v1198_v21  ;;  %v7381_v21 = vadd.f32 %v7132_v11, %v6982_v7  ;;  %v1202_v26 = vmul.f32 1.442695, %v1176_v58 }
 0x16e   : > { %v7353_v45 = vpop.f32.mrb[40].mxu0  ;;  %10343 = vst [vmem:[#allocation65_spill] sm:$0xff] %v7361_v22  ;;  %v7367_v41 = vpop.eup %5722  ;;  %5732 = vlog2.f32 %v7361_v22  ;;  %vm888_vm1 = vcmp.lt.f32.partialorder %v887_v39, 0.0004427343  ;;  %v7389_v19 = vadd.f32 1.0, %v7144_v43  ;;  %v902_v11 = vmul.f32 -0.5, %v7128_v9 }
 0x16f   : > { %v880_v32 = vsel %vm7348_vm14, %v877_v50, %v874_v59  ;;  %v7363_v63 = vpop.f32.mrb[32].mxu1  ;;  %v7365_v35 = vpop.f32.mrb[41].mxu0  ;;  %v1632_v59 = vmul.f32 1.442695, %v1613_v38  ;;  %v893_v50 = vmul.f32 -0.5, %v7134_v62  ;;  %5734 = vpow2.f32 %v1626_v46  ;;  %10344 = vst [vmem:[#allocation66_spill] sm:$0xff] %v7381_v21 }
 0x170   : > { %v950_v17 = vsel %vm810_vm11, %v7002_v31, %v880_v32  ;;  %v7373_v60 = vpop.f32.mrb[33].mxu1  ;;  %v5725_v25 = vpop.eup %5724  ;;  %v886_v31 = vmul.f32 %v7107_v40, %v885_v44  ;;  %v7386_v38 = vadd.f32 %v7136_v37, %v6988_v12  ;;  %10346 = vst [vmem:[#allocation68_spill] sm:$0xff] %v7389_v19  ;;  %5736 = vpow2.f32 %v1204_v15 }
 0x171   : > { %970 = vrot.lane.b32.xlu0 %v950_v17, %s6440_s23  ;;  %v883_v3 = vmul.f32 0.6931472, %v5725_v25  ;;  %v1630_v46 = vmul.f32 1.442695, %v1612_v23  ;;  %5738 = vpow2.f32 %v1632_v59  ;;  %v894_v37 = vadd.f32 1.0, %v893_v50  ;;  %v7405_v15 = vpop.eup %5726 }
 0x172   : > { %10345 = vst [vmem:[#allocation67_spill] sm:$0xff] %v7386_v38  ;;  %v1615_v44 = vmin.f32 %v7381_v21, 20.0  ;;  %v896_v58 = vand.u32 2147483647, %v7134_v62  ;;  %5740 = vlog2.f32 %v7389_v19  ;;  %v1614_v23 = vmin.f32 %v7386_v38, 20.0 }
 0x173   : > { %v7391_v32 = vpop.f32.mrb[34].mxu1  ;;  %v889_v17 = vsel %vm888_vm1, %v886_v31, %v883_v3  ;;  %5742 = vpow2.f32 %v1202_v26  ;;  %v7411_v50 = vadd.f32 1.0, %v7119_v24  ;;  %v905_v19 = vand.u32 2147483647, %v7128_v9 }
 0x174   : > { %v7394_v22 = vpop.f32.mrb[35].mxu1  ;;  %v951_v40 = vsel %vm811_vm15, %v6995_v18, %v889_v17  ;;  %5744 = vpow2.f32 %v1630_v46  ;;  %v903_v18 = vadd.f32 1.0, %v902_v11  ;;  %v1265_v26 = vmul.f32 -0.5, %v7144_v43 }
 0x175   : > { %972 = vrot.lane.b32.xlu1 %v951_v40, %s6440_s23  ;;  %10347 = vst [vmem:[#allocation69_spill] sm:$0xff] %v7411_v50  ;;  %v895_v40 = vmul.f32 %v7134_v62, %v894_v37  ;;  %v1636_v21 = vmul.f32 1.442695, %v1615_v44  ;;  %vm897_vm2 = vcmp.lt.f32.partialorder %v896_v58, 0.0004427343  ;;  %5746 = vlog2.f32 %v7411_v50 }
 0x176   : > { %v7403_v39 = vpop.f32.mrb[42].mxu0  ;;  %v5729_v59 = vpop.eup %5728  ;;  %v1634_v38 = vmul.f32 1.442695, %v1614_v23  ;;  %v7427_v48 = vadd.f32 %v7160_v34, %v6999_v30  ;;  %vm812_vm3 = vcmp.gt.f32.partialorder %v7017_v42, 20.0  ;;  %v7438_v44 = vadd.f32 %v7162_v4, %v6944_v56 }
 0x177   : > { %v7408_v25 = vpop.f32.mrb[36].mxu1  ;;  %v7415_v31 = vpop.f32.mrb[43].mxu0  ;;  %v892_v17 = vmul.f32 0.6931472, %v5729_v59  ;;  %v904_v50 = vmul.f32 %v7128_v9, %v903_v18  ;;  %vm906_vm4 = vcmp.lt.f32.partialorder %v905_v19, 0.0004427343  ;;  %v7453_v4 = vadd.f32 %v7174_v29, %v7006_v36 }
 0x178   : > { %v7413_v3 = vpop.f32.mrb[37].mxu1  ;;  %10349 = vst [vmem:[#allocation71_spill] sm:$0xff] %v7415_v31  ;;  %v7420_v52 = vpop.eup %5730  ;;  %10351 = vst [vmem:[#allocation73_spill] sm:$0xff] %v7427_v48  ;;  %v1266_v34 = vadd.f32 1.0, %v1265_v26  ;;  %vm813_vm5 = vcmp.gt.f32.partialorder %v7013_v33, 20.0  ;;  %5748 = vpow2.f32 %v1636_v21  ;;  %v1617_v29 = vmin.f32 %v7427_v48, 20.0 }
 0x179   : > { %10348 = vst [vmem:[#allocation70_spill] sm:$0xff] %v7413_v3  ;;  %v5733_v11 = vpop.eup %5732  ;;  %v898_v62 = vsel %vm897_vm2, %v895_v40, %v892_v17  ;;  %10354 = vst [vmem:[#allocation76_spill] sm:$0xff] %v7438_v44  ;;  %v1274_v17 = vmul.f32 -0.5, %v7119_v24  ;;  %v7445_v40 = vadd.f32 1.0, %v7164_v57  ;;  %v1268_v9 = vand.u32 2147483647, %v7144_v43 }
 0x17a   : > { %v7423_v46 = vpop.f32.mrb[44].mxu0  ;;  %v7434_v49 = vpop.eup %5734  ;;  %v952_v58 = vsel %vm812_vm3, %v7017_v42, %v898_v62  ;;  %v901_v23 = vmul.f32 0.6931472, %v5733_v11  ;;  %10358 = vst [vmem:[#allocation80_spill] sm:$0xff] %v7453_v4 }
 0x17b   : > { %10350 = vst [vmem:[#allocation72_spill] sm:$0xff] %v7423_v46  ;;  %v7430_v37 = vpop.f32.mrb[38].mxu1  ;;  %v7432_v59 = vpop.f32.mrb[45].mxu0  ;;  %974 = vrot.lane.b32.xlu0 %v952_v58, %s6440_s23  ;;  %10355 = vst [vmem:[#allocation77_spill] sm:$0xff] %v7445_v40  ;;  %5750 = vlog2.f32 %v7445_v40  ;;  %vm1269_vm6 = vcmp.lt.f32.partialorder %v1268_v9, 0.0004427343 }
 0x17c   : > { %10352 = vst [vmem:[#allocation74_spill] sm:$0xff] %v7430_v37  ;;  %10353 = vst [vmem:[#allocation75_spill] sm:$0xff] %v7432_v59  ;;  %v7447_v59 = vpop.f32.mrb[39].mxu1  ;;  %v7449_v8 = vpop.eup %5736  ;;  %v907_v42 = vsel %vm906_vm4, %v904_v50, %v901_v23  ;;  %v7470_v50 = vadd.f32 %v7176_v20, %v6950_v0  ;;  %5752 = vpow2.f32 %v1634_v38  ;;  %v1616_v20 = vmin.f32 %v7453_v4, 20.0 }
 0x17d   : > { %10356 = vst [vmem:[#allocation78_spill] sm:$0xff] %v7447_v59  ;;  %10357 = vst [vmem:[#allocation79_spill] sm:$0xff] %v7449_v8  ;;  %v7459_v18 = vpop.eup %5738  ;;  %v953_v26 = vsel %vm813_vm5, %v7013_v33, %v907_v42  ;;  %v2053_v59 = vmin.f32 %v7438_v44, 20.0  ;;  %v1267_v42 = vmul.f32 %v7144_v43, %v1266_v34 }
 0x17e   : > { %v7457_v19 = vpop.f32.mrb[46].mxu0  ;;  %10360 = vst [vmem:[#allocation82_spill] sm:$0xff] %v7459_v18  ;;  %v5741_v58 = vpop.eup %5740  ;;  %10363 = vst [vmem:[#allocation85_spill] sm:$0xff] %v7470_v50  ;;  %976 = vrot.lane.b32.xlu1 %v953_v26, %s6440_s23  ;;  %v1277_v26 = vand.u32 2147483647, %v7119_v24  ;;  %v2052_v38 = vmin.f32 %v7470_v50, 20.0 }
 0x17f   : > { %10359 = vst [vmem:[#allocation81_spill] sm:$0xff] %v7457_v19  ;;  %v7462_v11 = vpop.f32.mrb[40].mxu1  ;;  %v7464_v62 = vpop.f32.mrb[47].mxu0  ;;  %v1264_v23 = vmul.f32 0.6931472, %v5741_v58  ;;  %v10365_v19 = vld [vmem:[#allocation33_spill] sm:$0xff] }
 0x180   : > { %10361 = vst [vmem:[#allocation83_spill] sm:$0xff] %v7462_v11  ;;  %10362 = vst [vmem:[#allocation84_spill] sm:$0xff] %v7464_v62  ;;  %v7474_v21 = vpop.f32.mrb[41].mxu1  ;;  %v7476_v33 = vpop.eup %5742  ;;  %v1275_v62 = vadd.f32 1.0, %v1274_v17  ;;  %v7480_v48 = vadd.f32 1.0, %v10365_v19  ;;  %v911_v58 = vmul.f32 -0.5, %v7164_v57 }
 0x181   : > { %10364 = vst [vmem:[#allocation86_spill] sm:$0xff] %v7474_v21  ;;  %v7482_v44 = vpop.eup %5744  ;;  %v10369_v21 = vld [vmem:[#allocation12_spill] sm:$0xff]  ;;  %v1270_v11 = vsel %vm1269_vm6, %v1267_v42, %v1264_v23  ;;  %v1640_v17 = vmul.f32 1.442695, %v1617_v29  ;;  %v2068_v46 = vmul.f32 1.442695, %v2053_v59 }
 0x182   : > { %10366 = vst [vmem:[#allocation33_spill] sm:$0xff] %v7480_v48  ;;  %10367 = vst [vmem:[#allocation87_spill] sm:$0xff] %v7482_v44  ;;  %v7486_v40 = vpop.f32.mrb[48].mxu0  ;;  %vm1248_vm7 = vcmp.gt.f32.partialorder %v10369_v21, 20.0  ;;  %5754 = vlog2.f32 %v7480_v48  ;;  %v5747_v34 = vpop.eup %5746  ;;  %v920_v23 = vmul.f32 -0.5, %v10365_v19  ;;  %v7499_v42 = vadd.f32 1.0, %v7178_v1 }
 0x183   : > { %10368 = vst [vmem:[#allocation88_spill] sm:$0xff] %v7486_v40  ;;  %v7491_v43 = vpop.f32.mrb[49].mxu0  ;;  %v1388_v9 = vsel %vm1248_vm7, %v10369_v21, %v1270_v11  ;;  %v1273_v4 = vmul.f32 0.6931472, %v5747_v34  ;;  %v1276_v40 = vmul.f32 %v7119_v24, %v1275_v62  ;;  %v1638_v48 = vmul.f32 1.442695, %v1616_v20  ;;  %v7525_v44 = vpop.eup %5748 }
 0x184   : > { %10370 = vst [vmem:[#allocation12_spill] sm:$0xff] %v7491_v43  ;;  %1402 = vrot.lane.b32.xlu0 %v1388_v9, %s6440_s23  ;;  %10371 = vst [vmem:[#allocation89_spill] sm:$0xff] %v7499_v42  ;;  %v10373_v43 = vld [vmem:[#allocation40_spill] sm:$0xff]  ;;  %v10376_v29 = vld [vmem:[#allocation37_spill] sm:$0xff]  ;;  %vm1278_vm8 = vcmp.lt.f32.partialorder %v1277_v26, 0.0004427343  ;;  %5756 = vlog2.f32 %v7499_v42 }
 0x185   : > { %v7503_v18 = vadd.f32 %v10373_v43, %v10372_v10  ;;  %v10375_v59 = vld [vmem:[#allocation8_spill] sm:$0xff]  ;;  %v10379_v21 = vld [vmem:[#allocation10_spill] sm:$0xff]  ;;  %v1279_v24 = vsel %vm1278_vm8, %v1276_v40, %v1273_v4  ;;  %v912_v62 = vadd.f32 1.0, %v911_v58  ;;  %5758 = vpow2.f32 %v1640_v17  ;;  %v10382_v43 = vld [vmem:[#allocation13_spill] sm:$0xff]  ;;  %10386 = vst [vmem:[#allocation90_spill] sm:$0xff] %v7525_v44  ;;  %v5751_v17 = vpop.eup %5750 }
 0x186   : > { %v7507_v50 = vadd.f32 %v10376_v29, %v10375_v59  ;;  %v7509_v11 = vpop.f32.mrb[50].mxu0  ;;  %vm1249_vm9 = vcmp.gt.f32.partialorder %v10379_v21, 20.0  ;;  %v10383_v9 = vld [vmem:[#allocation44_spill] sm:$0xff]  ;;  %v914_v26 = vand.u32 2147483647, %v7164_v57  ;;  %5760 = vpow2.f32 %v2068_v46  ;;  %v10387_v58 = vld [vmem:[#allocation31_spill] sm:$0xff] }
 0x187   : > { %10374 = vst [vmem:[#allocation11_spill] sm:$0xff] %v7503_v18  ;;  %10378 = vst [vmem:[#allocation8_spill] sm:$0xff] %v7509_v11  ;;  %v7513_v34 = vpop.f32.mrb[42].mxu1  ;;  %v7515_v20 = vpop.f32.mrb[51].mxu0  ;;  %v7519_v37 = vadd.f32 %v10383_v9, %v10382_v43  ;;  %v1389_v29 = vsel %vm1249_vm9, %v10379_v21, %v1279_v24  ;;  %v2066_v40 = vmul.f32 1.442695, %v2052_v38  ;;  %5762 = vpow2.f32 %v1638_v48 }
 0x188   : > { %10377 = vst [vmem:[#allocation40_spill] sm:$0xff] %v7507_v50  ;;  %10380 = vst [vmem:[#allocation37_spill] sm:$0xff] %v7513_v34  ;;  %v7523_v11 = vpop.f32.mrb[43].mxu1  ;;  %1404 = vrot.lane.b32.xlu1 %v1389_v29, %s6440_s23  ;;  %v921_v4 = vadd.f32 1.0, %v920_v23  ;;  %v7529_v42 = vadd.f32 1.0, %v10387_v58  ;;  %v1619_v9 = vmin.f32 %v7503_v18, 20.0  ;;  %v913_v46 = vmul.f32 %v7164_v57, %v912_v62  ;;  %v7543_v48 = vpop.eup %5752 }
 0x189   : > { %10381 = vst [vmem:[#allocation10_spill] sm:$0xff] %v7515_v20  ;;  %10384 = vst [vmem:[#allocation13_spill] sm:$0xff] %v7519_v37  ;;  %v2055_v21 = vmin.f32 %v7507_v50, 20.0  ;;  %v1283_v24 = vmul.f32 -0.5, %v7178_v1  ;;  %v923_v38 = vand.u32 2147483647, %v10365_v19 }
 0x18a   : > { %10385 = vst [vmem:[#allocation44_spill] sm:$0xff] %v7523_v11  ;;  %10388 = vst [vmem:[#allocation31_spill] sm:$0xff] %v7529_v42  ;;  %v7534_v20 = vpop.f32.mrb[52].mxu0  ;;  %v910_v11 = vmul.f32 0.6931472, %v5751_v17  ;;  %5764 = vlog2.f32 %v7529_v42  ;;  %v1618_v18 = vmin.f32 %v7519_v37, 20.0  ;;  %v922_v42 = vmul.f32 %v10365_v19, %v921_v4 }
 0x18b   : > { %10389 = vst [vmem:[#allocation91_spill] sm:$0xff] %v7534_v20  ;;  %v7539_v23 = vpop.f32.mrb[44].mxu1  ;;  %v7541_v29 = vpop.f32.mrb[53].mxu0  ;;  %10392 = vst [vmem:[#allocation94_spill] sm:$0xff] %v7543_v48  ;;  %v10393_v50 = vld [vmem:[#allocation9_spill] sm:$0xff]  ;;  %v10396_v20 = vld [vmem:[#allocation16_spill] sm:$0xff]  ;;  %5766 = vpow2.f32 %v2066_v40 }
 0x18c   : > { %10390 = vst [vmem:[#allocation92_spill] sm:$0xff] %v7539_v23  ;;  %10391 = vst [vmem:[#allocation93_spill] sm:$0xff] %v7541_v29  ;;  %v10394_v34 = vld [vmem:[#allocation41_spill] sm:$0xff]  ;;  %vm814_vm10 = vcmp.gt.f32.partialorder %v10396_v20, 20.0  ;;  %vm915_vm11 = vcmp.lt.f32.partialorder %v914_v26, 0.0004427343  ;;  %v5755_v62 = vpop.eup %5754 }
 0x18d   : > { %v7548_v44 = vadd.f32 %v10394_v34, %v10393_v50  ;;  %v7551_v57 = vpop.f32.mrb[45].mxu1  ;;  %v916_v17 = vsel %vm915_vm11, %v913_v46, %v910_v11  ;;  %v1286_v23 = vand.u32 2147483647, %v7178_v1  ;;  %v10398_v29 = vld [vmem:[#allocation45_spill] sm:$0xff]  ;;  %v919_v48 = vmul.f32 0.6931472, %v5755_v62 }
 0x18e   : > { %10397 = vst [vmem:[#allocation41_spill] sm:$0xff] %v7551_v57  ;;  %v7556_v31 = vadd.f32 1.0, %v10398_v29  ;;  %v954_v37 = vsel %vm814_vm10, %v10396_v20, %v916_v17  ;;  %v1284_v8 = vadd.f32 1.0, %v1283_v24  ;;  %v1292_v34 = vmul.f32 -0.5, %v10387_v58  ;;  %v7560_v3 = vpop.f32.mrb[54].mxu0  ;;  %v10403_v46 = vld [vmem:[#allocation15_spill] sm:$0xff]  ;;  %v5757_v24 = vpop.eup %5756 }
 0x18f   : > { %10395 = vst [vmem:[#allocation9_spill] sm:$0xff] %v7548_v44  ;;  %10400 = vst [vmem:[#allocation45_spill] sm:$0xff] %v7560_v3  ;;  %v1644_v26 = vmul.f32 1.442695, %v1619_v9  ;;  %978 = vrot.lane.b32.xlu0 %v954_v37, %s6440_s23  ;;  %vm924_vm12 = vcmp.lt.f32.partialorder %v923_v38, 0.0004427343  ;;  %v7574_v37 = vadd.f32 %v7225_v51, %v6954_v2  ;;  %v7577_v38 = vpop.eup %5758 }
 0x190   : > { %10399 = vst [vmem:[#allocation16_spill] sm:$0xff] %v7556_v31  ;;  %v7563_v11 = vpop.f32.mrb[46].mxu1  ;;  %v7565_v19 = vpop.f32.mrb[55].mxu0  ;;  %v2072_v4 = vmul.f32 1.442695, %v2055_v21  ;;  %vm815_vm13 = vcmp.gt.f32.partialorder %v10403_v46, 20.0  ;;  %v925_v57 = vsel %vm924_vm12, %v922_v42, %v919_v48  ;;  %5768 = vlog2.f32 %v7556_v31 }
 0x191   : > { %10401 = vst [vmem:[#allocation95_spill] sm:$0xff] %v7563_v11  ;;  %10402 = vst [vmem:[#allocation96_spill] sm:$0xff] %v7565_v19  ;;  %v7569_v20 = vpop.f32.mrb[47].mxu1  ;;  %v1642_v62 = vmul.f32 1.442695, %v1618_v18  ;;  %v2054_v40 = vmin.f32 %v7548_v44, 20.0  ;;  %v955_v9 = vsel %vm815_vm13, %v10403_v46, %v925_v57  ;;  %v1285_v42 = vmul.f32 %v7178_v1, %v1284_v8  ;;  %v7585_v17 = vpop.eup %5760 }
 0x192   : > { %10404 = vst [vmem:[#allocation15_spill] sm:$0xff] %v7569_v20  ;;  %10405 = vst [vmem:[#allocation97_spill] sm:$0xff] %v7574_v37  ;;  %980 = vrot.lane.b32.xlu1 %v955_v9, %s6440_s23  ;;  %v1282_v21 = vmul.f32 0.6931472, %v5757_v24  ;;  %vm7581_vm14 = vcmp.lt.f32.partialorder %v1286_v23, 0.0004427343  ;;  %5770 = vpow2.f32 %v1644_v26  ;;  %v7594_v24 = vpop.eup %5762 }
 0x193   : > { %v1293_v18 = vadd.f32 1.0, %v1292_v34  ;;  %v1295_v51 = vand.u32 2147483647, %v10387_v58  ;;  %v929_v31 = vmul.f32 -0.5, %v10398_v29  ;;  %v10408_v57 = vld [vmem:[#allocation42_spill] sm:$0xff]  ;;  %v7592_v20 = vpop.f32.mrb[48].mxu1  ;;  %5772 = vpow2.f32 %v2072_v4 }
 0x194   : > { %v7590_v46 = vadd.f32 1.0, %v10408_v57  ;;  %10410 = vst [vmem:[#allocation98_spill] sm:$0xff] %v7592_v20  ;;  %v10411_v1 = vld [vmem:[#allocation17_spill] sm:$0xff]  ;;  %v1288_v8 = vsel %vm7581_vm14, %v1285_v42, %v1282_v21  ;;  %v7599_v23 = vpop.f32.mrb[49].mxu1  ;;  %v5765_v34 = vpop.eup %5764  ;;  %v2070_v26 = vmul.f32 1.442695, %v2054_v40 }
 0x195   : > { %vm1250_vm15 = vcmp.gt.f32.partialorder %v10411_v1, 20.0  ;;  %10412 = vst [vmem:[#allocation17_spill] sm:$0xff] %v7599_v23  ;;  %v1621_v19 = vmin.f32 %v7574_v37, 20.0  ;;  %v10413_v20 = vld [vmem:[#allocation48_spill] sm:$0xff]  ;;  %v1291_v4 = vmul.f32 0.6931472, %v5765_v34  ;;  %v1294_v48 = vmul.f32 %v10387_v58, %v1293_v18  ;;  %v7624_v18 = vpop.eup %5766 }
 0x196   : > { %10409 = vst [vmem:[#allocation42_spill] sm:$0xff] %v7590_v46  ;;  %v1390_v9 = vsel %vm1250_vm15, %v10411_v1, %v1288_v8  ;;  %5774 = vlog2.f32 %v7590_v46  ;;  %v7606_v44 = vadd.f32 %v10413_v20, %v6969_v13  ;;  %v7610_v21 = vpop.f32.mrb[56].mxu0  ;;  %vm1296_vm1 = vcmp.lt.f32.partialorder %v1295_v51, 0.0004427343  ;;  %v10416_v42 = vld [vmem:[#allocation46_spill] sm:$0xff] }
 0x197   : > { %1406 = vrot.lane.b32.xlu0 %v1390_v9, %s6440_s23  ;;  %10415 = vst [vmem:[#allocation99_spill] sm:$0xff] %v7610_v21  ;;  %5776 = vpow2.f32 %v1642_v62  ;;  %v930_v40 = vadd.f32 1.0, %v929_v31  ;;  %v7613_v1 = vadd.f32 1.0, %v10416_v42  ;;  %v7615_v8 = vpop.f32.mrb[50].mxu1  ;;  %v10419_v46 = vld [vmem:[#allocation14_spill] sm:$0xff]  ;;  %v1297_v37 = vsel %vm1296_vm1, %v1294_v48, %v1291_v4  ;;  %v7622_v58 = vpop.f32.mrb[57].mxu0 }
 0x198   : > { %10414 = vst [vmem:[#allocation48_spill] sm:$0xff] %v7606_v44  ;;  %10418 = vst [vmem:[#allocation100_spill] sm:$0xff] %v7615_v8  ;;  %vm1251_vm2 = vcmp.gt.f32.partialorder %v10419_v46, 20.0  ;;  %v932_v20 = vand.u32 2147483647, %v10398_v29  ;;  %v938_v9 = vmul.f32 -0.5, %v10408_v57  ;;  %5778 = vpow2.f32 %v2070_v26 }
 0x199   : > { %10417 = vst [vmem:[#allocation46_spill] sm:$0xff] %v7613_v1  ;;  %v7620_v34 = vpop.f32.mrb[51].mxu1  ;;  %10421 = vst [vmem:[#allocation101_spill] sm:$0xff] %v7622_v58  ;;  %v1391_v31 = vsel %vm1251_vm2, %v10419_v46, %v1297_v37  ;;  %v1648_v51 = vmul.f32 1.442695, %v1621_v19  ;;  %5780 = vlog2.f32 %v7613_v1  ;;  %v2057_v48 = vmin.f32 %v7606_v44, 20.0 }
 0x19a   : > { %10420 = vst [vmem:[#allocation14_spill] sm:$0xff] %v7620_v34  ;;  %v5769_v62 = vpop.eup %5768  ;;  %1408 = vrot.lane.b32.xlu1 %v1391_v31, %s6440_s23  ;;  %v7629_v4 = vpop.f32.mrb[58].mxu0  ;;  %v10423_v21 = vld [vmem:[#allocation52_spill] sm:$0xff]  ;;  %v931_v8 = vmul.f32 %v10398_v29, %v930_v40  ;;  %v10426_v37 = vld [vmem:[#allocation49_spill] sm:$0xff]  ;;  %vm933_vm3 = vcmp.lt.f32.partialorder %v932_v20, 0.0004427343 }
 0x19b   : > { %10422 = vst [vmem:[#allocation102_spill] sm:$0xff] %v7629_v4  ;;  %v7634_v34 = vadd.f32 %v10423_v21, %v6957_v5  ;;  %v928_v58 = vmul.f32 0.6931472, %v5769_v62  ;;  %v7637_v26 = vpop.f32.mrb[52].mxu1  ;;  %v7641_v19 = vadd.f32 %v10426_v37, %v6975_v16  ;;  %v939_v46 = vadd.f32 1.0, %v938_v9  ;;  %v10428_v31 = vld [vmem:[#allocation38_spill] sm:$0xff] }
 0x19c   : > { %10425 = vst [vmem:[#allocation103_spill] sm:$0xff] %v7637_v26  ;;  %v7644_v1 = vadd.f32 1.0, %v10428_v31  ;;  %v7646_v4 = vpop.f32.mrb[53].mxu1  ;;  %v7648_v44 = vpop.f32.mrb[59].mxu0  ;;  %v10432_v62 = vld [vmem:[#allocation20_spill] sm:$0xff]  ;;  %v1301_v26 = vmul.f32 -0.5, %v10416_v42  ;;  %5782 = vpow2.f32 %v1648_v51  ;;  %v7670_v51 = vadd.f32 %v7246_v54, %v6982_v7 }
 0x19d   : > { %10424 = vst [vmem:[#allocation52_spill] sm:$0xff] %v7634_v34  ;;  %10427 = vst [vmem:[#allocation49_spill] sm:$0xff] %v7641_v19  ;;  %v7650_v21 = vpop.eup %5770  ;;  %vm816_vm4 = vcmp.gt.f32.partialorder %v10432_v62, 20.0  ;;  %v934_v29 = vsel %vm933_vm3, %v931_v8, %v928_v58  ;;  %v941_v40 = vand.u32 2147483647, %v10408_v57  ;;  %v2056_v11 = vmin.f32 %v7641_v19, 20.0 }
 0x19e   : > { %10429 = vst [vmem:[#allocation38_spill] sm:$0xff] %v7644_v1  ;;  %10430 = vst [vmem:[#allocation104_spill] sm:$0xff] %v7646_v4  ;;  %v7655_v37 = vpop.eup %5772  ;;  %v956_v20 = vsel %vm816_vm4, %v10432_v62, %v934_v29  ;;  %v7658_v9 = vpop.f32.mrb[60].mxu0  ;;  %v2076_v4 = vmul.f32 1.442695, %v2057_v48  ;;  %5784 = vlog2.f32 %v7644_v1  ;;  %v940_v29 = vmul.f32 %v10408_v57, %v939_v46  ;;  %v10442_v19 = vld [vmem:[#allocation19_spill] sm:$0xff] }
 0x19f   : > { %10431 = vst [vmem:[#allocation105_spill] sm:$0xff] %v7648_v44  ;;  %10433 = vst [vmem:[#allocation20_spill] sm:$0xff] %v7655_v37  ;;  %v1620_v44 = vmin.f32 %v7634_v34, 20.0  ;;  %982 = vrot.lane.b32.xlu0 %v956_v20, %s6440_s23  ;;  %v7663_v8 = vpop.f32.mrb[54].mxu1  ;;  %v7665_v58 = vpop.f32.mrb[61].mxu0  ;;  %v7677_v20 = vadd.f32 %v7252_v47, %v6988_v12  ;;  %v1302_v1 = vadd.f32 1.0, %v1301_v26 }
 0x1a0   : > { %10434 = vst [vmem:[#allocation106_spill] sm:$0xff] %v7658_v9  ;;  %v5775_v23 = vpop.eup %5774  ;;  %10435 = vst [vmem:[#allocation107_spill] sm:$0xff] %v7663_v8  ;;  %vm942_vm5 = vcmp.lt.f32.partialorder %v941_v40, 0.0004427343  ;;  %v10439_v9 = vld [vmem:[#allocation53_spill] sm:$0xff]  ;;  %vm817_vm6 = vcmp.gt.f32.partialorder %v10442_v19, 20.0 }
 0x1a1   : > { %10436 = vst [vmem:[#allocation108_spill] sm:$0xff] %v7665_v58  ;;  %10437 = vst [vmem:[#allocation109_spill] sm:$0xff] %v7670_v51  ;;  %v937_v62 = vmul.f32 0.6931472, %v5775_v23  ;;  %v7673_v48 = vpop.eup %5776  ;;  %v7680_v8 = vadd.f32 1.0, %v10439_v9  ;;  %v7682_v58 = vpop.f32.mrb[55].mxu1 }
 0x1a2   : > { %10438 = vst [vmem:[#allocation110_spill] sm:$0xff] %v7677_v20  ;;  %10441 = vst [vmem:[#allocation111_spill] sm:$0xff] %v7682_v58  ;;  %v1304_v23 = vand.u32 2147483647, %v10416_v42  ;;  %v1310_v57 = vmul.f32 -0.5, %v10428_v31  ;;  %v7687_v46 = vpop.f32.mrb[62].mxu0  ;;  %v7689_v34 = vpop.eup %5778 }
 0x1a3   : > { %10440 = vst [vmem:[#allocation53_spill] sm:$0xff] %v7680_v8  ;;  %v943_v54 = vsel %vm942_vm5, %v940_v29, %v937_v62  ;;  %10443 = vst [vmem:[#allocation19_spill] sm:$0xff] %v7687_v46  ;;  %5786 = vlog2.f32 %v7680_v8  ;;  %v7693_v26 = vpop.f32.mrb[63].mxu0  ;;  %v5781_v40 = vpop.eup %5780  ;;  %v1646_v58 = vmul.f32 1.442695, %v1620_v44  ;;  %v2059_v3 = vmin.f32 %v7670_v51, 20.0 }
 0x1a4   : > { %v957_v47 = vsel %vm817_vm6, %v10442_v19, %v943_v54  ;;  %10444 = vst [vmem:[#allocation112_spill] sm:$0xff] %v7693_v26  ;;  %5788 = vpow2.f32 %v2076_v4  ;;  %v10445_v62 = vld [vmem:[#allocation51_spill] sm:$0xff]  ;;  %v2074_v37 = vmul.f32 1.442695, %v2056_v11  ;;  %v7702_v46 = vadd.f32 %v7277_v55, %v6999_v30 }
 0x1a5   : > { %984 = vrot.lane.b32.xlu1 %v957_v47, %s6440_s23  ;;  %v7698_v29 = vadd.f32 1.0, %v10445_v62  ;;  %v1300_v19 = vmul.f32 0.6931472, %v5781_v40  ;;  %v1303_v54 = vmul.f32 %v10416_v42, %v1302_v1  ;;  %v2058_v8 = vmin.f32 %v7677_v20, 20.0  ;;  %v10449_v47 = vld [vmem:[#allocation22_spill] sm:$0xff] }
 0x1a6   : > { %10447 = vst [vmem:[#allocation113_spill] sm:$0xff] %v7702_v46  ;;  %vm1305_vm7 = vcmp.lt.f32.partialorder %v1304_v23, 0.0004427343  ;;  %v1311_v4 = vadd.f32 1.0, %v1310_v57  ;;  %v1319_v44 = vmul.f32 -0.5, %v10439_v9  ;;  %v7707_v26 = vpop.f32.mrb[64].mxu0  ;;  %v7714_v40 = vpop.eup %5782 }
 0x1a7   : > { %10446 = vst [vmem:[#allocation51_spill] sm:$0xff] %v7698_v29  ;;  %10448 = vst [vmem:[#allocation114_spill] sm:$0xff] %v7707_v26  ;;  %vm1252_vm8 = vcmp.gt.f32.partialorder %v10449_v47, 20.0  ;;  %v1306_v51 = vsel %vm1305_vm7, %v1303_v54, %v1300_v19  ;;  %v1313_v11 = vand.u32 2147483647, %v10428_v31  ;;  %5790 = vlog2.f32 %v7698_v29  ;;  %v7712_v55 = vpop.f32.mrb[56].mxu1 }
 0x1a8   : > { %10450 = vst [vmem:[#allocation22_spill] sm:$0xff] %v7712_v55  ;;  %5792 = vpow2.f32 %v1646_v58  ;;  %v2080_v42 = vmul.f32 1.442695, %v2059_v3  ;;  %v1392_v1 = vsel %vm1252_vm8, %v10449_v47, %v1306_v51  ;;  %v7717_v23 = vpop.f32.mrb[65].mxu0  ;;  %v7719_v57 = vpop.f32.mrb[57].mxu1  ;;  %v2061_v19 = vmin.f32 %v7702_v46, 20.0 }
 0x1a9   : > { %10451 = vst [vmem:[#allocation115_spill] sm:$0xff] %v7717_v23  ;;  %10452 = vst [vmem:[#allocation116_spill] sm:$0xff] %v7719_v57  ;;  %v5785_v26 = vpop.eup %5784  ;;  %5794 = vpow2.f32 %v2074_v37  ;;  %v7724_v54 = vadd.f32 %v7283_v6, %v6944_v56  ;;  %1410 = vrot.lane.b32.xlu0 %v1392_v1, %s6440_s23  ;;  %v10454_v29 = vld [vmem:[#allocation59_spill] sm:$0xff]  ;;  %v1312_v58 = vmul.f32 %v10428_v31, %v1311_v4  ;;  %v1320_v51 = vadd.f32 1.0, %v1319_v44  ;;  %v10456_v6 = vld [vmem:[#allocation58_spill] sm:$0xff] }
 0x1aa   : > { %v7728_v55 = vadd.f32 1.0, %v10454_v29  ;;  %v1309_v3 = vmul.f32 0.6931472, %v5785_v26  ;;  %v1328_v47 = vmul.f32 -0.5, %v10445_v62  ;;  %v2078_v57 = vmul.f32 1.442695, %v2058_v8 }
 0x1ab   : > { %10453 = vst [vmem:[#allocation117_spill] sm:$0xff] %v7724_v54  ;;  %vm1314_vm9 = vcmp.lt.f32.partialorder %v1313_v11, 0.0004427343  ;;  %v1322_v37 = vand.u32 2147483647, %v10439_v9  ;;  %v7736_v23 = vadd.f32 %v10456_v6, %v7006_v36  ;;  %v10458_v1 = vld [vmem:[#allocation18_spill] sm:$0xff]  ;;  %v1321_v6 = vmul.f32 %v10439_v9, %v1320_v51 }
 0x1ac   : > { %10455 = vst [vmem:[#allocation59_spill] sm:$0xff] %v7728_v55  ;;  %5796 = vlog2.f32 %v7728_v55  ;;  %vm1253_vm10 = vcmp.gt.f32.partialorder %v10458_v1, 20.0  ;;  %v1315_v46 = vsel %vm1314_vm9, %v1312_v58, %v1309_v3  ;;  %v2084_v20 = vmul.f32 1.442695, %v2061_v19  ;;  %v10459_v4 = vld [vmem:[#allocation61_spill] sm:$0xff]  ;;  %v10462_v58 = vld [vmem:[#allocation54_spill] sm:$0xff] }
 0x1ad   : > { %5798 = vpow2.f32 %v2080_v42  ;;  %10457 = vst [vmem:[#allocation58_spill] sm:$0xff] %v7736_v23  ;;  %v5787_v26 = vpop.eup %5786  ;;  %v2497_v31 = vmin.f32 %v7724_v54, 20.0  ;;  %v7742_v8 = vadd.f32 %v10459_v4, %v6950_v0  ;;  %v1393_v44 = vsel %vm1253_vm10, %v10458_v1, %v1315_v46  ;;  %v7754_v4 = vpop.f32.mrb[66].mxu0 }
 0x1ae   : > { %v7745_v11 = vpop.eup %5788  ;;  %1412 = vrot.lane.b32.xlu1 %v1393_v44, %s6440_s23  ;;  %v1318_v42 = vmul.f32 0.6931472, %v5787_v26  ;;  %v1329_v55 = vadd.f32 1.0, %v1328_v47  ;;  %v1337_v3 = vmul.f32 -0.5, %v10454_v29  ;;  %5800 = vpow2.f32 %v2078_v57  ;;  %10464 = vst [vmem:[#allocation118_spill] sm:$0xff] %v7754_v4  ;;  %v10466_v26 = vld [vmem:[#allocation24_spill] sm:$0xff] }
 0x1af   : > { %10460 = vst [vmem:[#allocation18_spill] sm:$0xff] %v7742_v8  ;;  %10461 = vst [vmem:[#allocation61_spill] sm:$0xff] %v7745_v11  ;;  %vm1323_vm11 = vcmp.lt.f32.partialorder %v1322_v37, 0.0004427343  ;;  %v1331_v19 = vand.u32 2147483647, %v10445_v62  ;;  %v7759_v1 = vadd.f32 %v7310_v61, %v10372_v10  ;;  %5802 = vpow2.f32 %v2084_v20 }
 0x1b0   : > { %v7752_v54 = vadd.f32 1.0, %v10462_v58  ;;  %v2060_v46 = vmin.f32 %v7736_v23, 20.0  ;;  %vm1254_vm12 = vcmp.gt.f32.partialorder %v10466_v26, 20.0  ;;  %v1324_v9 = vsel %vm1323_vm11, %v1321_v6, %v1318_v42  ;;  %v7772_v42 = vpop.f32.mrb[67].mxu0 }
 0x1b1   : > { %10465 = vst [vmem:[#allocation119_spill] sm:$0xff] %v7759_v1  ;;  %v5791_v51 = vpop.eup %5790  ;;  %v2512_v57 = vmul.f32 1.442695, %v2497_v31  ;;  %v7764_v47 = vadd.f32 %v7324_v53, %v10375_v59  ;;  %v1394_v37 = vsel %vm1254_vm12, %v10466_v26, %v1324_v9  ;;  %v2496_v4 = vmin.f32 %v7742_v8, 20.0  ;;  %10468 = vst [vmem:[#allocation120_spill] sm:$0xff] %v7772_v42  ;;  %v10470_v9 = vld [vmem:[#allocation23_spill] sm:$0xff] }
 0x1b2   : > { %10463 = vst [vmem:[#allocation54_spill] sm:$0xff] %v7752_v54  ;;  %v7767_v44 = vpop.eup %5792  ;;  %1414 = vrot.lane.b32.xlu0 %v1394_v37, %s6440_s23  ;;  %v1327_v61 = vmul.f32 0.6931472, %v5791_v51  ;;  %v1330_v23 = vmul.f32 %v10445_v62, %v1329_v55  ;;  %v1338_v11 = vadd.f32 1.0, %v1337_v3  ;;  %vm1332_vm13 = vcmp.lt.f32.partialorder %v1331_v19, 0.0004427343 }
 0x1b3   : > { %10467 = vst [vmem:[#allocation24_spill] sm:$0xff] %v7764_v47  ;;  %v7774_v20 = vpop.eup %5794  ;;  %v1340_v53 = vand.u32 2147483647, %v10454_v29  ;;  %5804 = vlog2.f32 %v7752_v54  ;;  %v7779_v31 = vadd.f32 1.0, %v7343_v28  ;;  %v2082_v6 = vmul.f32 1.442695, %v2060_v46 }
 0x1b4   : > { %v2063_v26 = vmin.f32 %v7759_v1, 20.0  ;;  %vm1255_vm14 = vcmp.gt.f32.partialorder %v10470_v9, 20.0  ;;  %v1333_v51 = vsel %vm1332_vm13, %v1330_v23, %v1327_v61  ;;  %v2499_v55 = vmin.f32 %v7764_v47, 20.0  ;;  %v10473_v42 = vld [vmem:[#allocation55_spill] sm:$0xff] }
 0x1b5   : > { %10469 = vst [vmem:[#allocation121_spill] sm:$0xff] %v7779_v31  ;;  %v7786_v3 = vadd.f32 %v7326_v14, %v10382_v43  ;;  %v1395_v19 = vsel %vm1255_vm14, %v10470_v9, %v1333_v51  ;;  %5806 = vlog2.f32 %v7779_v31  ;;  %v7794_v46 = vadd.f32 %v7339_v27, %v10393_v50  ;;  %v10475_v31 = vld [vmem:[#allocation28_spill] sm:$0xff] }
 0x1b6   : > { %v5797_v62 = vpop.eup %5796  ;;  %1416 = vrot.lane.b32.xlu1 %v1395_v19, %s6440_s23  ;;  %v1339_v61 = vmul.f32 %v10454_v29, %v1338_v11  ;;  %v1346_v54 = vmul.f32 -0.5, %v10462_v58  ;;  %5808 = vpow2.f32 %v2512_v57  ;;  %v2510_v14 = vmul.f32 1.442695, %v2496_v4 }
 0x1b7   : > { %10471 = vst [vmem:[#allocation23_spill] sm:$0xff] %v7786_v3  ;;  %v7790_v37 = vpop.eup %5798  ;;  %10472 = vst [vmem:[#allocation122_spill] sm:$0xff] %v7794_v46  ;;  %v1336_v23 = vmul.f32 0.6931472, %v5797_v62  ;;  %vm1341_vm15 = vcmp.lt.f32.partialorder %v1340_v53, 0.0004427343  ;;  %v7812_v4 = vadd.f32 %v7353_v45, %v6954_v2 }
 0x1b8   : > { %v7800_v9 = vadd.f32 1.0, %v10473_v42  ;;  %v2088_v51 = vmul.f32 1.442695, %v2063_v26  ;;  %vm1256_vm1 = vcmp.gt.f32.partialorder %v10475_v31, 20.0  ;;  %v1709_v27 = vmul.f32 -0.5, %v7343_v28  ;;  %v7804_v1 = vpop.eup %5800 }
 0x1b9   : > { %v1342_v47 = vsel %vm1341_vm15, %v1339_v61, %v1336_v23  ;;  %v2516_v19 = vmul.f32 1.442695, %v2499_v55  ;;  %v2062_v62 = vmin.f32 %v7786_v3, 20.0  ;;  %v2498_v11 = vmin.f32 %v7794_v46, 20.0  ;;  %10476 = vst [vmem:[#allocation28_spill] sm:$0xff] %v7812_v4  ;;  %v7815_v53 = vpop.eup %5802  ;;  %v10479_v3 = vld [vmem:[#allocation25_spill] sm:$0xff] }
 0x1ba   : > { %10474 = vst [vmem:[#allocation55_spill] sm:$0xff] %v7800_v9  ;;  %v1396_v29 = vsel %vm1256_vm1, %v10475_v31, %v1342_v47  ;;  %5810 = vlog2.f32 %v7800_v9  ;;  %v1347_v57 = vadd.f32 1.0, %v1346_v54  ;;  %v7819_v26 = vadd.f32 %v7363_v63, %v6969_v13 }
 0x1bb   : > { %5812 = vpow2.f32 %v2082_v6  ;;  %1418 = vrot.lane.b32.xlu0 %v1396_v29, %s6440_s23  ;;  %v1349_v47 = vand.u32 2147483647, %v10462_v58  ;;  %v7823_v31 = vadd.f32 1.0, %v7420_v52  ;;  %v1710_v6 = vadd.f32 1.0, %v1709_v27 }
 0x1bc   : > { %5814 = vpow2.f32 %v2510_v14  ;;  %10477 = vst [vmem:[#allocation123_spill] sm:$0xff] %v7819_v26  ;;  %v1718_v45 = vmul.f32 -0.5, %v10473_v42  ;;  %v2086_v23 = vmul.f32 1.442695, %v2062_v62  ;;  %v1712_v54 = vand.u32 2147483647, %v7343_v28 }
 0x1bd   : > { %10478 = vst [vmem:[#allocation124_spill] sm:$0xff] %v7823_v31  ;;  %5816 = vpow2.f32 %v2088_v51  ;;  %v5805_v55 = vpop.eup %5804  ;;  %v2514_v61 = vmul.f32 1.442695, %v2498_v11  ;;  %v2065_v14 = vmin.f32 %v7812_v4, 20.0  ;;  %v1348_v63 = vmul.f32 %v10462_v58, %v1347_v57 }
 0x1be   : > { %5818 = vpow2.f32 %v2516_v19  ;;  %v1345_v29 = vmul.f32 0.6931472, %v5805_v55  ;;  %v2501_v46 = vmin.f32 %v7819_v26, 20.0  ;;  %vm1257_vm2 = vcmp.gt.f32.partialorder %v10479_v3, 20.0 }
 0x1bf   : > { %v5807_v9 = vpop.eup %5806  ;;  %vm1350_vm3 = vcmp.lt.f32.partialorder %v1349_v47, 0.0004427343  ;;  %5820 = vlog2.f32 %v7823_v31  ;;  %v1711_v19 = vmul.f32 %v7343_v28, %v1710_v6  ;;  %v1719_v62 = vadd.f32 1.0, %v1718_v45  ;;  %v10481_v47 = vld [vmem:[#allocation30_spill] sm:$0xff] }
 0x1c0   : > { %v1351_v51 = vsel %vm1350_vm3, %v1348_v63, %v1345_v29  ;;  %v1708_v27 = vmul.f32 0.6931472, %v5807_v9  ;;  %v7833_v8 = vpop.eup %5808  ;;  %v7837_v11 = vadd.f32 %v7365_v35, %v6957_v5  ;;  %vm1713_vm4 = vcmp.lt.f32.partialorder %v1712_v54, 0.0004427343 }
 0x1c1   : > { %v1397_v58 = vsel %vm1257_vm2, %v10479_v3, %v1351_v51  ;;  %v1721_v57 = vand.u32 2147483647, %v10473_v42  ;;  %vm1692_vm5 = vcmp.gt.f32.partialorder %v10481_v47, 20.0  ;;  %v1355_v9 = vmul.f32 -0.5, %v7420_v52 }
 0x1c2   : > { %10480 = vst [vmem:[#allocation25_spill] sm:$0xff] %v7837_v11  ;;  %1420 = vrot.lane.b32.xlu1 %v1397_v58, %s6440_s23  ;;  %v1714_v55 = vsel %vm1713_vm4, %v1711_v19, %v1708_v27  ;;  %v7845_v28 = vadd.f32 1.0, %v7367_v41  ;;  %5822 = vpow2.f32 %v2086_v23  ;;  %v2092_v45 = vmul.f32 1.442695, %v2065_v14  ;;  %v10486_v14 = vld [vmem:[#allocation26_spill] sm:$0xff] }
 0x1c3   : > { %v2520_v35 = vmul.f32 1.442695, %v2501_v46  ;;  %v1832_v29 = vsel %vm1692_vm5, %v10481_v47, %v1714_v55  ;;  %v7852_v54 = vadd.f32 %v7373_v60, %v6975_v16  ;;  %v1720_v51 = vmul.f32 %v10473_v42, %v1719_v62 }
 0x1c4   : > { %10482 = vst [vmem:[#allocation30_spill] sm:$0xff] %v7845_v28  ;;  %v5811_v6 = vpop.eup %5810  ;;  %1846 = vrot.lane.b32.xlu0 %v1832_v29, %s6440_s23  ;;  %v7857_v27 = vadd.f32 1.0, %v7434_v49  ;;  %v2064_v46 = vmin.f32 %v7837_v11, 20.0  ;;  %v7864_v23 = vadd.f32 %v7391_v32, %v6982_v7  ;;  %vm1722_vm6 = vcmp.lt.f32.partialorder %v1721_v57, 0.0004427343  ;;  %v10520_v11 = vld [vmem:[#allocation90_spill] sm:$0xff] }
 0x1c5   : > { %v7848_v3 = vpop.eup %5812  ;;  %10483 = vst [vmem:[#allocation125_spill] sm:$0xff] %v7852_v54  ;;  %v1717_v63 = vmul.f32 0.6931472, %v5811_v6  ;;  %5824 = vlog2.f32 %v7845_v28  ;;  %vm1693_vm7 = vcmp.gt.f32.partialorder %v10486_v14, 20.0  ;;  %v1356_v42 = vadd.f32 1.0, %v1355_v9 }
 0x1c6   : > { %10484 = vst [vmem:[#allocation126_spill] sm:$0xff] %v7857_v27  ;;  %v7859_v19 = vpop.eup %5814  ;;  %10485 = vst [vmem:[#allocation127_spill] sm:$0xff] %v7864_v23  ;;  %5826 = vlog2.f32 %v7857_v27  ;;  %v1358_v55 = vand.u32 2147483647, %v7420_v52  ;;  %v1364_v32 = vmul.f32 -0.5, %v7367_v41  ;;  %v7878_v57 = vadd.f32 1.0, %v7405_v15 }
 0x1c7   : > { %v7867_v60 = vpop.eup %5816  ;;  %v1723_v58 = vsel %vm1722_vm6, %v1720_v51, %v1717_v63  ;;  %5828 = vpow2.f32 %v2514_v61  ;;  %v2500_v9 = vmin.f32 %v7852_v54, 20.0  ;;  %v1727_v29 = vmul.f32 -0.5, %v7434_v49 }
 0x1c8   : > { %v7871_v62 = vpop.eup %5818  ;;  %v1833_v47 = vsel %vm1693_vm7, %v10486_v14, %v1723_v58  ;;  %5830 = vpow2.f32 %v2092_v45  ;;  %10487 = vst [vmem:[#allocation26_spill] sm:$0xff] %v7878_v57  ;;  %v2090_v63 = vmul.f32 1.442695, %v2064_v46  ;;  %v2503_v61 = vmin.f32 %v7864_v23, 20.0  ;;  %v10489_v58 = vld [vmem:[#allocation39_spill] sm:$0xff] }
 0x1c9   : > { %1848 = vrot.lane.b32.xlu1 %v1833_v47, %s6440_s23  ;;  %v5821_v6 = vpop.eup %5820  ;;  %5832 = vpow2.f32 %v2520_v35  ;;  %v1357_v14 = vmul.f32 %v7420_v52, %v1356_v42  ;;  %v7886_v45 = vadd.f32 %v7394_v22, %v6988_v12  ;;  %vm1359_vm8 = vcmp.lt.f32.partialorder %v1358_v55, 0.0004427343 }
 0x1ca   : > { %v1354_v51 = vmul.f32 0.6931472, %v5821_v6  ;;  %5834 = vlog2.f32 %v7878_v57  ;;  %vm1258_vm9 = vcmp.gt.f32.partialorder %v10489_v58, 20.0  ;;  %v1365_v47 = vadd.f32 1.0, %v1364_v32 }
 0x1cb   : > { %10488 = vst [vmem:[#allocation128_spill] sm:$0xff] %v7886_v45  ;;  %v1367_v27 = vand.u32 2147483647, %v7367_v41  ;;  %v1728_v6 = vadd.f32 1.0, %v1727_v29  ;;  %v1730_v52 = vand.u32 2147483647, %v7434_v49  ;;  %5836 = vpow2.f32 %v2090_v63 }
 0x1cc   : > { %v1360_v35 = vsel %vm1359_vm8, %v1357_v14, %v1354_v51  ;;  %v7891_v28 = vpop.eup %5822  ;;  %v7896_v42 = vadd.f32 1.0, %v7476_v33  ;;  %v2518_v22 = vmul.f32 1.442695, %v2500_v9  ;;  %v2524_v55 = vmul.f32 1.442695, %v2503_v61  ;;  %v10493_v9 = vld [vmem:[#allocation70_spill] sm:$0xff] }
 0x1cd   : > { %v1398_v46 = vsel %vm1258_vm9, %v10489_v58, %v1360_v35  ;;  %v1736_v51 = vmul.f32 -0.5, %v7405_v15  ;;  %v2502_v14 = vmin.f32 %v7886_v45, 20.0  ;;  %v7903_v57 = vadd.f32 %v7408_v25, %v6999_v30  ;;  %v10495_v58 = vld [vmem:[#allocation32_spill] sm:$0xff] }
 0x1ce   : > { %10490 = vst [vmem:[#allocation39_spill] sm:$0xff] %v7896_v42  ;;  %1422 = vrot.lane.b32.xlu0 %v1398_v46, %s6440_s23  ;;  %v7907_v29 = vadd.f32 %v7403_v39, %v6944_v56  ;;  %5838 = vlog2.f32 %v7896_v42  ;;  %v7912_v61 = vadd.f32 %v10493_v9, %v7006_v36  ;;  %vm1259_vm10 = vcmp.gt.f32.partialorder %v10495_v58, 20.0  ;;  %v10496_v9 = vld [vmem:[#allocation79_spill] sm:$0xff] }
 0x1cf   : > { %v5825_v32 = vpop.eup %5824  ;;  %10491 = vst [vmem:[#allocation129_spill] sm:$0xff] %v7903_v57  ;;  %v1366_v46 = vmul.f32 %v7367_v41, %v1365_v47  ;;  %vm1368_vm11 = vcmp.lt.f32.partialorder %v1367_v27, 0.0004427343  ;;  %v1729_v23 = vmul.f32 %v7434_v49, %v1728_v6  ;;  %vm1731_vm12 = vcmp.lt.f32.partialorder %v1730_v52, 0.0004427343  ;;  %v10498_v47 = vld [vmem:[#allocation47_spill] sm:$0xff] }
 0x1d0   : > { %10492 = vst [vmem:[#allocation130_spill] sm:$0xff] %v7907_v29  ;;  %v5827_v63 = vpop.eup %5826  ;;  %10494 = vst [vmem:[#allocation70_spill] sm:$0xff] %v7912_v61  ;;  %v1363_v35 = vmul.f32 0.6931472, %v5825_v32  ;;  %v1737_v45 = vadd.f32 1.0, %v1736_v51  ;;  %v1373_v26 = vmul.f32 -0.5, %v7476_v33  ;;  %5840 = vpow2.f32 %v2518_v22 }
 0x1d1   : > { %v7916_v31 = vpop.eup %5828  ;;  %v1726_v25 = vmul.f32 0.6931472, %v5827_v63  ;;  %v7923_v54 = vadd.f32 1.0, %v10496_v9  ;;  %vm1694_vm13 = vcmp.gt.f32.partialorder %v10498_v47, 20.0  ;;  %v1739_v32 = vand.u32 2147483647, %v7405_v15 }
 0x1d2   : > { %v7919_v39 = vpop.eup %5830  ;;  %v1369_v42 = vsel %vm1368_vm11, %v1366_v46, %v1363_v35  ;;  %v2522_v49 = vmul.f32 1.442695, %v2502_v14  ;;  %v2505_v51 = vmin.f32 %v7903_v57, 20.0  ;;  %v2941_v63 = vmin.f32 %v7907_v29, 20.0  ;;  %v10499_v35 = vld [vmem:[#allocation71_spill] sm:$0xff]  ;;  %v10504_v29 = vld [vmem:[#allocation74_spill] sm:$0xff] }
 0x1d3   : > { %10497 = vst [vmem:[#allocation32_spill] sm:$0xff] %v7923_v54  ;;  %v7925_v4 = vpop.eup %5832  ;;  %v1399_v41 = vsel %vm1259_vm10, %v10495_v58, %v1369_v42  ;;  %v1732_v27 = vsel %vm1731_vm12, %v1729_v23, %v1726_v25  ;;  %v7936_v46 = vadd.f32 %v10499_v35, %v6950_v0  ;;  %5842 = vlog2.f32 %v7923_v54  ;;  %v10501_v14 = vld [vmem:[#allocation87_spill] sm:$0xff]  ;;  %v10516_v57 = vld [vmem:[#allocation57_spill] sm:$0xff] }
 0x1d4   : > { %1424 = vrot.lane.b32.xlu1 %v1399_v41, %s6440_s23  ;;  %v1834_v6 = vsel %vm1694_vm13, %v10498_v47, %v1732_v27  ;;  %v5835_v52 = vpop.eup %5834  ;;  %v1738_v42 = vmul.f32 %v7405_v15, %v1737_v45  ;;  %v1374_v22 = vadd.f32 1.0, %v1373_v26  ;;  %v7942_v58 = vadd.f32 1.0, %v10501_v14  ;;  %v10503_v27 = vld [vmem:[#allocation36_spill] sm:$0xff] }
 0x1d5   : > { %10500 = vst [vmem:[#allocation79_spill] sm:$0xff] %v7936_v46  ;;  %1850 = vrot.lane.b32.xlu0 %v1834_v6, %s6440_s23  ;;  %v1735_v23 = vmul.f32 0.6931472, %v5835_v52  ;;  %5844 = vpow2.f32 %v2524_v55  ;;  %v2504_v25 = vmin.f32 %v7912_v61, 20.0  ;;  %vm1740_vm14 = vcmp.lt.f32.partialorder %v1739_v32, 0.0004427343  ;;  %v7946_v47 = vpop.eup %5836 }
 0x1d6   : > { %10502 = vst [vmem:[#allocation47_spill] sm:$0xff] %v7942_v58  ;;  %v1376_v41 = vand.u32 2147483647, %v7476_v33  ;;  %vm1695_vm15 = vcmp.gt.f32.partialorder %v10503_v27, 20.0  ;;  %v1382_v35 = vmul.f32 -0.5, %v10496_v9  ;;  %5846 = vlog2.f32 %v7942_v58  ;;  %v10506_v58 = vld [vmem:[#allocation82_spill] sm:$0xff] }
 0x1d7   : > { %v1741_v6 = vsel %vm1740_vm14, %v1738_v42, %v1735_v23  ;;  %5848 = vpow2.f32 %v2522_v49  ;;  %v2528_v26 = vmul.f32 1.442695, %v2505_v51  ;;  %v2956_v55 = vmul.f32 1.442695, %v2941_v63 }
 0x1d8   : > { %v5839_v15 = vpop.eup %5838  ;;  %v1835_v45 = vsel %vm1695_vm15, %v10503_v27, %v1741_v6  ;;  %v2940_v52 = vmin.f32 %v7936_v46, 20.0  ;;  %v1375_v54 = vmul.f32 %v7476_v33, %v1374_v22  ;;  %v7957_v23 = vadd.f32 %v10504_v29, %v10372_v10  ;;  %v10508_v27 = vld [vmem:[#allocation62_spill] sm:$0xff] }
 0x1d9   : > { %1852 = vrot.lane.b32.xlu1 %v1835_v45, %s6440_s23  ;;  %v1372_v32 = vmul.f32 0.6931472, %v5839_v15  ;;  %vm1377_vm1 = vcmp.lt.f32.partialorder %v1376_v41, 0.0004427343  ;;  %v1745_v42 = vmul.f32 -0.5, %v10501_v14  ;;  %v7961_v49 = vadd.f32 1.0, %v10506_v58 }
 0x1da   : > { %10505 = vst [vmem:[#allocation71_spill] sm:$0xff] %v7957_v23  ;;  %v2526_v51 = vmul.f32 1.442695, %v2504_v25  ;;  %vm1260_vm2 = vcmp.gt.f32.partialorder %v10508_v27, 20.0  ;;  %v1383_v6 = vadd.f32 1.0, %v1382_v35  ;;  %v10509_v45 = vld [vmem:[#allocation72_spill] sm:$0xff]  ;;  %v7971_v22 = vpop.eup %5840 }
 0x1db   : > { %10507 = vst [vmem:[#allocation87_spill] sm:$0xff] %v7961_v49  ;;  %v1378_v63 = vsel %vm1377_vm1, %v1375_v54, %v1372_v32  ;;  %v7966_v15 = vadd.f32 %v10509_v45, %v10375_v59  ;;  %v1385_v29 = vand.u32 2147483647, %v10496_v9  ;;  %5850 = vlog2.f32 %v7961_v49  ;;  %v10511_v35 = vld [vmem:[#allocation94_spill] sm:$0xff] }
 0x1dc   : > { %v1400_v33 = vsel %vm1260_vm2, %v10508_v27, %v1378_v63  ;;  %5852 = vpow2.f32 %v2528_v26  ;;  %v2507_v54 = vmin.f32 %v7957_v23, 20.0  ;;  %v1746_v41 = vadd.f32 1.0, %v1745_v42  ;;  %v10514_v42 = vld [vmem:[#allocation78_spill] sm:$0xff] }
 0x1dd   : > { %10510 = vst [vmem:[#allocation36_spill] sm:$0xff] %v7966_v15  ;;  %1426 = vrot.lane.b32.xlu0 %v1400_v33, %s6440_s23  ;;  %v5843_v25 = vpop.eup %5842  ;;  %5854 = vpow2.f32 %v2956_v55  ;;  %v7976_v32 = vadd.f32 1.0, %v10511_v35  ;;  %v1384_v27 = vmul.f32 %v10496_v9, %v1383_v6  ;;  %v1748_v63 = vand.u32 2147483647, %v10501_v14  ;;  %v10517_v6 = vld [vmem:[#allocation75_spill] sm:$0xff] }
 0x1de   : > { %v1381_v45 = vmul.f32 0.6931472, %v5843_v25  ;;  %v1754_v49 = vmul.f32 -0.5, %v10506_v58  ;;  %5856 = vpow2.f32 %v2526_v51  ;;  %v2954_v26 = vmul.f32 1.442695, %v2940_v52 }
 0x1df   : > { %10512 = vst [vmem:[#allocation74_spill] sm:$0xff] %v7976_v32  ;;  %v7981_v46 = vpop.eup %5844  ;;  %v2943_v33 = vmin.f32 %v7966_v15, 20.0  ;;  %vm1386_vm3 = vcmp.lt.f32.partialorder %v1385_v29, 0.0004427343  ;;  %v7986_v23 = vadd.f32 %v10514_v42, %v10382_v43  ;;  %vm1261_vm4 = vcmp.gt.f32.partialorder %v10516_v57, 20.0  ;;  %v10519_v42 = vld [vmem:[#allocation63_spill] sm:$0xff] }
 0x1e0   : > { %10513 = vst [vmem:[#allocation82_spill] sm:$0xff] %v7981_v46  ;;  %v5847_v55 = vpop.eup %5846  ;;  %v1387_v25 = vsel %vm1386_vm3, %v1384_v27, %v1381_v45  ;;  %5858 = vlog2.f32 %v7976_v32  ;;  %v7994_v61 = vadd.f32 %v10517_v6, %v10393_v50  ;;  %v1747_v29 = vmul.f32 %v10501_v14, %v1746_v41 }
 0x1e1   : > { %10515 = vst [vmem:[#allocation62_spill] sm:$0xff] %v7986_v23  ;;  %v7990_v9 = vpop.eup %5848  ;;  %v1401_v52 = vsel %vm1261_vm4, %v10516_v57, %v1387_v25  ;;  %v1744_v51 = vmul.f32 0.6931472, %v5847_v55  ;;  %v2532_v15 = vmul.f32 1.442695, %v2507_v54  ;;  %vm1696_vm5 = vcmp.gt.f32.partialorder %v10519_v42, 20.0 }
 0x1e2   : > { %10518 = vst [vmem:[#allocation72_spill] sm:$0xff] %v7994_v61  ;;  %1428 = vrot.lane.b32.xlu1 %v1401_v52, %s6440_s23  ;;  %vm1749_vm6 = vcmp.lt.f32.partialorder %v1748_v63, 0.0004427343  ;;  %v1755_v45 = vadd.f32 1.0, %v1754_v49  ;;  %v1757_v32 = vand.u32 2147483647, %v10506_v58  ;;  %5860 = vpow2.f32 %v2954_v26 }
 0x1e3   : > { %v1750_v27 = vsel %vm1749_vm6, %v1747_v29, %v1744_v51  ;;  %v1763_v46 = vmul.f32 -0.5, %v10511_v35  ;;  %v8003_v6 = vadd.f32 1.0, %v10520_v11  ;;  %v2960_v57 = vmul.f32 1.442695, %v2943_v33  ;;  %v10522_v63 = vld [vmem:[#allocation83_spill] sm:$0xff]  ;;  %v10524_v26 = vld [vmem:[#allocation81_spill] sm:$0xff] }
 0x1e4   : > { %v1836_v55 = vsel %vm1696_vm5, %v10519_v42, %v1750_v27  ;;  %v2506_v54 = vmin.f32 %v7986_v23, 20.0  ;;  %v2942_v41 = vmin.f32 %v7994_v61, 20.0  ;;  %v8010_v49 = vadd.f32 %v10522_v63, %v6954_v2 }
 0x1e5   : > { %10521 = vst [vmem:[#allocation94_spill] sm:$0xff] %v8003_v6  ;;  %v5851_v14 = vpop.eup %5850  ;;  %1854 = vrot.lane.b32.xlu0 %v1836_v55, %s6440_s23  ;;  %5862 = vlog2.f32 %v8003_v6  ;;  %v8018_v33 = vadd.f32 %v10524_v26, %v6969_v13  ;;  %v1756_v51 = vmul.f32 %v10506_v58, %v1755_v45  ;;  %v8022_v29 = vadd.f32 1.0, %v7594_v24  ;;  %v10528_v55 = vld [vmem:[#allocation60_spill] sm:$0xff] }
 0x1e6   : > { %10523 = vst [vmem:[#allocation78_spill] sm:$0xff] %v8010_v49  ;;  %v8014_v25 = vpop.eup %5852  ;;  %v1753_v52 = vmul.f32 0.6931472, %v5851_v14  ;;  %5864 = vpow2.f32 %v2532_v15  ;;  %vm1758_vm7 = vcmp.lt.f32.partialorder %v1757_v32, 0.0004427343  ;;  %v1764_v27 = vadd.f32 1.0, %v1763_v46 }
 0x1e7   : > { %10525 = vst [vmem:[#allocation57_spill] sm:$0xff] %v8018_v33  ;;  %10526 = vst [vmem:[#allocation75_spill] sm:$0xff] %v8022_v29  ;;  %v8024_v42 = vpop.eup %5854  ;;  %vm1697_vm8 = vcmp.gt.f32.partialorder %v10528_v55, 20.0  ;;  %v1766_v6 = vand.u32 2147483647, %v10511_v35  ;;  %v1772_v61 = vmul.f32 -0.5, %v10520_v11  ;;  %5866 = vpow2.f32 %v2960_v57 }
 0x1e8   : > { %10527 = vst [vmem:[#allocation63_spill] sm:$0xff] %v8024_v42  ;;  %v1759_v63 = vsel %vm1758_vm7, %v1756_v51, %v1753_v52  ;;  %v8029_v26 = vpop.eup %5856  ;;  %v2530_v14 = vmul.f32 1.442695, %v2506_v54  ;;  %v2958_v23 = vmul.f32 1.442695, %v2942_v41  ;;  %v2509_v42 = vmin.f32 %v8010_v49, 20.0 }
 0x1e9   : > { %v1837_v58 = vsel %vm1697_vm8, %v10528_v55, %v1759_v63  ;;  %v2945_v15 = vmin.f32 %v8018_v33, 20.0  ;;  %5868 = vlog2.f32 %v8022_v29  ;;  %v10529_v46 = vld [vmem:[#allocation86_spill] sm:$0xff]  ;;  %v1765_v57 = vmul.f32 %v10511_v35, %v1764_v27  ;;  %v10532_v41 = vld [vmem:[#allocation84_spill] sm:$0xff]  ;;  %v10534_v55 = vld [vmem:[#allocation67_spill] sm:$0xff] }
 0x1ea   : > { %v5859_v45 = vpop.eup %5858  ;;  %1856 = vrot.lane.b32.xlu1 %v1837_v58, %s6440_s23  ;;  %v8038_v32 = vadd.f32 %v10529_v46, %v6957_v5  ;;  %v8042_v54 = vadd.f32 1.0, %v7577_v38  ;;  %v8046_v51 = vadd.f32 %v10532_v41, %v6975_v16  ;;  %vm1698_vm9 = vcmp.gt.f32.partialorder %v10534_v55, 20.0  ;;  %v10535_v35 = vld [vmem:[#allocation88_spill] sm:$0xff] }
 0x1eb   : > { %v1762_v52 = vmul.f32 0.6931472, %v5859_v45  ;;  %vm1767_vm10 = vcmp.lt.f32.partialorder %v1766_v6, 0.0004427343  ;;  %v1773_v63 = vadd.f32 1.0, %v1772_v61  ;;  %v1781_v46 = vmul.f32 -0.5, %v7594_v24 }
 0x1ec   : > { %10530 = vst [vmem:[#allocation90_spill] sm:$0xff] %v8038_v32  ;;  %10531 = vst [vmem:[#allocation83_spill] sm:$0xff] %v8042_v54  ;;  %v1775_v29 = vand.u32 2147483647, %v10520_v11  ;;  %5870 = vlog2.f32 %v8042_v54  ;;  %v8052_v45 = vpop.eup %5860  ;;  %v8056_v27 = vadd.f32 %v10535_v35, %v6982_v7  ;;  %v2536_v6 = vmul.f32 1.442695, %v2509_v42 }
 0x1ed   : > { %10533 = vst [vmem:[#allocation81_spill] sm:$0xff] %v8046_v51  ;;  %v1768_v58 = vsel %vm1767_vm10, %v1765_v57, %v1762_v52  ;;  %5872 = vpow2.f32 %v2530_v14  ;;  %v2964_v61 = vmul.f32 1.442695, %v2945_v15  ;;  %v8061_v52 = vadd.f32 1.0, %v7624_v18  ;;  %v10538_v15 = vld [vmem:[#allocation66_spill] sm:$0xff] }
 0x1ee   : > { %10536 = vst [vmem:[#allocation60_spill] sm:$0xff] %v8056_v27  ;;  %v1838_v41 = vsel %vm1698_vm9, %v10534_v55, %v1768_v58  ;;  %5874 = vpow2.f32 %v2958_v23  ;;  %v2508_v57 = vmin.f32 %v8038_v32, 20.0  ;;  %v1774_v14 = vmul.f32 %v10520_v11, %v1773_v63  ;;  %v10540_v11 = vld [vmem:[#allocation12_spill] sm:$0xff] }
 0x1ef   : > { %v5863_v33 = vpop.eup %5862  ;;  %1858 = vrot.lane.b32.xlu0 %v1838_v41, %s6440_s23  ;;  %10537 = vst [vmem:[#allocation86_spill] sm:$0xff] %v8061_v52  ;;  %v1790_v49 = vmul.f32 -0.5, %v7577_v38  ;;  %v2944_v55 = vmin.f32 %v8046_v51, 20.0  ;;  %vm1776_vm11 = vcmp.lt.f32.partialorder %v1775_v29, 0.0004427343  ;;  %v1782_v23 = vadd.f32 1.0, %v1781_v46 }
 0x1f0   : > { %v1771_v54 = vmul.f32 0.6931472, %v5863_v33  ;;  %v8066_v35 = vpop.eup %5864  ;;  %5876 = vlog2.f32 %v8061_v52  ;;  %v2947_v42 = vmin.f32 %v8056_v27, 20.0  ;;  %vm1699_vm12 = vcmp.gt.f32.partialorder %v10538_v15, 20.0 }
 0x1f1   : > { %v1784_v41 = vand.u32 2147483647, %v7594_v24  ;;  %v8073_v33 = vpop.eup %5866  ;;  %5878 = vpow2.f32 %v2536_v6  ;;  %v8077_v63 = vadd.f32 %v10540_v11, %v6988_v12  ;;  %v1791_v46 = vadd.f32 1.0, %v1790_v49  ;;  %v10543_v49 = vld [vmem:[#allocation8_spill] sm:$0xff] }
 0x1f2   : > { %v1777_v58 = vsel %vm1776_vm11, %v1774_v14, %v1771_v54  ;;  %10539 = vst [vmem:[#allocation84_spill] sm:$0xff] %v8073_v33  ;;  %5880 = vpow2.f32 %v2964_v61  ;;  %v2153_v52 = vmul.f32 -0.5, %v7624_v18  ;;  %v8083_v54 = vadd.f32 1.0, %v7585_v17 }
 0x1f3   : > { %10541 = vst [vmem:[#allocation67_spill] sm:$0xff] %v8077_v63  ;;  %v1839_v51 = vsel %vm1699_vm12, %v10538_v15, %v1777_v58  ;;  %v5869_v29 = vpop.eup %5868  ;;  %v2534_v14 = vmul.f32 1.442695, %v2508_v57  ;;  %v1783_v6 = vmul.f32 %v7594_v24, %v1782_v23  ;;  %v1793_v32 = vand.u32 2147483647, %v7577_v38  ;;  %v10545_v58 = vld [vmem:[#allocation80_spill] sm:$0xff] }
 0x1f4   : > { %1860 = vrot.lane.b32.xlu1 %v1839_v51, %s6440_s23  ;;  %10542 = vst [vmem:[#allocation88_spill] sm:$0xff] %v8083_v54  ;;  %v1780_v27 = vmul.f32 0.6931472, %v5869_v29  ;;  %v2962_v11 = vmul.f32 1.442695, %v2944_v55  ;;  %5882 = vlog2.f32 %v8083_v54  ;;  %v2946_v51 = vmin.f32 %v8077_v63, 20.0 }
 0x1f5   : > { %v2968_v33 = vmul.f32 1.442695, %v2947_v42  ;;  %vm1785_vm13 = vcmp.lt.f32.partialorder %v1784_v41, 0.0004427343  ;;  %v8091_v15 = vadd.f32 %v10543_v49, %v6999_v30  ;;  %vm1700_vm14 = vcmp.gt.f32.partialorder %v10545_v58, 20.0 }
 0x1f6   : > { %v5871_v61 = vpop.eup %5870  ;;  %v1786_v57 = vsel %vm1785_vm13, %v1783_v6, %v1780_v27  ;;  %v1792_v55 = vmul.f32 %v7577_v38, %v1791_v46  ;;  %v2154_v42 = vadd.f32 1.0, %v2153_v52  ;;  %5884 = vpow2.f32 %v2534_v14  ;;  %v10546_v27 = vld [vmem:[#allocation73_spill] sm:$0xff] }
 0x1f7   : > { %10544 = vst [vmem:[#allocation66_spill] sm:$0xff] %v8091_v15  ;;  %v8094_v29 = vpop.eup %5872  ;;  %v1840_v24 = vsel %vm1700_vm14, %v10545_v58, %v1786_v57  ;;  %v1789_v23 = vmul.f32 0.6931472, %v5871_v61  ;;  %vm1794_vm15 = vcmp.lt.f32.partialorder %v1793_v32, 0.0004427343  ;;  %v2162_v54 = vmul.f32 -0.5, %v7585_v17 }
 0x1f8   : > { %v8098_v41 = vpop.eup %5874  ;;  %1862 = vrot.lane.b32.xlu0 %v1840_v24, %s6440_s23  ;;  %v2156_v49 = vand.u32 2147483647, %v7624_v18  ;;  %5886 = vpow2.f32 %v2962_v11  ;;  %vm1701_vm1 = vcmp.gt.f32.partialorder %v10546_v27, 20.0  ;;  %v8105_v58 = vadd.f32 1.0, %v7673_v48  ;;  %v10548_v52 = vld [vmem:[#allocation37_spill] sm:$0xff] }
 0x1f9   : > { %v1795_v6 = vsel %vm1794_vm15, %v1792_v55, %v1789_v23  ;;  %5888 = vpow2.f32 %v2968_v33  ;;  %v2966_v38 = vmul.f32 1.442695, %v2946_v51  ;;  %v8109_v46 = vadd.f32 %v10548_v52, %v6944_v56  ;;  %v10551_v33 = vld [vmem:[#allocation10_spill] sm:$0xff] }
 0x1fa   : > { %10547 = vst [vmem:[#allocation12_spill] sm:$0xff] %v8105_v58  ;;  %v5877_v61 = vpop.eup %5876  ;;  %v1841_v32 = vsel %vm1701_vm1, %v10546_v27, %v1795_v6  ;;  %v2949_v14 = vmin.f32 %v8091_v15, 20.0  ;;  %v2155_v57 = vmul.f32 %v7624_v18, %v2154_v42  ;;  %5890 = vlog2.f32 %v8105_v58  ;;  %v10555_v6 = vld [vmem:[#allocation44_spill] sm:$0xff]  ;;  %v10557_v18 = vld [vmem:[#allocation85_spill] sm:$0xff]  ;;  %v10558_v15 = vld [vmem:[#allocation91_spill] sm:$0xff] }
 0x1fb   : > { %10549 = vst [vmem:[#allocation8_spill] sm:$0xff] %v8109_v46  ;;  %1864 = vrot.lane.b32.xlu1 %v1841_v32, %s6440_s23  ;;  %v2152_v11 = vmul.f32 0.6931472, %v5877_v61  ;;  %v8116_v24 = vpop.eup %5878  ;;  %v8120_v51 = vadd.f32 %v10551_v33, %v7006_v36  ;;  %vm2157_vm2 = vcmp.lt.f32.partialorder %v2156_v49, 0.0004427343  ;;  %v2163_v23 = vadd.f32 1.0, %v2162_v54 }
 0x1fc   : > { %10550 = vst [vmem:[#allocation80_spill] sm:$0xff] %v8116_v24  ;;  %v8123_v55 = vadd.f32 1.0, %v7650_v21  ;;  %v8125_v27 = vpop.eup %5880  ;;  %v8129_v61 = vadd.f32 %v10555_v6, %v6950_v0  ;;  %vm2136_vm3 = vcmp.gt.f32.partialorder %v10557_v18, 20.0  ;;  %v2165_v52 = vand.u32 2147483647, %v7585_v17 }
 0x1fd   : > { %10552 = vst [vmem:[#allocation73_spill] sm:$0xff] %v8120_v51  ;;  %10554 = vst [vmem:[#allocation10_spill] sm:$0xff] %v8125_v27  ;;  %v2158_v42 = vsel %vm2157_vm2, %v2155_v57, %v2152_v11  ;;  %5892 = vpow2.f32 %v2966_v38  ;;  %v1799_v49 = vmul.f32 -0.5, %v7673_v48  ;;  %v2972_v33 = vmul.f32 1.442695, %v2949_v14 }
 0x1fe   : > { %10553 = vst [vmem:[#allocation37_spill] sm:$0xff] %v8123_v55  ;;  %10556 = vst [vmem:[#allocation44_spill] sm:$0xff] %v8129_v61  ;;  %v2276_v32 = vsel %vm2136_vm3, %v10557_v18, %v2158_v42  ;;  %v5883_v54 = vpop.eup %5882  ;;  %v3385_v58 = vmin.f32 %v8109_v46, 20.0  ;;  %5894 = vlog2.f32 %v8123_v55  ;;  %v2948_v6 = vmin.f32 %v8120_v51, 20.0  ;;  %v10560_v42 = vld [vmem:[#allocation92_spill] sm:$0xff] }
 0x1ff   : > { %2290 = vrot.lane.b32.xlu0 %v2276_v32, %s6440_s23  ;;  %v8141_v11 = vadd.f32 %v10558_v15, %v10372_v10  ;;  %v2161_v57 = vmul.f32 0.6931472, %v5883_v54  ;;  %v2164_v38 = vmul.f32 %v7585_v17, %v2163_v23  ;;  %v3384_v18 = vmin.f32 %v8129_v61, 20.0  ;;  %v10563_v46 = vld [vmem:[#allocation76_spill] sm:$0xff] }
 0x200   : > { %v8147_v14 = vadd.f32 %v10560_v42, %v10375_v59  ;;  %vm2166_vm4 = vcmp.lt.f32.partialorder %v2165_v52, 0.0004427343  ;;  %v8150_v32 = vadd.f32 1.0, %v7689_v34  ;;  %v8152_v55 = vpop.eup %5884  ;;  %vm2137_vm5 = vcmp.gt.f32.partialorder %v10563_v46, 20.0 }
 0x201   : > { %10559 = vst [vmem:[#allocation85_spill] sm:$0xff] %v8141_v11  ;;  %v2167_v51 = vsel %vm2166_vm4, %v2164_v38, %v2161_v57  ;;  %v1800_v15 = vadd.f32 1.0, %v1799_v49  ;;  %v1808_v54 = vmul.f32 -0.5, %v7650_v21  ;;  %5896 = vpow2.f32 %v2972_v33  ;;  %v10566_v33 = vld [vmem:[#allocation93_spill] sm:$0xff] }
 0x202   : > { %10561 = vst [vmem:[#allocation91_spill] sm:$0xff] %v8147_v14  ;;  %10562 = vst [vmem:[#allocation92_spill] sm:$0xff] %v8150_v32  ;;  %v8156_v63 = vpop.eup %5886  ;;  %v3400_v17 = vmul.f32 1.442695, %v3385_v58  ;;  %v2277_v23 = vsel %vm2137_vm5, %v10563_v46, %v2167_v51  ;;  %v1802_v42 = vand.u32 2147483647, %v7673_v48  ;;  %5898 = vlog2.f32 %v8150_v32 }
 0x203   : > { %10564 = vst [vmem:[#allocation76_spill] sm:$0xff] %v8156_v63  ;;  %v8160_v52 = vpop.eup %5888  ;;  %v2970_v61 = vmul.f32 1.442695, %v2948_v6  ;;  %2292 = vrot.lane.b32.xlu1 %v2277_v23, %s6440_s23  ;;  %v3398_v57 = vmul.f32 1.442695, %v3384_v18  ;;  %v2951_v49 = vmin.f32 %v8141_v11, 20.0  ;;  %v8168_v58 = vadd.f32 %v10566_v33, %v10382_v43 }
 0x204   : > { %10565 = vst [vmem:[#allocation131_spill] sm:$0xff] %v8160_v52  ;;  %v5891_v27 = vpop.eup %5890  ;;  %v3387_v38 = vmin.f32 %v8147_v14, 20.0  ;;  %v1801_v51 = vmul.f32 %v7673_v48, %v1800_v15  ;;  %v1809_v63 = vadd.f32 1.0, %v1808_v54  ;;  %v10568_v52 = vld [vmem:[#allocation20_spill] sm:$0xff]  ;;  %5900 = vpow2.f32 %v3400_v17  ;;  %v10571_v14 = vld [vmem:[#allocation41_spill] sm:$0xff] }
 0x205   : > { %10567 = vst [vmem:[#allocation93_spill] sm:$0xff] %v8168_v58  ;;  %v1798_v46 = vmul.f32 0.6931472, %v5891_v27  ;;  %v8172_v6 = vadd.f32 1.0, %v10568_v52  ;;  %vm1803_vm6 = vcmp.lt.f32.partialorder %v1802_v42, 0.0004427343  ;;  %5902 = vpow2.f32 %v2970_v61 }
 0x206   : > { %v1811_v23 = vand.u32 2147483647, %v7650_v21  ;;  %v2171_v18 = vmul.f32 -0.5, %v7689_v34  ;;  %v8180_v33 = vadd.f32 %v10571_v14, %v10393_v50  ;;  %v10573_v27 = vld [vmem:[#allocation13_spill] sm:$0xff]  ;;  %5904 = vpow2.f32 %v3398_v57 }
 0x207   : > { %10569 = vst [vmem:[#allocation20_spill] sm:$0xff] %v8172_v6  ;;  %v8176_v32 = vpop.eup %5892  ;;  %vm1702_vm7 = vcmp.gt.f32.partialorder %v10573_v27, 20.0  ;;  %v1804_v48 = vsel %vm1803_vm6, %v1801_v51, %v1798_v46  ;;  %v2976_v54 = vmul.f32 1.442695, %v2951_v49  ;;  %v3404_v11 = vmul.f32 1.442695, %v3387_v38 }
 0x208   : > { %10570 = vst [vmem:[#allocation132_spill] sm:$0xff] %v8176_v32  ;;  %10572 = vst [vmem:[#allocation41_spill] sm:$0xff] %v8180_v33  ;;  %v5895_v15 = vpop.eup %5894  ;;  %v1842_v17 = vsel %vm1702_vm7, %v10573_v27, %v1804_v48  ;;  %v2950_v42 = vmin.f32 %v8168_v58, 20.0  ;;  %v1810_v61 = vmul.f32 %v7650_v21, %v1809_v63  ;;  %5906 = vlog2.f32 %v8172_v6  ;;  %v10574_v14 = vld [vmem:[#allocation45_spill] sm:$0xff]  ;;  %v10577_v38 = vld [vmem:[#allocation11_spill] sm:$0xff] }
 0x209   : > { %1866 = vrot.lane.b32.xlu0 %v1842_v17, %s6440_s23  ;;  %v1807_v24 = vmul.f32 0.6931472, %v5895_v15  ;;  %v8190_v32 = vadd.f32 %v10574_v14, %v6954_v2  ;;  %vm1812_vm8 = vcmp.lt.f32.partialorder %v1811_v23, 0.0004427343  ;;  %v2172_v46 = vadd.f32 1.0, %v2171_v18  ;;  %v10578_v18 = vld [vmem:[#allocation95_spill] sm:$0xff] }
 0x20a   : > { %v8193_v57 = vadd.f32 1.0, %v7767_v44  ;;  %v3386_v49 = vmin.f32 %v8180_v33, 20.0  ;;  %vm1703_vm9 = vcmp.gt.f32.partialorder %v10577_v38, 20.0  ;;  %v2174_v27 = vand.u32 2147483647, %v7689_v34 }
 0x20b   : > { %10575 = vst [vmem:[#allocation13_spill] sm:$0xff] %v8190_v32  ;;  %v1813_v51 = vsel %vm1812_vm8, %v1810_v61, %v1807_v24  ;;  %v8198_v48 = vpop.eup %5896  ;;  %5908 = vpow2.f32 %v2976_v54  ;;  %v2180_v63 = vmul.f32 -0.5, %v10568_v52  ;;  %v2974_v23 = vmul.f32 1.442695, %v2950_v42 }
 0x20c   : > { %10576 = vst [vmem:[#allocation45_spill] sm:$0xff] %v8193_v57  ;;  %v1843_v21 = vsel %vm1703_vm9, %v10577_v38, %v1813_v51  ;;  %v5899_v15 = vpop.eup %5898  ;;  %v8204_v17 = vadd.f32 %v10578_v18, %v6969_v13  ;;  %5910 = vlog2.f32 %v8193_v57  ;;  %v2953_v24 = vmin.f32 %v8190_v32, 20.0  ;;  %v10581_v51 = vld [vmem:[#allocation9_spill] sm:$0xff] }
 0x20d   : > { %1868 = vrot.lane.b32.xlu1 %v1843_v21, %s6440_s23  ;;  %v2170_v61 = vmul.f32 0.6931472, %v5899_v15  ;;  %v2173_v14 = vmul.f32 %v7689_v34, %v2172_v46  ;;  %v8211_v54 = vadd.f32 1.0, %v7714_v40  ;;  %5912 = vpow2.f32 %v3404_v11 }
 0x20e   : > { %10579 = vst [vmem:[#allocation11_spill] sm:$0xff] %v8204_v17  ;;  %v3402_v38 = vmul.f32 1.442695, %v3386_v49  ;;  %vm2175_vm10 = vcmp.lt.f32.partialorder %v2174_v27, 0.0004427343  ;;  %v8213_v42 = vpop.eup %5900  ;;  %vm2138_vm11 = vcmp.gt.f32.partialorder %v10581_v51, 20.0 }
 0x20f   : > { %10580 = vst [vmem:[#allocation95_spill] sm:$0xff] %v8211_v54  ;;  %v2176_v18 = vsel %vm2175_vm10, %v2173_v14, %v2170_v61  ;;  %v2181_v6 = vadd.f32 1.0, %v2180_v63  ;;  %v1817_v21 = vmul.f32 -0.5, %v7767_v44  ;;  %v8217_v57 = vpop.eup %5902  ;;  %v3389_v15 = vmin.f32 %v8204_v17, 20.0  ;;  %v10582_v27 = vld [vmem:[#allocation96_spill] sm:$0xff]  ;;  %v10584_v14 = vld [vmem:[#allocation15_spill] sm:$0xff] }
 0x210   : > { %v2278_v34 = vsel %vm2138_vm11, %v10581_v51, %v2176_v18  ;;  %v2183_v46 = vand.u32 2147483647, %v10568_v52  ;;  %5914 = vlog2.f32 %v8211_v54  ;;  %v8223_v11 = vpop.eup %5904  ;;  %v2980_v49 = vmul.f32 1.442695, %v2953_v24 }
 0x211   : > { %5916 = vpow2.f32 %v2974_v23  ;;  %v8227_v61 = vadd.f32 %v10582_v27, %v6957_v5  ;;  %2294 = vrot.lane.b32.xlu0 %v2278_v34, %s6440_s23  ;;  %v8232_v17 = vadd.f32 %v10584_v14, %v6975_v16  ;;  %v8235_v51 = vadd.f32 1.0, %v7774_v20  ;;  %v10588_v14 = vld [vmem:[#allocation40_spill] sm:$0xff] }
 0x212   : > { %v5907_v63 = vpop.eup %5906  ;;  %5918 = vpow2.f32 %v3402_v38  ;;  %v2182_v54 = vmul.f32 %v10568_v52, %v2181_v6  ;;  %v1818_v23 = vadd.f32 1.0, %v1817_v21  ;;  %v1826_v24 = vmul.f32 -0.5, %v7714_v40  ;;  %v10589_v6 = vld [vmem:[#allocation98_spill] sm:$0xff] }
 0x213   : > { %10583 = vst [vmem:[#allocation9_spill] sm:$0xff] %v8227_v61  ;;  %10585 = vst [vmem:[#allocation96_spill] sm:$0xff] %v8232_v17  ;;  %v2179_v18 = vmul.f32 0.6931472, %v5907_v63  ;;  %v3408_v32 = vmul.f32 1.442695, %v3389_v15  ;;  %5920 = vlog2.f32 %v8235_v51  ;;  %v8248_v21 = vadd.f32 %v10589_v6, %v6982_v7 }
 0x214   : > { %10586 = vst [vmem:[#allocation15_spill] sm:$0xff] %v8235_v51  ;;  %vm2184_vm12 = vcmp.lt.f32.partialorder %v2183_v46, 0.0004427343  ;;  %v1820_v27 = vand.u32 2147483647, %v7767_v44  ;;  %5922 = vpow2.f32 %v2980_v49  ;;  %v2952_v34 = vmin.f32 %v8227_v61, 20.0 }
 0x215   : > { %v8241_v38 = vpop.eup %5908  ;;  %vm2139_vm13 = vcmp.gt.f32.partialorder %v10588_v14, 20.0  ;;  %v2185_v33 = vsel %vm2184_vm12, %v2182_v54, %v2179_v18  ;;  %v3388_v52 = vmin.f32 %v8232_v17, 20.0  ;;  %10590 = vst [vmem:[#allocation40_spill] sm:$0xff] %v8248_v21  ;;  %v10591_v15 = vld [vmem:[#allocation17_spill] sm:$0xff]  ;;  %v1819_v61 = vmul.f32 %v7767_v44, %v1818_v23  ;;  %v8258_v18 = vpop.permute.xlu0 %960 }
 0x216   : > { %10587 = vst [vmem:[#allocation133_spill] sm:$0xff] %v8241_v38  ;;  %v5911_v63 = vpop.eup %5910  ;;  %v8252_v46 = vadd.f32 %v10591_v15, %v6988_v12  ;;  %v2279_v51 = vsel %vm2139_vm13, %v10588_v14, %v2185_v33  ;;  %v1827_v58 = vadd.f32 1.0, %v1826_v24  ;;  %v2189_v54 = vmul.f32 -0.5, %v7774_v20  ;;  %10593 = vst [vmem:[#allocation17_spill] sm:$0xff] %v8258_v18  ;;  %v10595_v38 = vld [vmem:[#allocation52_spill] sm:$0xff]  ;;  %v10596_v14 = vld [vmem:[#allocation61_spill] sm:$0xff] }
 0x217   : > { %2296 = vrot.lane.b32.xlu1 %v2279_v51, %s6440_s23  ;;  %v1816_v49 = vmul.f32 0.6931472, %v5911_v63  ;;  %v8260_v17 = vpop.eup %5912  ;;  %5924 = vpow2.f32 %v3408_v32  ;;  %vm1821_vm14 = vcmp.lt.f32.partialorder %v1820_v27, 0.0004427343  ;;  %v1829_v6 = vand.u32 2147483647, %v7714_v40 }
 0x218   : > { %10592 = vst [vmem:[#allocation98_spill] sm:$0xff] %v8252_v46  ;;  %10594 = vst [vmem:[#allocation134_spill] sm:$0xff] %v8260_v17  ;;  %v2978_v15 = vmul.f32 1.442695, %v2952_v34  ;;  %vm1704_vm15 = vcmp.gt.f32.partialorder %v10595_v38, 20.0  ;;  %v8265_v51 = vadd.f32 1.0, %v10596_v14  ;;  %v1828_v27 = vmul.f32 %v7714_v40, %v1827_v58 }
 0x219   : > { %v1822_v33 = vsel %vm1821_vm14, %v1819_v61, %v1816_v49  ;;  %v3406_v44 = vmul.f32 1.442695, %v3388_v52  ;;  %v3391_v23 = vmin.f32 %v8248_v21, 20.0  ;;  %v3390_v24 = vmin.f32 %v8252_v46, 20.0  ;;  %v8275_v61 = vpop.permute.xlu1 %964  ;;  %v10599_v52 = vld [vmem:[#allocation100_spill] sm:$0xff]  ;;  %v10602_v40 = vld [vmem:[#allocation99_spill] sm:$0xff] }
 0x21a   : > { %10597 = vst [vmem:[#allocation52_spill] sm:$0xff] %v8265_v51  ;;  %v5915_v63 = vpop.eup %5914  ;;  %v1844_v18 = vsel %vm1704_vm15, %v10595_v38, %v1822_v33  ;;  %v2190_v34 = vadd.f32 1.0, %v2189_v54  ;;  %5926 = vlog2.f32 %v8265_v51  ;;  %10598 = vst [vmem:[#allocation61_spill] sm:$0xff] %v8275_v61  ;;  %v8281_v21 = vadd.f32 %v10599_v52, %v6999_v30  ;;  %v10604_v54 = vld [vmem:[#allocation97_spill] sm:$0xff] }
 0x21b   : > { %v8270_v17 = vpop.eup %5916  ;;  %1870 = vrot.lane.b32.xlu0 %v1844_v18, %s6440_s23  ;;  %v1825_v32 = vmul.f32 0.6931472, %v5915_v63  ;;  %vm1830_vm1 = vcmp.lt.f32.partialorder %v1829_v6, 0.0004427343  ;;  %v2192_v38 = vand.u32 2147483647, %v7774_v20  ;;  %5928 = vpow2.f32 %v2978_v15  ;;  %v8292_v63 = vpop.permute.xlu0 %958 }
 0x21c   : > { %v8277_v49 = vpop.eup %5918  ;;  %10600 = vst [vmem:[#allocation100_spill] sm:$0xff] %v8281_v21  ;;  %v8285_v33 = vadd.f32 1.0, %v7804_v1  ;;  %v8289_v58 = vadd.f32 %v10602_v40, %v6944_v56  ;;  %vm1705_vm2 = vcmp.gt.f32.partialorder %v10604_v54, 20.0  ;;  %10605 = vst [vmem:[#allocation97_spill] sm:$0xff] %v8292_v63  ;;  %v2198_v6 = vmul.f32 -0.5, %v10596_v14 }
 0x21d   : > { %v1831_v18 = vsel %vm1830_vm1, %v1828_v27, %v1825_v32  ;;  %v5921_v61 = vpop.eup %5920  ;;  %v3412_v15 = vmul.f32 1.442695, %v3391_v23  ;;  %v2191_v40 = vmul.f32 %v7774_v20, %v2190_v34  ;;  %v3410_v46 = vmul.f32 1.442695, %v3390_v24  ;;  %v8308_v23 = vpop.permute.xlu1 %962 }
 0x21e   : > { %10601 = vst [vmem:[#allocation135_spill] sm:$0xff] %v8285_v33  ;;  %10603 = vst [vmem:[#allocation99_spill] sm:$0xff] %v8289_v58  ;;  %v1845_v52 = vsel %vm1705_vm2, %v10604_v54, %v1831_v18  ;;  %5930 = vlog2.f32 %v8285_v33  ;;  %v8297_v51 = vpop.eup %5922  ;;  %v2188_v56 = vmul.f32 0.6931472, %v5921_v61  ;;  %v3393_v32 = vmin.f32 %v8281_v21, 20.0  ;;  %v10607_v18 = vld [vmem:[#allocation49_spill] sm:$0xff] }
 0x21f   : > { %5932 = vpow2.f32 %v3406_v44  ;;  %1872 = vrot.lane.b32.xlu1 %v1845_v52, %s6440_s23  ;;  %vm2193_vm3 = vcmp.lt.f32.partialorder %v2192_v38, 0.0004427343  ;;  %v8303_v27 = vadd.f32 1.0, %v7790_v37  ;;  %v3829_v54 = vmin.f32 %v8289_v58, 20.0  ;;  %10608 = vst [vmem:[#allocation49_spill] sm:$0xff] %v8308_v23  ;;  %v8317_v38 = vpop.permute.xlu0 %966  ;;  %v10614_v58 = vld [vmem:[#allocation48_spill] sm:$0xff] }
 0x220   : > { %vm2140_vm4 = vcmp.gt.f32.partialorder %v10607_v18, 20.0  ;;  %v2194_v63 = vsel %vm2193_vm3, %v2191_v40, %v2188_v56  ;;  %v2207_v44 = vmul.f32 -0.5, %v7804_v1  ;;  %v2199_v24 = vadd.f32 1.0, %v2198_v6  ;;  %10610 = vst [vmem:[#allocation138_spill] sm:$0xff] %v8317_v38 }
 0x221   : > { %10606 = vst [vmem:[#allocation136_spill] sm:$0xff] %v8303_v27  ;;  %v8310_v52 = vpop.eup %5924  ;;  %v2280_v20 = vsel %vm2140_vm4, %v10607_v18, %v2194_v63  ;;  %5934 = vlog2.f32 %v8303_v27  ;;  %v2201_v34 = vand.u32 2147483647, %v10596_v14  ;;  %v2210_v61 = vand.u32 2147483647, %v7804_v1 }
 0x222   : > { %10609 = vst [vmem:[#allocation137_spill] sm:$0xff] %v8310_v52  ;;  %5936 = vpow2.f32 %v3412_v15  ;;  %2298 = vrot.lane.b32.xlu0 %v2280_v20, %s6440_s23  ;;  %v2216_v56 = vmul.f32 -0.5, %v7790_v37  ;;  %v8321_v40 = vadd.f32 1.0, %v7848_v3  ;;  %v3416_v63 = vmul.f32 1.442695, %v3393_v32  ;;  %v10613_v20 = vld [vmem:[#allocation14_spill] sm:$0xff] }
 0x223   : > { %5938 = vpow2.f32 %v3410_v46  ;;  %v8323_v6 = vmul.f32 1.442695, %v3829_v54  ;;  %v2208_v18 = vadd.f32 1.0, %v2207_v44  ;;  %v8326_v15 = vadd.f32 1.0, %v7815_v53  ;;  %v8342_v54 = vpop.permute.xlu1 %968 }
 0x224   : > { %10611 = vst [vmem:[#allocation139_spill] sm:$0xff] %v8321_v40  ;;  %v5927_v23 = vpop.eup %5926  ;;  %v8330_v27 = vadd.f32 %v10613_v20, %v7006_v36  ;;  %v2200_v46 = vmul.f32 %v10596_v14, %v2199_v24  ;;  %5940 = vlog2.f32 %v8321_v40  ;;  %vm2141_vm5 = vcmp.gt.f32.partialorder %v10614_v58, 20.0  ;;  %10617 = vst [vmem:[#allocation14_spill] sm:$0xff] %v8342_v54 }
 0x225   : > { %10612 = vst [vmem:[#allocation140_spill] sm:$0xff] %v8326_v15  ;;  %v2197_v33 = vmul.f32 0.6931472, %v5927_v23  ;;  %v8334_v38 = vpop.eup %5928  ;;  %vm2202_vm6 = vcmp.lt.f32.partialorder %v2201_v34, 0.0004427343  ;;  %5942 = vlog2.f32 %v8326_v15  ;;  %v2217_v23 = vadd.f32 1.0, %v2216_v56  ;;  %v8353_v15 = vpop.permute.xlu0 %970 }
 0x226   : > { %vm8337_vm7 = vcmp.lt.f32.partialorder %v2210_v61, 0.0004427343  ;;  %v2225_v14 = vmul.f32 -0.5, %v7848_v3  ;;  %v8346_v24 = vadd.f32 1.0, %v7859_v19  ;;  %v2209_v21 = vmul.f32 %v7804_v1, %v2208_v18  ;;  %10620 = vst [vmem:[#allocation142_spill] sm:$0xff] %v8353_v15  ;;  %v10623_v1 = vld [vmem:[#allocation110_spill] sm:$0xff] }
 0x227   : > { %v2203_v20 = vsel %vm2202_vm6, %v2200_v46, %v2197_v33  ;;  %v2234_v52 = vmul.f32 -0.5, %v7815_v53  ;;  %v2219_v33 = vand.u32 2147483647, %v7790_v37  ;;  %v2228_v56 = vand.u32 2147483647, %v7848_v3 }
 0x228   : > { %v5931_v44 = vpop.eup %5930  ;;  %10618 = vst [vmem:[#allocation48_spill] sm:$0xff] %v8346_v24  ;;  %v2281_v34 = vsel %vm2141_vm5, %v10614_v58, %v2203_v20  ;;  %5944 = vlog2.f32 %v8346_v24  ;;  %v8360_v46 = vadd.f32 1.0, %v7833_v8  ;;  %v10622_v58 = vld [vmem:[#allocation101_spill] sm:$0xff]  ;;  %vm2142_vm8 = vcmp.gt.f32.partialorder %v10623_v1, 20.0 }
 0x229   : > { %v8348_v40 = vpop.eup %5932  ;;  %v2206_v61 = vmul.f32 0.6931472, %v5931_v44  ;;  %2300 = vrot.lane.b32.xlu1 %v2281_v34, %s6440_s23  ;;  %5946 = vpow2.f32 %v3416_v63  ;;  %v8364_v44 = vadd.f32 %v10622_v58, %v6950_v0  ;;  %v2218_v15 = vmul.f32 %v7790_v37, %v2217_v23  ;;  %v10629_v37 = vld [vmem:[#allocation58_spill] sm:$0xff] }
 0x22a   : > { %10619 = vst [vmem:[#allocation141_spill] sm:$0xff] %v8348_v40  ;;  %10621 = vst [vmem:[#allocation143_spill] sm:$0xff] %v8360_v46  ;;  %v2226_v54 = vadd.f32 1.0, %v2225_v14  ;;  %5948 = vlog2.f32 %v8360_v46  ;;  %v2235_v0 = vadd.f32 1.0, %v2234_v52  ;;  %v2597_v58 = vmul.f32 -0.5, %v7859_v19  ;;  %v10633_v46 = vld [vmem:[#allocation113_spill] sm:$0xff] }
 0x22b   : > { %v2212_v18 = vsel %vm8337_vm7, %v2209_v21, %v2206_v61  ;;  %v5935_v20 = vpop.eup %5934  ;;  %v8377_v40 = vadd.f32 1.0, %v7891_v28  ;;  %v8379_v21 = vpop.permute.xlu1 %972  ;;  %v10628_v61 = vld [vmem:[#allocation109_spill] sm:$0xff]  ;;  %vm2220_vm10 = vcmp.lt.f32.partialorder %v2219_v33, 0.0004427343  ;;  %vm2144_vm11 = vcmp.gt.f32.partialorder %v10629_v37, 20.0 }
 0x22c   : > { %v2282_v34 = vsel %vm2142_vm8, %v10623_v1, %v2212_v18  ;;  %v8372_v24 = vpop.eup %5936  ;;  %v2215_v63 = vmul.f32 0.6931472, %v5935_v20  ;;  %10626 = vst [vmem:[#allocation144_spill] sm:$0xff] %v8379_v21  ;;  %vm2143_vm9 = vcmp.gt.f32.partialorder %v10628_v61, 20.0  ;;  %vm8385_vm12 = vcmp.lt.f32.partialorder %v2228_v56, 0.0004427343  ;;  %v8392_v18 = vpop.permute.xlu0 %974 }
 0x22d   : > { %10624 = vst [vmem:[#allocation101_spill] sm:$0xff] %v8372_v24  ;;  %2302 = vrot.lane.b32.xlu0 %v2282_v34, %s6440_s23  ;;  %10625 = vst [vmem:[#allocation110_spill] sm:$0xff] %v8377_v40  ;;  %v8381_v32 = vpop.eup %5938  ;;  %v2237_v52 = vand.u32 2147483647, %v7815_v53  ;;  %v2606_v1 = vmul.f32 -0.5, %v7833_v8  ;;  %5950 = vlog2.f32 %v8377_v40  ;;  %v2227_v33 = vmul.f32 %v7848_v3, %v2226_v54 }
 0x22e   : > { %10627 = vst [vmem:[#allocation145_spill] sm:$0xff] %v8381_v32  ;;  %v2221_v14 = vsel %vm2220_vm10, %v2218_v15, %v2215_v63  ;;  %10632 = vst [vmem:[#allocation109_spill] sm:$0xff] %v8392_v18  ;;  %v5941_v20 = vpop.eup %5940  ;;  %vm2145_vm13 = vcmp.gt.f32.partialorder %v10633_v46, 20.0  ;;  %v8398_v56 = vadd.f32 1.0, %v7867_v60  ;;  %v2236_v63 = vmul.f32 %v7815_v53, %v2235_v0 }
 0x22f   : > { %v2283_v34 = vsel %vm2143_vm9, %v10628_v61, %v2221_v14  ;;  %v5943_v21 = vpop.eup %5942  ;;  %v2224_v15 = vmul.f32 0.6931472, %v5941_v20  ;;  %v2598_v24 = vadd.f32 1.0, %v2597_v58  ;;  %v2600_v40 = vand.u32 2147483647, %v7859_v19  ;;  %v10636_v61 = vld [vmem:[#allocation18_spill] sm:$0xff]  ;;  %v8411_v20 = vpop.permute.xlu1 %976 }
 0x230   : > { %10634 = vst [vmem:[#allocation58_spill] sm:$0xff] %v8398_v56  ;;  %2304 = vrot.lane.b32.xlu1 %v2283_v34, %s6440_s23  ;;  %v2233_v18 = vmul.f32 0.6931472, %v5943_v21  ;;  %v2243_v32 = vmul.f32 -0.5, %v7891_v28  ;;  %5952 = vlog2.f32 %v8398_v56  ;;  %v8406_v3 = vadd.f32 1.0, %v7916_v31  ;;  %10637 = vst [vmem:[#allocation18_spill] sm:$0xff] %v8411_v20 }
 0x231   : > { %v2230_v54 = vsel %vm8385_vm12, %v2227_v33, %v2224_v15  ;;  %vm2238_vm14 = vcmp.lt.f32.partialorder %v2237_v52, 0.0004427343  ;;  %vm2580_vm15 = vcmp.gt.f32.partialorder %v10636_v61, 20.0  ;;  %v2607_v14 = vadd.f32 1.0, %v2606_v1  ;;  %v8426_v15 = vpop.permute.xlu0 %1402 }
 0x232   : > { %10635 = vst [vmem:[#allocation113_spill] sm:$0xff] %v8406_v3  ;;  %v5945_v53 = vpop.eup %5944  ;;  %v2284_v0 = vsel %vm2144_vm11, %v10629_v37, %v2230_v54  ;;  %v2239_v58 = vsel %vm2238_vm14, %v2236_v63, %v2233_v18  ;;  %v2609_v21 = vand.u32 2147483647, %v7833_v8  ;;  %5954 = vlog2.f32 %v8406_v3  ;;  %10638 = vst [vmem:[#allocation146_spill] sm:$0xff] %v8426_v15  ;;  %v10664_v15 = vld [vmem:[#allocation104_spill] sm:$0xff] }
 0x233   : > { %v8418_v34 = vpop.eup %5946  ;;  %2306 = vrot.lane.b32.xlu0 %v2284_v0, %s6440_s23  ;;  %v2285_v23 = vsel %vm2145_vm13, %v10633_v46, %v2239_v58  ;;  %v2596_v52 = vmul.f32 0.6931472, %v5945_v53  ;;  %v2599_v1 = vmul.f32 %v7859_v19, %v2598_v24  ;;  %v2252_v33 = vmul.f32 -0.5, %v7867_v60  ;;  %v10640_v53 = vld [vmem:[#allocation117_spill] sm:$0xff] }
 0x234   : > { %v5949_v37 = vpop.eup %5948  ;;  %2308 = vrot.lane.b32.xlu1 %v2285_v23, %s6440_s23  ;;  %vm2601_vm1 = vcmp.lt.f32.partialorder %v2600_v40, 0.0004427343  ;;  %v2244_v18 = vadd.f32 1.0, %v2243_v32  ;;  %v2246_v63 = vand.u32 2147483647, %v7891_v28  ;;  %v8431_v54 = vadd.f32 1.0, %v7871_v62 }
 0x235   : > { %v2602_v0 = vsel %vm2601_vm1, %v2599_v1, %v2596_v52  ;;  %v2605_v3 = vmul.f32 0.6931472, %v5949_v37  ;;  %v2608_v46 = vmul.f32 %v7833_v8, %v2607_v14  ;;  %v2615_v19 = vmul.f32 -0.5, %v7916_v31  ;;  %v8445_v14 = vpop.permute.xlu1 %1404 }
 0x236   : > { %10639 = vst [vmem:[#allocation147_spill] sm:$0xff] %v8431_v54  ;;  %v2720_v24 = vsel %vm2580_vm15, %v10636_v61, %v2602_v0  ;;  %vm2581_vm2 = vcmp.gt.f32.partialorder %v10640_v53, 20.0  ;;  %vm2610_vm3 = vcmp.lt.f32.partialorder %v2609_v21, 0.0004427343  ;;  %5956 = vlog2.f32 %v8431_v54  ;;  %10642 = vst [vmem:[#allocation148_spill] sm:$0xff] %v8445_v14 }
 0x237   : > { %v5951_v40 = vpop.eup %5950  ;;  %2734 = vrot.lane.b32.xlu0 %v2720_v24, %s6440_s23  ;;  %v2611_v32 = vsel %vm2610_vm3, %v2608_v46, %v2605_v3  ;;  %v2253_v58 = vadd.f32 1.0, %v2252_v33  ;;  %v2255_v23 = vand.u32 2147483647, %v7867_v60  ;;  %v8443_v8 = vadd.f32 1.0, %v7946_v47  ;;  %v8455_v33 = vpop.permute.xlu0 %978  ;;  %v10645_v24 = vld [vmem:[#allocation23_spill] sm:$0xff] }
 0x238   : > { %v2721_v52 = vsel %vm2581_vm2, %v10640_v53, %v2611_v32  ;;  %v2242_v61 = vmul.f32 0.6931472, %v5951_v40  ;;  %v2245_v1 = vmul.f32 %v7891_v28, %v2244_v18  ;;  %v2624_v21 = vmul.f32 -0.5, %v7871_v62  ;;  %10644 = vst [vmem:[#allocation150_spill] sm:$0xff] %v8455_v33  ;;  %v10646_v40 = vld [vmem:[#allocation119_spill] sm:$0xff] }
 0x239   : > { %10641 = vst [vmem:[#allocation117_spill] sm:$0xff] %v8443_v8  ;;  %2736 = vrot.lane.b32.xlu1 %v2721_v52, %s6440_s23  ;;  %vm2247_vm4 = vcmp.lt.f32.partialorder %v2246_v63, 0.0004427343  ;;  %v2616_v37 = vadd.f32 1.0, %v2615_v19  ;;  %5958 = vlog2.f32 %v8443_v8  ;;  %v8453_v3 = vadd.f32 1.0, %v7919_v39 }
 0x23a   : > { %v5953_v0 = vpop.eup %5952  ;;  %v3392_v46 = vmin.f32 %v8330_v27, 20.0  ;;  %vm2146_vm5 = vcmp.gt.f32.partialorder %v10645_v24, 20.0  ;;  %v2248_v53 = vsel %vm2247_vm4, %v2245_v1, %v2242_v61  ;;  %v2618_v28 = vand.u32 2147483647, %v7916_v31 }
 0x23b   : > { %10643 = vst [vmem:[#allocation149_spill] sm:$0xff] %v8453_v3  ;;  %v2286_v18 = vsel %vm2146_vm5, %v10645_v24, %v2248_v53  ;;  %vm2147_vm6 = vcmp.gt.f32.partialorder %v10646_v40, 20.0  ;;  %v2251_v63 = vmul.f32 0.6931472, %v5953_v0  ;;  %v2254_v19 = vmul.f32 %v7867_v60, %v2253_v58  ;;  %v8470_v53 = vpop.permute.xlu1 %980 }
 0x23c   : > { %v5955_v32 = vpop.eup %5954  ;;  %2310 = vrot.lane.b32.xlu0 %v2286_v18, %s6440_s23  ;;  %vm2256_vm7 = vcmp.lt.f32.partialorder %v2255_v23, 0.0004427343  ;;  %v2625_v52 = vadd.f32 1.0, %v2624_v21  ;;  %v2261_v54 = vmul.f32 -0.5, %v7946_v47  ;;  %5960 = vlog2.f32 %v8453_v3  ;;  %v10648_v21 = vld [vmem:[#allocation122_spill] sm:$0xff] }
 0x23d   : > { %v2257_v14 = vsel %vm2256_vm7, %v2254_v19, %v2251_v63  ;;  %v2614_v61 = vmul.f32 0.6931472, %v5955_v32  ;;  %v2617_v1 = vmul.f32 %v7916_v31, %v2616_v37  ;;  %v8468_v24 = vadd.f32 1.0, %v7971_v22  ;;  %v8479_v31 = vpop.permute.xlu0 %1406 }
 0x23e   : > { %v3828_v60 = vmin.f32 %v8364_v44, 20.0  ;;  %v2287_v58 = vsel %vm2147_vm6, %v10646_v40, %v2257_v14  ;;  %vm2619_vm8 = vcmp.lt.f32.partialorder %v2618_v28, 0.0004427343  ;;  %v2627_v23 = vand.u32 2147483647, %v7871_v62  ;;  %10649 = vst [vmem:[#allocation119_spill] sm:$0xff] %v8479_v31 }
 0x23f   : > { %10647 = vst [vmem:[#allocation23_spill] sm:$0xff] %v8468_v24  ;;  %2312 = vrot.lane.b32.xlu1 %v2287_v58, %s6440_s23  ;;  %vm2582_vm9 = vcmp.gt.f32.partialorder %v10648_v21, 20.0  ;;  %v2620_v0 = vsel %vm2619_vm8, %v2617_v1, %v2614_v61  ;;  %v2270_v18 = vmul.f32 -0.5, %v7919_v39  ;;  %5962 = vlog2.f32 %v8468_v24  ;;  %v10651_v31 = vld [vmem:[#allocation24_spill] sm:$0xff] }
 0x240   : > { %v5957_v37 = vpop.eup %5956  ;;  %v3414_v63 = vmul.f32 1.442695, %v3392_v46  ;;  %v2722_v19 = vsel %vm2582_vm9, %v10648_v21, %v2620_v0  ;;  %v2626_v14 = vmul.f32 %v7871_v62, %v2625_v52  ;;  %v2262_v28 = vadd.f32 1.0, %v2261_v54  ;;  %v8495_v52 = vpop.permute.xlu1 %1408 }
 0x241   : > { %2738 = vrot.lane.b32.xlu0 %v2722_v19, %s6440_s23  ;;  %v2623_v40 = vmul.f32 0.6931472, %v5957_v37  ;;  %v2264_v32 = vand.u32 2147483647, %v7946_v47  ;;  %v2633_v61 = vmul.f32 -0.5, %v7971_v22  ;;  %v8487_v1 = vadd.f32 1.0, %v7925_v4 }
 0x242   : > { %5964 = vpow2.f32 %v8323_v6  ;;  %v3842_v58 = vmul.f32 1.442695, %v3828_v60  ;;  %vm2583_vm10 = vcmp.gt.f32.partialorder %v10651_v31, 20.0  ;;  %vm2628_vm11 = vcmp.lt.f32.partialorder %v2627_v23, 0.0004427343  ;;  %10653 = vst [vmem:[#allocation151_spill] sm:$0xff] %v8495_v52 }
 0x243   : > { %10650 = vst [vmem:[#allocation122_spill] sm:$0xff] %v8487_v1  ;;  %v5959_v46 = vpop.eup %5958  ;;  %v2629_v21 = vsel %vm2628_vm11, %v2626_v14, %v2623_v40  ;;  %v2271_v62 = vadd.f32 1.0, %v2270_v18  ;;  %5966 = vlog2.f32 %v8487_v1  ;;  %v8493_v54 = vadd.f32 1.0, %v7990_v9  ;;  %v10654_v60 = vld [vmem:[#allocation103_spill] sm:$0xff]  ;;  %v8506_v14 = vpop.permute.xlu0 %982 }
 0x244   : > { %v2723_v0 = vsel %vm2583_vm10, %v10651_v31, %v2629_v21  ;;  %v2260_v37 = vmul.f32 0.6931472, %v5959_v46  ;;  %v2263_v19 = vmul.f32 %v7946_v47, %v2262_v28  ;;  %v2273_v6 = vand.u32 2147483647, %v7919_v39  ;;  %10655 = vst [vmem:[#allocation103_spill] sm:$0xff] %v8506_v14  ;;  %v10656_v31 = vld [vmem:[#allocation25_spill] sm:$0xff] }
 0x245   : > { %10652 = vst [vmem:[#allocation24_spill] sm:$0xff] %v8493_v54  ;;  %v8502_v23 = vadd.f32 %v10654_v60, %v10372_v10  ;;  %2740 = vrot.lane.b32.xlu1 %v2723_v0, %s6440_s23  ;;  %vm2265_vm12 = vcmp.lt.f32.partialorder %v2264_v32, 0.0004427343  ;;  %v2634_v18 = vadd.f32 1.0, %v2633_v61  ;;  %5968 = vlog2.f32 %v8493_v54  ;;  %v10657_v61 = vld [vmem:[#allocation82_spill] sm:$0xff] }
 0x246   : > { %v5961_v40 = vpop.eup %5960  ;;  %5970 = vpow2.f32 %v3414_v63  ;;  %vm2148_vm13 = vcmp.gt.f32.partialorder %v10656_v31, 20.0  ;;  %v2266_v46 = vsel %vm2265_vm12, %v2263_v19, %v2260_v37  ;;  %v2642_v47 = vmul.f32 -0.5, %v7925_v4  ;;  %v10659_v37 = vld [vmem:[#allocation28_spill] sm:$0xff] }
 0x247   : > { %v2288_v28 = vsel %vm2148_vm13, %v10656_v31, %v2266_v46  ;;  %v2269_v21 = vmul.f32 0.6931472, %v5961_v40  ;;  %v2272_v60 = vmul.f32 %v7919_v39, %v2271_v62  ;;  %v2636_v0 = vand.u32 2147483647, %v7971_v22  ;;  %v8523_v39 = vpop.permute.xlu1 %984  ;;  %v10661_v46 = vld [vmem:[#allocation102_spill] sm:$0xff] }
 0x248   : > { %5972 = vpow2.f32 %v3842_v58  ;;  %2314 = vrot.lane.b32.xlu0 %v2288_v28, %s6440_s23  ;;  %vm2274_vm14 = vcmp.lt.f32.partialorder %v2273_v6, 0.0004427343  ;;  %v2651_v32 = vmul.f32 -0.5, %v7990_v9  ;;  %v8516_v63 = vadd.f32 1.0, %v10657_v61 }
 0x249   : > { %v5963_v52 = vpop.eup %5962  ;;  %vm2149_vm15 = vcmp.gt.f32.partialorder %v10659_v37, 20.0  ;;  %v2275_v19 = vsel %vm2274_vm14, %v2272_v60, %v2269_v21  ;;  %v2635_v31 = vmul.f32 %v7971_v22, %v2634_v18  ;;  %v8521_v40 = vadd.f32 1.0, %v8029_v26  ;;  %v8534_v18 = vpop.permute.xlu0 %1410 }
 0x24a   : > { %10658 = vst [vmem:[#allocation25_spill] sm:$0xff] %v8516_v63  ;;  %v2289_v58 = vsel %vm2149_vm15, %v10659_v37, %v2275_v19  ;;  %v2632_v62 = vmul.f32 0.6931472, %v5963_v52  ;;  %v2643_v6 = vadd.f32 1.0, %v2642_v47  ;;  %5974 = vlog2.f32 %v8516_v63  ;;  %v10662_v47 = vld [vmem:[#allocation125_spill] sm:$0xff] }
 0x24b   : > { %10660 = vst [vmem:[#allocation82_spill] sm:$0xff] %v8521_v40  ;;  %v8529_v28 = vadd.f32 %v10661_v46, %v10375_v59  ;;  %2316 = vrot.lane.b32.xlu1 %v2289_v58, %s6440_s23  ;;  %vm2637_vm1 = vcmp.lt.f32.partialorder %v2636_v0, 0.0004427343  ;;  %v2645_v22 = vand.u32 2147483647, %v7925_v4  ;;  %5976 = vlog2.f32 %v8521_v40  ;;  %v8556_v14 = vpop.permute.xlu1 %1412 }
 0x24c   : > { %v8536_v21 = vpop.eup %5964  ;;  %v3395_v52 = vmin.f32 %v8502_v23, 20.0  ;;  %vm2584_vm2 = vcmp.gt.f32.partialorder %v10662_v47, 20.0  ;;  %v2638_v60 = vsel %vm2637_vm1, %v2635_v31, %v2632_v62  ;;  %v2652_v37 = vadd.f32 1.0, %v2651_v32 }
 0x24d   : > { %v5967_v19 = vpop.eup %5966  ;;  %v2724_v59 = vsel %vm2584_vm2, %v10662_v47, %v2638_v60  ;;  %v2654_v58 = vand.u32 2147483647, %v7990_v9  ;;  %v2660_v0 = vmul.f32 -0.5, %v10657_v61  ;;  %v8544_v46 = vadd.f32 1.0, %v8014_v25  ;;  %v10665_v47 = vld [vmem:[#allocation123_spill] sm:$0xff]  ;;  %v10666_v60 = vld [vmem:[#allocation128_spill] sm:$0xff]  ;;  %v8566_v56 = vpop.permute.xlu0 %1414 }
 0x24e   : > { %v8548_v33 = vadd.f32 %v10664_v15, %v10382_v43  ;;  %2742 = vrot.lane.b32.xlu0 %v2724_v59, %s6440_s23  ;;  %v2641_v20 = vmul.f32 0.6931472, %v5967_v19  ;;  %v2644_v31 = vmul.f32 %v7925_v4, %v2643_v6  ;;  %v2669_v32 = vmul.f32 -0.5, %v8029_v26  ;;  %10668 = vst [vmem:[#allocation125_spill] sm:$0xff] %v8566_v56 }
 0x24f   : > { %10663 = vst [vmem:[#allocation28_spill] sm:$0xff] %v8544_v46  ;;  %v5969_v62 = vpop.eup %5968  ;;  %vm2585_vm3 = vcmp.gt.f32.partialorder %v10665_v47, 20.0  ;;  %vm2646_vm4 = vcmp.lt.f32.partialorder %v2645_v22, 0.0004427343  ;;  %vm2586_vm5 = vcmp.gt.f32.partialorder %v10666_v60, 20.0  ;;  %5978 = vlog2.f32 %v8544_v46  ;;  %v8590_v54 = vpop.permute.xlu1 %1416 }
 0x250   : > { %v8558_v63 = vpop.eup %5970  ;;  %v2647_v15 = vsel %vm2646_vm4, %v2644_v31, %v2641_v20  ;;  %v2650_v8 = vmul.f32 0.6931472, %v5969_v62  ;;  %v2653_v19 = vmul.f32 %v7990_v9, %v2652_v37  ;;  %v8562_v4 = vadd.f32 1.0, %v8052_v45  ;;  %10673 = vst [vmem:[#allocation123_spill] sm:$0xff] %v8590_v54  ;;  %v10696_v54 = vld [vmem:[#allocation71_spill] sm:$0xff] }
 0x251   : > { %v2725_v6 = vsel %vm2585_vm3, %v10665_v47, %v2647_v15  ;;  %vm2655_vm6 = vcmp.lt.f32.partialorder %v2654_v58, 0.0004427343  ;;  %v2661_v59 = vadd.f32 1.0, %v2660_v0  ;;  %v2663_v22 = vand.u32 2147483647, %v10657_v61  ;;  %v10669_v15 = vld [vmem:[#allocation105_spill] sm:$0xff]  ;;  %v8598_v56 = vpop.permute.xlu0 %1418 }
 0x252   : > { %10667 = vst [vmem:[#allocation102_spill] sm:$0xff] %v8562_v4  ;;  %v8568_v46 = vpop.eup %5972  ;;  %2744 = vrot.lane.b32.xlu1 %v2725_v6, %s6440_s23  ;;  %v2656_v40 = vsel %vm2655_vm6, %v2653_v19, %v2650_v8  ;;  %v2670_v20 = vadd.f32 1.0, %v2669_v32  ;;  %v2678_v31 = vmul.f32 -0.5, %v8014_v25  ;;  %5980 = vlog2.f32 %v8562_v4  ;;  %v10672_v4 = vld [vmem:[#allocation127_spill] sm:$0xff]  ;;  %10675 = vst [vmem:[#allocation105_spill] sm:$0xff] %v8598_v56 }
 0x253   : > { %v3420_v9 = vmul.f32 1.442695, %v3395_v52  ;;  %v3831_v37 = vmin.f32 %v8529_v28, 20.0  ;;  %v2726_v58 = vsel %vm2586_vm5, %v10666_v60, %v2656_v40  ;;  %v2672_v0 = vand.u32 2147483647, %v8029_v26  ;;  %v10670_v52 = vld [vmem:[#allocation63_spill] sm:$0xff] }
 0x254   : > { %v5975_v62 = vpop.eup %5974  ;;  %v3394_v47 = vmin.f32 %v8548_v33, 20.0  ;;  %v8581_v8 = vadd.f32 %v10669_v15, %v10393_v50  ;;  %2746 = vrot.lane.b32.xlu0 %v2726_v58, %s6440_s23  ;;  %v3041_v32 = vmul.f32 -0.5, %v8052_v45  ;;  %v8586_v19 = vadd.f32 1.0, %v10670_v52 }
 0x255   : > { %v5977_v6 = vpop.eup %5976  ;;  %vm2587_vm7 = vcmp.gt.f32.partialorder %v10672_v4, 20.0  ;;  %v2659_v40 = vmul.f32 0.6931472, %v5975_v62  ;;  %v2662_v60 = vmul.f32 %v10657_v61, %v2661_v59  ;;  %vm2664_vm8 = vcmp.lt.f32.partialorder %v2663_v22, 0.0004427343  ;;  %v10676_v59 = vld [vmem:[#allocation70_spill] sm:$0xff] }
 0x256   : > { %10671 = vst [vmem:[#allocation104_spill] sm:$0xff] %v8586_v19  ;;  %v2668_v1 = vmul.f32 0.6931472, %v5977_v6  ;;  %v2671_v50 = vmul.f32 %v8029_v26, %v2670_v20  ;;  %v2679_v15 = vadd.f32 1.0, %v2678_v31  ;;  %5982 = vlog2.f32 %v8586_v19 }
 0x257   : > { %v2665_v58 = vsel %vm2664_vm8, %v2662_v60, %v2659_v40  ;;  %vm2673_vm9 = vcmp.lt.f32.partialorder %v2672_v0, 0.0004427343  ;;  %v2681_v24 = vand.u32 2147483647, %v8014_v25  ;;  %v8596_v3 = vadd.f32 1.0, %v8094_v29  ;;  %v8613_v60 = vpop.permute.xlu1 %1420 }
 0x258   : > { %v2727_v61 = vsel %vm2587_vm7, %v10672_v4, %v2665_v58  ;;  %vm2588_vm10 = vcmp.gt.f32.partialorder %v10676_v59, 20.0  ;;  %v2674_v22 = vsel %vm2673_vm9, %v2671_v50, %v2668_v1  ;;  %v3042_v62 = vadd.f32 1.0, %v3041_v32  ;;  %10678 = vst [vmem:[#allocation127_spill] sm:$0xff] %v8613_v60  ;;  %v10679_v58 = vld [vmem:[#allocation129_spill] sm:$0xff] }
 0x259   : > { %10674 = vst [vmem:[#allocation128_spill] sm:$0xff] %v8596_v3  ;;  %v5979_v6 = vpop.eup %5978  ;;  %v3848_v26 = vmul.f32 1.442695, %v3831_v37  ;;  %2748 = vrot.lane.b32.xlu1 %v2727_v61, %s6440_s23  ;;  %v2728_v20 = vsel %vm2588_vm10, %v10676_v59, %v2674_v22  ;;  %v3050_v31 = vmul.f32 -0.5, %v10670_v52  ;;  %5984 = vlog2.f32 %v8596_v3 }
 0x25a   : > { %5986 = vpow2.f32 %v3420_v9  ;;  %2750 = vrot.lane.b32.xlu0 %v2728_v20, %s6440_s23  ;;  %v2677_v0 = vmul.f32 0.6931472, %v5979_v6  ;;  %v2680_v4 = vmul.f32 %v8014_v25, %v2679_v15  ;;  %v3044_v40 = vand.u32 2147483647, %v8052_v45 }
 0x25b   : > { %v3418_v1 = vmul.f32 1.442695, %v3394_v47  ;;  %v3830_v32 = vmin.f32 %v8581_v8, 20.0  ;;  %vm2682_vm11 = vcmp.lt.f32.partialorder %v2681_v24, 0.0004427343  ;;  %v8611_v37 = vadd.f32 1.0, %v8066_v35  ;;  %v8620_v24 = vpop.permute.xlu0 %1846 }
 0x25c   : > { %v5981_v50 = vpop.eup %5980  ;;  %vm2589_vm12 = vcmp.gt.f32.partialorder %v10679_v58, 20.0  ;;  %v2683_v9 = vsel %vm2682_vm11, %v2680_v4, %v2677_v0  ;;  %v3043_v61 = vmul.f32 %v8052_v45, %v3042_v62  ;;  %v2687_v59 = vmul.f32 -0.5, %v8094_v29  ;;  %10680 = vst [vmem:[#allocation70_spill] sm:$0xff] %v8620_v24  ;;  %v10682_v62 = vld [vmem:[#allocation79_spill] sm:$0xff] }
 0x25d   : > { %10677 = vst [vmem:[#allocation63_spill] sm:$0xff] %v8611_v37  ;;  %v2729_v25 = vsel %vm2589_vm12, %v10679_v58, %v2683_v9  ;;  %v3040_v15 = vmul.f32 0.6931472, %v5981_v50  ;;  %v3051_v47 = vadd.f32 1.0, %v3050_v31  ;;  %5988 = vlog2.f32 %v8611_v37  ;;  %v10683_v4 = vld [vmem:[#allocation107_spill] sm:$0xff]  ;;  %v10698_v37 = vld [vmem:[#allocation76_spill] sm:$0xff] }
 0x25e   : > { %5990 = vpow2.f32 %v3848_v26  ;;  %2752 = vrot.lane.b32.xlu1 %v2729_v25, %s6440_s23  ;;  %vm3045_vm13 = vcmp.lt.f32.partialorder %v3044_v40, 0.0004427343  ;;  %v3053_v22 = vand.u32 2147483647, %v10670_v52  ;;  %v8625_v6 = vadd.f32 1.0, %v8098_v41 }
 0x25f   : > { %v3846_v45 = vmul.f32 1.442695, %v3830_v32  ;;  %vm3024_vm14 = vcmp.gt.f32.partialorder %v10682_v62, 20.0  ;;  %v3046_v20 = vsel %vm3045_vm13, %v3043_v61, %v3040_v15  ;;  %v2696_v0 = vmul.f32 -0.5, %v8066_v35  ;;  %v10684_v61 = vld [vmem:[#allocation84_spill] sm:$0xff]  ;;  %v8641_v15 = vpop.permute.xlu1 %1848 }
 0x260   : > { %10681 = vst [vmem:[#allocation129_spill] sm:$0xff] %v8625_v6  ;;  %v5983_v31 = vpop.eup %5982  ;;  %v8631_v50 = vadd.f32 %v10683_v4, %v6954_v2  ;;  %v3164_v26 = vsel %vm3024_vm14, %v10682_v62, %v3046_v20  ;;  %v2688_v58 = vadd.f32 1.0, %v2687_v59  ;;  %5992 = vlog2.f32 %v8625_v6  ;;  %10686 = vst [vmem:[#allocation107_spill] sm:$0xff] %v8641_v15  ;;  %v10687_v4 = vld [vmem:[#allocation106_spill] sm:$0xff] }
 0x261   : > { %3178 = vrot.lane.b32.xlu0 %v3164_v26, %s6440_s23  ;;  %v3049_v40 = vmul.f32 0.6931472, %v5983_v31  ;;  %v3052_v32 = vmul.f32 %v10670_v52, %v3051_v47  ;;  %v2690_v9 = vand.u32 2147483647, %v8094_v29  ;;  %v8639_v25 = vadd.f32 1.0, %v10684_v61  ;;  %v10688_v20 = vld [vmem:[#allocation130_spill] sm:$0xff]  ;;  %v8650_v47 = vpop.permute.xlu0 %1422 }
 0x262   : > { %5994 = vpow2.f32 %v3418_v1  ;;  %v8645_v19 = vadd.f32 %v10687_v4, %v6969_v13  ;;  %vm3054_vm15 = vcmp.lt.f32.partialorder %v3053_v22, 0.0004427343  ;;  %v3059_v59 = vmul.f32 -0.5, %v8098_v41  ;;  %10689 = vst [vmem:[#allocation84_spill] sm:$0xff] %v8650_v47  ;;  %v10694_v47 = vld [vmem:[#allocation80_spill] sm:$0xff] }
 0x263   : > { %10685 = vst [vmem:[#allocation79_spill] sm:$0xff] %v8639_v25  ;;  %v5985_v62 = vpop.eup %5984  ;;  %vm3025_vm1 = vcmp.gt.f32.partialorder %v10688_v20, 20.0  ;;  %v3055_v31 = vsel %vm3054_vm15, %v3052_v32, %v3049_v40  ;;  %v2697_v52 = vadd.f32 1.0, %v2696_v0  ;;  %5996 = vlog2.f32 %v8639_v25  ;;  %v10691_v40 = vld [vmem:[#allocation62_spill] sm:$0xff] }
 0x264   : > { %v8652_v26 = vpop.eup %5986  ;;  %v3165_v1 = vsel %vm3025_vm1, %v10688_v20, %v3055_v31  ;;  %v2686_v6 = vmul.f32 0.6931472, %v5985_v62  ;;  %v2689_v13 = vmul.f32 %v8094_v29, %v2688_v58  ;;  %v8657_v22 = vadd.f32 1.0, %v8152_v55  ;;  %v10692_v58 = vld [vmem:[#allocation111_spill] sm:$0xff] }
 0x265   : > { %v3397_v4 = vmin.f32 %v8631_v50, 20.0  ;;  %3180 = vrot.lane.b32.xlu1 %v3165_v1, %s6440_s23  ;;  %vm2590_vm2 = vcmp.gt.f32.partialorder %v10691_v40, 20.0  ;;  %vm2691_vm3 = vcmp.lt.f32.partialorder %v2690_v9, 0.0004427343  ;;  %v2699_v0 = vand.u32 2147483647, %v8066_v35  ;;  %v8672_v9 = vpop.permute.xlu1 %1424 }
 0x266   : > { %10690 = vst [vmem:[#allocation106_spill] sm:$0xff] %v8657_v22  ;;  %v2692_v32 = vsel %vm2691_vm3, %v2689_v13, %v2686_v6  ;;  %v3060_v25 = vadd.f32 1.0, %v3059_v59  ;;  %v3068_v15 = vmul.f32 -0.5, %v10684_v61  ;;  %5998 = vlog2.f32 %v8657_v22  ;;  %10693 = vst [vmem:[#allocation130_spill] sm:$0xff] %v8672_v9 }
 0x267   : > { %v5989_v62 = vpop.eup %5988  ;;  %v3833_v29 = vmin.f32 %v8645_v19, 20.0  ;;  %v8668_v20 = vadd.f32 %v10692_v58, %v6957_v5  ;;  %v2730_v31 = vsel %vm2590_vm2, %v10691_v40, %v2692_v32  ;;  %v2698_v1 = vmul.f32 %v8066_v35, %v2697_v52  ;;  %v8683_v35 = vpop.permute.xlu0 %1850 }
 0x268   : > { %v8674_v24 = vpop.eup %5990  ;;  %2754 = vrot.lane.b32.xlu0 %v2730_v31, %s6440_s23  ;;  %v2695_v6 = vmul.f32 0.6931472, %v5989_v62  ;;  %v3062_v59 = vand.u32 2147483647, %v8098_v41  ;;  %v2705_v13 = vmul.f32 -0.5, %v8152_v55  ;;  %v8680_v60 = vadd.f32 1.0, %v10694_v47 }
 0x269   : > { %6000 = vpow2.f32 %v3846_v45  ;;  %v3424_v58 = vmul.f32 1.442695, %v3397_v4  ;;  %vm2591_vm4 = vcmp.gt.f32.partialorder %v10696_v54, 20.0  ;;  %vm2700_vm5 = vcmp.lt.f32.partialorder %v2699_v0, 0.0004427343  ;;  %10697 = vst [vmem:[#allocation111_spill] sm:$0xff] %v8683_v35 }
 0x26a   : > { %10695 = vst [vmem:[#allocation62_spill] sm:$0xff] %v8680_v60  ;;  %v5993_v52 = vpop.eup %5992  ;;  %v2701_v40 = vsel %vm2700_vm5, %v2698_v1, %v2695_v6  ;;  %v3061_v32 = vmul.f32 %v8098_v41, %v3060_v25  ;;  %v3069_v31 = vadd.f32 1.0, %v3068_v15  ;;  %6002 = vlog2.f32 %v8680_v60  ;;  %v10700_v15 = vld [vmem:[#allocation72_spill] sm:$0xff]  ;;  %v8699_v6 = vpop.permute.xlu1 %1852 }
 0x26b   : > { %v2731_v62 = vsel %vm2591_vm4, %v10696_v54, %v2701_v40  ;;  %v3058_v22 = vmul.f32 0.6931472, %v5993_v52  ;;  %v3071_v3 = vand.u32 2147483647, %v10684_v61  ;;  %v8690_v45 = vadd.f32 1.0, %v10698_v37  ;;  %10701 = vst [vmem:[#allocation71_spill] sm:$0xff] %v8699_v6  ;;  %v8713_v6 = vpop.permute.xlu0 %1426 }
 0x26c   : > { %v8692_v4 = vpop.eup %5994  ;;  %v3852_v0 = vmul.f32 1.442695, %v3833_v29  ;;  %v3396_v35 = vmin.f32 %v8668_v20, 20.0  ;;  %2756 = vrot.lane.b32.xlu1 %v2731_v62, %s6440_s23  ;;  %vm3063_vm6 = vcmp.lt.f32.partialorder %v3062_v59, 0.0004427343  ;;  %v2706_v41 = vadd.f32 1.0, %v2705_v13 }
 0x26d   : > { %10699 = vst [vmem:[#allocation80_spill] sm:$0xff] %v8690_v45  ;;  %v5997_v25 = vpop.eup %5996  ;;  %vm3026_vm7 = vcmp.gt.f32.partialorder %v10700_v15, 20.0  ;;  %v3064_v1 = vsel %vm3063_vm6, %v3061_v32, %v3058_v22  ;;  %v2714_v54 = vmul.f32 -0.5, %v10694_v47  ;;  %6004 = vlog2.f32 %v8690_v45  ;;  %v10702_v59 = vld [vmem:[#allocation108_spill] sm:$0xff]  ;;  %v10703_v32 = vld [vmem:[#allocation10_spill] sm:$0xff]  ;;  %10705 = vst [vmem:[#allocation72_spill] sm:$0xff] %v8713_v6 }
 0x26e   : > { %v3166_v52 = vsel %vm3026_vm7, %v10700_v15, %v3064_v1  ;;  %v3067_v40 = vmul.f32 0.6931472, %v5997_v25  ;;  %v3070_v29 = vmul.f32 %v10684_v61, %v3069_v31  ;;  %v2708_v60 = vand.u32 2147483647, %v8152_v55  ;;  %v10706_v1 = vld [vmem:[#allocation36_spill] sm:$0xff] }
 0x26f   : > { %v8706_v13 = vadd.f32 %v10702_v59, %v6975_v16  ;;  %3182 = vrot.lane.b32.xlu0 %v3166_v52, %s6440_s23  ;;  %vm3072_vm8 = vcmp.lt.f32.partialorder %v3071_v3, 0.0004427343  ;;  %v3077_v22 = vmul.f32 -0.5, %v10698_v37  ;;  %v8711_v62 = vadd.f32 1.0, %v10703_v32  ;;  %v10707_v52 = vld [vmem:[#allocation132_spill] sm:$0xff] }
 0x270   : > { %v5999_v15 = vpop.eup %5998  ;;  %v3422_v25 = vmul.f32 1.442695, %v3396_v35  ;;  %vm3027_vm9 = vcmp.gt.f32.partialorder %v10706_v1, 20.0  ;;  %v3073_v61 = vsel %vm3072_vm8, %v3070_v29, %v3067_v40  ;;  %v2707_v31 = vmul.f32 %v8152_v55, %v2706_v41  ;;  %v10709_v40 = vld [vmem:[#allocation90_spill] sm:$0xff]  ;;  %v8727_v29 = vpop.permute.xlu1 %1428 }
 0x271   : > { %10704 = vst [vmem:[#allocation76_spill] sm:$0xff] %v8711_v62  ;;  %v3167_v16 = vsel %vm3027_vm9, %v10706_v1, %v3073_v61  ;;  %v2704_v59 = vmul.f32 0.6931472, %v5999_v15  ;;  %v2715_v45 = vadd.f32 1.0, %v2714_v54  ;;  %6006 = vlog2.f32 %v8711_v62  ;;  %10710 = vst [vmem:[#allocation10_spill] sm:$0xff] %v8727_v29  ;;  %v10725_v29 = vld [vmem:[#allocation114_spill] sm:$0xff] }
 0x272   : > { %6008 = vpow2.f32 %v3424_v58  ;;  %3184 = vrot.lane.b32.xlu1 %v3167_v16, %s6440_s23  ;;  %vm2709_vm10 = vcmp.lt.f32.partialorder %v2708_v60, 0.0004427343  ;;  %v2717_v3 = vand.u32 2147483647, %v10694_v47  ;;  %v8722_v6 = vadd.f32 1.0, %v10707_v52  ;;  %v10712_v16 = vld [vmem:[#allocation131_spill] sm:$0xff] }
 0x273   : > { %v8724_v35 = vpop.eup %6000  ;;  %6010 = vpow2.f32 %v3852_v0  ;;  %vm2592_vm11 = vcmp.gt.f32.partialorder %v10709_v40, 20.0  ;;  %v2710_v55 = vsel %vm2709_vm10, %v2707_v31, %v2704_v59  ;;  %v3078_v41 = vadd.f32 1.0, %v3077_v22  ;;  %v8736_v31 = vpop.permute.xlu0 %1854 }
 0x274   : > { %10708 = vst [vmem:[#allocation108_spill] sm:$0xff] %v8722_v6  ;;  %v6003_v54 = vpop.eup %6002  ;;  %v2732_v58 = vsel %vm2592_vm11, %v10709_v40, %v2710_v55  ;;  %v3086_v15 = vmul.f32 -0.5, %v10703_v32  ;;  %6012 = vlog2.f32 %v8722_v6  ;;  %v3832_v60 = vmin.f32 %v8706_v13, 20.0  ;;  %10711 = vst [vmem:[#allocation36_spill] sm:$0xff] %v8736_v31  ;;  %v10714_v55 = vld [vmem:[#allocation19_spill] sm:$0xff] }
 0x275   : > { %2758 = vrot.lane.b32.xlu0 %v2732_v58, %s6440_s23  ;;  %v2713_v1 = vmul.f32 0.6931472, %v6003_v54  ;;  %v2716_v0 = vmul.f32 %v10694_v47, %v2715_v45  ;;  %v3080_v61 = vand.u32 2147483647, %v10698_v37  ;;  %6014 = vpow2.f32 %v3422_v25  ;;  %v10715_v58 = vld [vmem:[#allocation78_spill] sm:$0xff] }
 0x276   : > { %vm2718_vm12 = vcmp.lt.f32.partialorder %v2717_v3, 0.0004427343  ;;  %v3095_v22 = vmul.f32 -0.5, %v10707_v52  ;;  %v8740_v59 = vadd.f32 1.0, %v10712_v16  ;;  %v8744_v6 = vadd.f32 %v10714_v55, %v6982_v7  ;;  %v10716_v3 = vld [vmem:[#allocation112_spill] sm:$0xff] }
 0x277   : > { %v6005_v40 = vpop.eup %6004  ;;  %vm2593_vm13 = vcmp.gt.f32.partialorder %v10715_v58, 20.0  ;;  %v2719_v54 = vsel %vm2718_vm12, %v2716_v0, %v2713_v1  ;;  %v3079_v47 = vmul.f32 %v10698_v37, %v3078_v41  ;;  %v3087_v25 = vadd.f32 1.0, %v3086_v15  ;;  %v8759_v1 = vpop.permute.xlu1 %1856  ;;  %v10719_v37 = vld [vmem:[#allocation81_spill] sm:$0xff] }
 0x278   : > { %10713 = vst [vmem:[#allocation132_spill] sm:$0xff] %v8740_v59  ;;  %v2733_v45 = vsel %vm2593_vm13, %v10715_v58, %v2719_v54  ;;  %v3076_v62 = vmul.f32 0.6931472, %v6005_v40  ;;  %6016 = vlog2.f32 %v8740_v59  ;;  %v8752_v31 = vadd.f32 %v10716_v3, %v6988_v12  ;;  %10718 = vst [vmem:[#allocation131_spill] sm:$0xff] %v8759_v1  ;;  %v10722_v59 = vld [vmem:[#allocation57_spill] sm:$0xff] }
 0x279   : > { %2760 = vrot.lane.b32.xlu1 %v2733_v45, %s6440_s23  ;;  %vm3081_vm14 = vcmp.lt.f32.partialorder %v3080_v61, 0.0004427343  ;;  %v3089_v7 = vand.u32 2147483647, %v10703_v32  ;;  %v8757_v55 = vadd.f32 1.0, %v8217_v57  ;;  %vm3028_vm15 = vcmp.gt.f32.partialorder %v10719_v37, 20.0  ;;  %v8765_v61 = vpop.permute.xlu0 %1858 }
 0x27a   : > { %v3082_v41 = vsel %vm3081_vm14, %v3079_v47, %v3076_v62  ;;  %v3096_v15 = vadd.f32 1.0, %v3095_v22  ;;  %v3104_v0 = vmul.f32 -0.5, %v10712_v16  ;;  %v3850_v58 = vmul.f32 1.442695, %v3832_v60  ;;  %10720 = vst [vmem:[#allocation19_spill] sm:$0xff] %v8765_v61 }
 0x27b   : > { %10717 = vst [vmem:[#allocation90_spill] sm:$0xff] %v8757_v55  ;;  %v6007_v40 = vpop.eup %6006  ;;  %v3168_v12 = vsel %vm3028_vm15, %v10719_v37, %v3082_v41  ;;  %6018 = vlog2.f32 %v8757_v55  ;;  %v3835_v45 = vmin.f32 %v8744_v6, 20.0  ;;  %v3088_v62 = vmul.f32 %v10703_v32, %v3087_v25 }
 0x27c   : > { %v8767_v54 = vpop.eup %6008  ;;  %3186 = vrot.lane.b32.xlu0 %v3168_v12, %s6440_s23  ;;  %v3085_v3 = vmul.f32 0.6931472, %v6007_v40  ;;  %v3098_v22 = vand.u32 2147483647, %v10707_v52  ;;  %v3834_v60 = vmin.f32 %v8752_v31, 20.0  ;;  %v3113_v37 = vmul.f32 -0.5, %v8217_v57 }
 0x27d   : > { %v8773_v47 = vpop.eup %6010  ;;  %vm3090_vm1 = vcmp.lt.f32.partialorder %v3089_v7, 0.0004427343  ;;  %v8778_v41 = vadd.f32 1.0, %v8198_v48  ;;  %vm3029_vm2 = vcmp.gt.f32.partialorder %v10722_v59, 20.0  ;;  %v3097_v40 = vmul.f32 %v10707_v52, %v3096_v15  ;;  %v8787_v7 = vpop.permute.xlu1 %1860  ;;  %v10726_v52 = vld [vmem:[#allocation67_spill] sm:$0xff] }
 0x27e   : > { %v6013_v55 = vpop.eup %6012  ;;  %v3091_v61 = vsel %vm3090_vm1, %v3088_v62, %v3085_v3  ;;  %v3105_v12 = vadd.f32 1.0, %v3104_v0  ;;  %v8785_v1 = vadd.f32 1.0, %v8223_v11  ;;  %10724 = vst [vmem:[#allocation81_spill] sm:$0xff] %v8787_v7  ;;  %v8793_v56 = vadd.f32 %v10725_v29, %v6999_v30 }
 0x27f   : > { %10721 = vst [vmem:[#allocation78_spill] sm:$0xff] %v8778_v41  ;;  %v3169_v32 = vsel %vm3029_vm2, %v10722_v59, %v3091_v61  ;;  %v3094_v25 = vmul.f32 0.6931472, %v6013_v55  ;;  %6020 = vlog2.f32 %v8778_v41  ;;  %v8789_v9 = vpop.eup %6014  ;;  %vm3030_vm3 = vcmp.gt.f32.partialorder %v10726_v52, 20.0  ;;  %v8800_v61 = vpop.permute.xlu0 %1862 }
 0x280   : > { %10723 = vst [vmem:[#allocation112_spill] sm:$0xff] %v8785_v1  ;;  %3188 = vrot.lane.b32.xlu1 %v3169_v32, %s6440_s23  ;;  %vm3099_vm4 = vcmp.lt.f32.partialorder %v3098_v22, 0.0004427343  ;;  %v3107_v59 = vand.u32 2147483647, %v10712_v16  ;;  %v3114_v15 = vadd.f32 1.0, %v3113_v37  ;;  %6022 = vlog2.f32 %v8785_v1 }
 0x281   : > { %v3100_v55 = vsel %vm3099_vm4, %v3097_v40, %v3094_v25  ;;  %v3122_v0 = vmul.f32 -0.5, %v8198_v48  ;;  %10727 = vst [vmem:[#allocation57_spill] sm:$0xff] %v8800_v61  ;;  %6024 = vpow2.f32 %v3850_v58  ;;  %v3856_v62 = vmul.f32 1.442695, %v3835_v45  ;;  %v10729_v45 = vld [vmem:[#allocation60_spill] sm:$0xff]  ;;  %v10758_v61 = vld [vmem:[#allocation141_spill] sm:$0xff] }
 0x282   : > { %v6017_v3 = vpop.eup %6016  ;;  %v3170_v30 = vsel %vm3030_vm3, %v10726_v52, %v3100_v55  ;;  %v3854_v29 = vmul.f32 1.442695, %v3834_v60  ;;  %v3106_v22 = vmul.f32 %v10712_v16, %v3105_v12  ;;  %v3116_v40 = vand.u32 2147483647, %v8217_v57 }
 0x283   : > { %3190 = vrot.lane.b32.xlu0 %v3170_v30, %s6440_s23  ;;  %v3103_v32 = vmul.f32 0.6931472, %v6017_v3  ;;  %v3837_v37 = vmin.f32 %v8793_v56, 20.0  ;;  %vm3108_vm5 = vcmp.lt.f32.partialorder %v3107_v59, 0.0004427343  ;;  %v3485_v25 = vmul.f32 -0.5, %v8223_v11  ;;  %v8813_v3 = vpop.permute.xlu1 %1864 }
 0x284   : > { %v8809_v1 = vadd.f32 1.0, %v8213_v42  ;;  %vm3031_vm6 = vcmp.gt.f32.partialorder %v10729_v45, 20.0  ;;  %v3115_v60 = vmul.f32 %v8217_v57, %v3114_v15  ;;  %v3123_v55 = vadd.f32 1.0, %v3122_v0  ;;  %10730 = vst [vmem:[#allocation67_spill] sm:$0xff] %v8813_v3  ;;  %v10732_v30 = vld [vmem:[#allocation73_spill] sm:$0xff]  ;;  %v8823_v57 = vpop.permute.xlu0 %2290  ;;  %v10750_v3 = vld [vmem:[#allocation8_spill] sm:$0xff] }
 0x285   : > { %v6019_v58 = vpop.eup %6018  ;;  %v3109_v52 = vsel %vm3108_vm5, %v3106_v22, %v3103_v32  ;;  %v8818_v59 = vadd.f32 1.0, %v8270_v17  ;;  %vm3032_vm7 = vcmp.gt.f32.partialorder %v10732_v30, 20.0  ;;  %vm3117_vm8 = vcmp.lt.f32.partialorder %v3116_v40, 0.0004427343  ;;  %10733 = vst [vmem:[#allocation73_spill] sm:$0xff] %v8823_v57 }
 0x286   : > { %10728 = vst [vmem:[#allocation114_spill] sm:$0xff] %v8809_v1  ;;  %v3171_v16 = vsel %vm3031_vm6, %v10729_v45, %v3109_v52  ;;  %v3112_v12 = vmul.f32 0.6931472, %v6019_v58  ;;  %6026 = vlog2.f32 %v8809_v1  ;;  %v3125_v32 = vand.u32 2147483647, %v8198_v48  ;;  %v10734_v45 = vld [vmem:[#allocation22_spill] sm:$0xff] }
 0x287   : > { %10731 = vst [vmem:[#allocation60_spill] sm:$0xff] %v8818_v59  ;;  %6028 = vpow2.f32 %v3856_v62  ;;  %3192 = vrot.lane.b32.xlu1 %v3171_v16, %s6440_s23  ;;  %v3486_v0 = vadd.f32 1.0, %v3485_v25  ;;  %v3488_v22 = vand.u32 2147483647, %v8223_v11  ;;  %v8829_v62 = vadd.f32 %v10734_v45, %v6954_v2  ;;  %v10736_v1 = vld [vmem:[#allocation115_spill] sm:$0xff]  ;;  %v10738_v45 = vld [vmem:[#allocation133_spill] sm:$0xff] }
 0x288   : > { %v3118_v15 = vsel %vm3117_vm8, %v3115_v60, %v3112_v12  ;;  %6030 = vlog2.f32 %v8818_v59  ;;  %v3494_v40 = vmul.f32 -0.5, %v8213_v42  ;;  %v3860_v16 = vmul.f32 1.442695, %v3837_v37 }
 0x289   : > { %v6021_v58 = vpop.eup %6020  ;;  %6032 = vpow2.f32 %v3854_v29  ;;  %10735 = vst [vmem:[#allocation22_spill] sm:$0xff] %v8829_v62  ;;  %v3172_v52 = vsel %vm3032_vm7, %v10732_v30, %v3118_v15  ;;  %v8835_v57 = vadd.f32 %v10736_v1, %v7006_v36  ;;  %v3124_v60 = vmul.f32 %v8198_v48, %v3123_v55  ;;  %v10737_v29 = vld [vmem:[#allocation66_spill] sm:$0xff]  ;;  %v8844_v15 = vpop.permute.xlu1 %2292 }
 0x28a   : > { %3194 = vrot.lane.b32.xlu0 %v3172_v52, %s6440_s23  ;;  %v3121_v25 = vmul.f32 0.6931472, %v6021_v58  ;;  %v6023_v12 = vpop.eup %6022  ;;  %vm3033_vm9 = vcmp.gt.f32.partialorder %v10737_v29, 20.0  ;;  %vm3126_vm10 = vcmp.lt.f32.partialorder %v3125_v32, 0.0004427343  ;;  %v3131_v2 = vmul.f32 -0.5, %v8270_v17  ;;  %v8854_v58 = vpop.permute.xlu0 %1866 }
 0x28b   : > { %v8842_v30 = vadd.f32 1.0, %v10738_v45  ;;  %10740 = vst [vmem:[#allocation66_spill] sm:$0xff] %v8844_v15  ;;  %v8846_v37 = vpop.eup %6024  ;;  %v3484_v1 = vmul.f32 0.6931472, %v6023_v12  ;;  %v3487_v52 = vmul.f32 %v8223_v11, %v3486_v0  ;;  %vm3489_vm11 = vcmp.lt.f32.partialorder %v3488_v22, 0.0004427343 }
 0x28c   : > { %v3127_v36 = vsel %vm3126_vm10, %v3124_v60, %v3121_v25  ;;  %v3495_v55 = vadd.f32 1.0, %v3494_v40  ;;  %v8852_v32 = vadd.f32 1.0, %v8277_v49  ;;  %10742 = vst [vmem:[#allocation152_spill] sm:$0xff] %v8854_v58  ;;  %v3841_v59 = vmin.f32 %v8829_v62, 20.0  ;;  %v10743_v15 = vld [vmem:[#allocation44_spill] sm:$0xff] }
 0x28d   : > { %10739 = vst [vmem:[#allocation115_spill] sm:$0xff] %v8842_v30  ;;  %v3173_v48 = vsel %vm3033_vm9, %v10737_v29, %v3127_v36  ;;  %6034 = vlog2.f32 %v8842_v30  ;;  %vm3468_vm12 = vcmp.gt.f32.partialorder %v10743_v15, 20.0  ;;  %v3490_v25 = vsel %vm3489_vm11, %v3487_v52, %v3484_v1  ;;  %v10744_v0 = vld [vmem:[#allocation116_spill] sm:$0xff] }
 0x28e   : > { %10741 = vst [vmem:[#allocation133_spill] sm:$0xff] %v8852_v32  ;;  %3196 = vrot.lane.b32.xlu1 %v3173_v48, %s6440_s23  ;;  %v3497_v11 = vand.u32 2147483647, %v8213_v42  ;;  %v8862_v22 = vadd.f32 %v10744_v0, %v6957_v5  ;;  %v3608_v40 = vsel %vm3468_vm12, %v10743_v15, %v3490_v25  ;;  %v3132_v60 = vadd.f32 1.0, %v3131_v2  ;;  %v10745_v2 = vld [vmem:[#allocation134_spill] sm:$0xff]  ;;  %v8877_v0 = vpop.permute.xlu1 %1868  ;;  %v10749_v58 = vld [vmem:[#allocation120_spill] sm:$0xff]  ;;  %v8892_v41 = vpop.permute.xlu0 %2294 }
 0x28f   : > { %6036 = vlog2.f32 %v8852_v32  ;;  %v3836_v29 = vmin.f32 %v8835_v57, 20.0  ;;  %3622 = vrot.lane.b32.xlu0 %v3608_v40, %s6440_s23  ;;  %v3134_v36 = vand.u32 2147483647, %v8270_v17  ;;  %v3140_v1 = vmul.f32 -0.5, %v10738_v45  ;;  %10747 = vst [vmem:[#allocation116_spill] sm:$0xff] %v8877_v0  ;;  %v10748_v32 = vld [vmem:[#allocation118_spill] sm:$0xff] }
 0x290   : > { %v6027_v12 = vpop.eup %6026  ;;  %6038 = vpow2.f32 %v3860_v16  ;;  %v3496_v5 = vmul.f32 %v8213_v42, %v3495_v55  ;;  %v3503_v15 = vmul.f32 -0.5, %v8277_v49  ;;  %v8875_v25 = vadd.f32 1.0, %v10745_v2  ;;  %10751 = vst [vmem:[#allocation134_spill] sm:$0xff] %v8892_v41  ;;  %v10756_v41 = vld [vmem:[#allocation85_spill] sm:$0xff] }
 0x291   : > { %v8870_v52 = vpop.eup %6028  ;;  %v3493_v48 = vmul.f32 0.6931472, %v6027_v12  ;;  %v8881_v40 = vadd.f32 %v10748_v32, %v10372_v10  ;;  %v8885_v30 = vadd.f32 %v10749_v58, %v10382_v43  ;;  %vm3469_vm13 = vcmp.gt.f32.partialorder %v10750_v3, 20.0  ;;  %v10753_v58 = vld [vmem:[#allocation93_spill] sm:$0xff] }
 0x292   : > { %10746 = vst [vmem:[#allocation44_spill] sm:$0xff] %v8875_v25  ;;  %v6031_v16 = vpop.eup %6030  ;;  %vm3498_vm14 = vcmp.lt.f32.partialorder %v3497_v11, 0.0004427343  ;;  %v3133_v7 = vmul.f32 %v8270_v17, %v3132_v60  ;;  %6040 = vlog2.f32 %v8875_v25  ;;  %vm3135_vm15 = vcmp.lt.f32.partialorder %v3134_v36, 0.0004427343  ;;  %v8918_v25 = vpop.permute.xlu0 %1870 }
 0x293   : > { %v8888_v42 = vpop.eup %6032  ;;  %v3499_v55 = vsel %vm3498_vm14, %v3496_v5, %v3493_v48  ;;  %v3130_v12 = vmul.f32 0.6931472, %v6031_v16  ;;  %v3141_v32 = vadd.f32 1.0, %v3140_v1  ;;  %v8896_v43 = vadd.f32 1.0, %v8334_v38  ;;  %10757 = vst [vmem:[#allocation93_spill] sm:$0xff] %v8918_v25 }
 0x294   : > { %v3609_v10 = vsel %vm3469_vm13, %v10750_v3, %v3499_v55  ;;  %vm3034_vm1 = vcmp.gt.f32.partialorder %v10753_v58, 20.0  ;;  %v3143_v48 = vand.u32 2147483647, %v10738_v45  ;;  %v3504_v5 = vadd.f32 1.0, %v3503_v15 }
 0x295   : > { %10752 = vst [vmem:[#allocation118_spill] sm:$0xff] %v8896_v43  ;;  %3624 = vrot.lane.b32.xlu1 %v3609_v10, %s6440_s23  ;;  %v3136_v11 = vsel %vm3135_vm15, %v3133_v7, %v3130_v12  ;;  %v3868_v17 = vmul.f32 1.442695, %v3841_v59  ;;  %v3512_v16 = vmul.f32 -0.5, %v10745_v2  ;;  %6042 = vlog2.f32 %v8896_v43  ;;  %v8908_v12 = vpop.permute.xlu1 %2296 }
 0x296   : > { %v3174_v60 = vsel %vm3034_vm1, %v10753_v58, %v3136_v11  ;;  %v3858_v36 = vmul.f32 1.442695, %v3836_v29  ;;  %v3840_v1 = vmin.f32 %v8862_v22, 20.0  ;;  %v3839_v55 = vmin.f32 %v8881_v40, 20.0  ;;  %10754 = vst [vmem:[#allocation120_spill] sm:$0xff] %v8908_v12 }
 0x297   : > { %v6035_v3 = vpop.eup %6034  ;;  %3198 = vrot.lane.b32.xlu0 %v3174_v60, %s6440_s23  ;;  %v3506_v7 = vand.u32 2147483647, %v8277_v49  ;;  %v3142_v59 = vmul.f32 %v10738_v45, %v3141_v32  ;;  %v3149_v10 = vmul.f32 -0.5, %v8334_v38  ;;  %v8913_v58 = vadd.f32 1.0, %v8297_v51 }
 0x298   : > { %v3139_v15 = vmul.f32 0.6931472, %v6035_v3  ;;  %v3838_v29 = vmin.f32 %v8885_v30, 20.0  ;;  %vm3035_vm2 = vcmp.gt.f32.partialorder %v10756_v41, 20.0  ;;  %vm3144_vm3 = vcmp.lt.f32.partialorder %v3143_v48, 0.0004427343 }
 0x299   : > { %10755 = vst [vmem:[#allocation8_spill] sm:$0xff] %v8913_v58  ;;  %v6037_v11 = vpop.eup %6036  ;;  %v3505_v60 = vmul.f32 %v8277_v49, %v3504_v5  ;;  %v3513_v45 = vadd.f32 1.0, %v3512_v16  ;;  %6044 = vlog2.f32 %v8913_v58  ;;  %vm3507_vm4 = vcmp.lt.f32.partialorder %v3506_v7, 0.0004427343  ;;  %v10760_v49 = vld [vmem:[#allocation41_spill] sm:$0xff] }
 0x29a   : > { %v8920_v43 = vpop.eup %6038  ;;  %v3145_v3 = vsel %vm3144_vm3, %v3142_v59, %v3139_v15  ;;  %v3502_v12 = vmul.f32 0.6931472, %v6037_v11  ;;  %v3515_v0 = vand.u32 2147483647, %v10745_v2  ;;  %v8926_v62 = vadd.f32 1.0, %v10758_v61 }
 0x29b   : > { %v3175_v32 = vsel %vm3035_vm2, %v10756_v41, %v3145_v3  ;;  %6046 = vpow2.f32 %v3868_v17  ;;  %vm3470_vm5 = vcmp.gt.f32.partialorder %v10760_v49, 20.0  ;;  %v3150_v5 = vadd.f32 1.0, %v3149_v10  ;;  %v8933_v41 = vpop.permute.xlu1 %1872 }
 0x29c   : > { %10759 = vst [vmem:[#allocation85_spill] sm:$0xff] %v8926_v62  ;;  %3200 = vrot.lane.b32.xlu1 %v3175_v32, %s6440_s23  ;;  %v3508_v48 = vsel %vm3507_vm4, %v3505_v60, %v3502_v12  ;;  %v6041_v15 = vpop.eup %6040  ;;  %v3866_v59 = vmul.f32 1.442695, %v3840_v1  ;;  %v3158_v11 = vmul.f32 -0.5, %v8297_v51  ;;  %6048 = vlog2.f32 %v8926_v62  ;;  %v10761_v1 = vld [vmem:[#allocation137_spill] sm:$0xff]  ;;  %v8941_v60 = vpop.permute.xlu0 %2298 }
 0x29d   : > { %v3610_v16 = vsel %vm3470_vm5, %v10760_v49, %v3508_v48  ;;  %v3864_v7 = vmul.f32 1.442695, %v3839_v55  ;;  %v3511_v17 = vmul.f32 0.6931472, %v6041_v15  ;;  %v3514_v3 = vmul.f32 %v10745_v2, %v3513_v45  ;;  %v10763_v48 = vld [vmem:[#allocation91_spill] sm:$0xff] }
 0x29e   : > { %3626 = vrot.lane.b32.xlu0 %v3610_v16, %s6440_s23  ;;  %v3152_v32 = vand.u32 2147483647, %v8334_v38  ;;  %6050 = vpow2.f32 %v3858_v36  ;;  %v3862_v12 = vmul.f32 1.442695, %v3838_v29  ;;  %vm3516_vm6 = vcmp.lt.f32.partialorder %v3515_v0, 0.0004427343 }
 0x29f   : > { %v8939_v10 = vadd.f32 1.0, %v10761_v1  ;;  %v6043_v49 = vpop.eup %6042  ;;  %vm3471_vm7 = vcmp.gt.f32.partialorder %v10763_v48, 20.0  ;;  %v3517_v62 = vsel %vm3516_vm6, %v3514_v3, %v3511_v17  ;;  %v3151_v55 = vmul.f32 %v8334_v38, %v3150_v5  ;;  %v10764_v36 = vld [vmem:[#allocation145_spill] sm:$0xff]  ;;  %v8954_v5 = vpop.permute.xlu1 %2300 }
 0x2a0   : > { %v3521_v15 = vmul.f32 -0.5, %v10758_v61  ;;  %v3611_v2 = vsel %vm3471_vm7, %v10763_v48, %v3517_v62  ;;  %v3148_v45 = vmul.f32 0.6931472, %v6043_v49  ;;  %v3159_v16 = vadd.f32 1.0, %v3158_v11  ;;  %v10766_v17 = vld [vmem:[#allocation9_spill] sm:$0xff]  ;;  %10767 = vst [vmem:[#allocation137_spill] sm:$0xff] %v8954_v5 }
 0x2a1   : > { %10762 = vst [vmem:[#allocation141_spill] sm:$0xff] %v8939_v10  ;;  %6052 = vlog2.f32 %v8939_v10  ;;  %3628 = vrot.lane.b32.xlu1 %v3611_v2, %s6440_s23  ;;  %vm3153_vm8 = vcmp.lt.f32.partialorder %v3152_v32, 0.0004427343  ;;  %v3161_v0 = vand.u32 2147483647, %v8297_v51  ;;  %v8951_v29 = vadd.f32 1.0, %v10764_v36 }
 0x2a2   : > { %6054 = vpow2.f32 %v3866_v59  ;;  %vm3036_vm9 = vcmp.gt.f32.partialorder %v10766_v17, 20.0  ;;  %v3154_v38 = vsel %vm3153_vm8, %v3151_v55, %v3148_v45  ;;  %v3522_v3 = vadd.f32 1.0, %v3521_v15  ;;  %v10769_v2 = vld [vmem:[#allocation35_spill] sm:$0xff]  ;;  %v10770_v15 = vld [vmem:[#allocation13_spill] sm:$0xff] }
 0x2a3   : > { %10765 = vst [vmem:[#allocation41_spill] sm:$0xff] %v8951_v29  ;;  %6056 = vpow2.f32 %v3864_v7  ;;  %v6045_v62 = vpop.eup %6044  ;;  %v3176_v11 = vsel %vm3036_vm9, %v10766_v17, %v3154_v38  ;;  %v3530_v59 = vmul.f32 -0.5, %v10761_v1  ;;  %v3160_v49 = vmul.f32 %v8297_v51, %v3159_v16  ;;  %v8962_v7 = vpop.permute.xlu0 %2302  ;;  %v10771_v38 = vld [vmem:[#allocation101_spill] sm:$0xff] }
 0x2a4   : > { %6058 = vpow2.f32 %v3862_v12  ;;  %3202 = vrot.lane.b32.xlu0 %v3176_v11, %s6440_s23  ;;  %v3157_v32 = vmul.f32 0.6931472, %v6045_v62  ;;  %v3524_v48 = vand.u32 2147483647, %v10758_v61  ;;  %10768 = vst [vmem:[#allocation91_spill] sm:$0xff] %v8962_v7  ;;  %vm3037_vm11 = vcmp.gt.f32.partialorder %v10770_v15, 20.0 }
 0x2a5   : > { %6060 = vlog2.f32 %v8951_v29  ;;  %v8964_v55 = vpop.eup %6046  ;;  %vm3162_vm10 = vcmp.lt.f32.partialorder %v3161_v0, 0.0004427343  ;;  %v3539_v17 = vmul.f32 -0.5, %v10764_v36  ;;  %v8970_v62 = vadd.f32 1.0, %v10771_v38 }
 0x2a6   : > { %6062 = vrcp.f32 %v10769_v2  ;;  %v6049_v12 = vpop.eup %6048  ;;  %v3163_v45 = vsel %vm3162_vm10, %v3160_v49, %v3157_v32  ;;  %v3523_v11 = vmul.f32 %v10758_v61, %v3522_v3  ;;  %v3531_v29 = vadd.f32 1.0, %v3530_v59  ;;  %v8982_v49 = vpop.permute.xlu1 %2304  ;;  %v10775_v2 = vld [vmem:[#allocation43_spill] sm:$0xff]  ;;  %v10777_v59 = vld [vmem:[#allocation50_spill] sm:$0xff] }
 0x2a7   : > { %10772 = vst [vmem:[#allocation145_spill] sm:$0xff] %v8970_v62  ;;  %v3177_v51 = vsel %vm3037_vm11, %v10770_v15, %v3163_v45  ;;  %v3520_v16 = vmul.f32 0.6931472, %v6049_v12  ;;  %vm3525_vm12 = vcmp.lt.f32.partialorder %v3524_v48, 0.0004427343  ;;  %6064 = vlog2.f32 %v8970_v62  ;;  %10774 = vst [vmem:[#allocation35_spill] sm:$0xff] %v8982_v49  ;;  %v8988_v45 = vpop.permute.xlu0 %2306 }
 0x2a8   : > { %v8974_v10 = vpop.eup %6050  ;;  %3204 = vrot.lane.b32.xlu1 %v3177_v51, %s6440_s23  ;;  %v3533_v0 = vand.u32 2147483647, %v10761_v1  ;;  %v8980_v32 = vadd.f32 1.0, %v8558_v63  ;;  %6066 = vrcp.f32 %v10775_v2  ;;  %v10776_v12 = vld [vmem:[#allocation96_spill] sm:$0xff]  ;;  %v3540_v48 = vadd.f32 1.0, %v3539_v17  ;;  %10778 = vst [vmem:[#allocation13_spill] sm:$0xff] %v8988_v45 }
 0x2a9   : > { %vm3472_vm13 = vcmp.gt.f32.partialorder %v10776_v12, 20.0  ;;  %v3526_v61 = vsel %vm3525_vm12, %v3523_v11, %v3520_v16  ;;  %6068 = vrcp.f32 %v10777_v59  ;;  %v3532_v58 = vmul.f32 %v10761_v1, %v3531_v29  ;;  %v10779_v11 = vld [vmem:[#allocation56_spill] sm:$0xff]  ;;  %v10785_v45 = vld [vmem:[#allocation65_spill] sm:$0xff] }
 0x2aa   : > { %10773 = vst [vmem:[#allocation9_spill] sm:$0xff] %v8980_v32  ;;  %v3612_v15 = vsel %vm3472_vm13, %v10776_v12, %v3526_v61  ;;  %v3548_v2 = vmul.f32 -0.5, %v10771_v38  ;;  %6070 = vlog2.f32 %v8980_v32  ;;  %vm3534_vm14 = vcmp.lt.f32.partialorder %v3533_v0, 0.0004427343  ;;  %v10780_v61 = vld [vmem:[#allocation11_spill] sm:$0xff]  ;;  %v9010_v0 = vpop.permute.xlu1 %2308 }
 0x2ab   : > { %v6053_v3 = vpop.eup %6052  ;;  %3630 = vrot.lane.b32.xlu0 %v3612_v15, %s6440_s23  ;;  %6072 = vrcp.f32 %v10779_v11  ;;  %v3542_v17 = vand.u32 2147483647, %v10764_v36  ;;  %vm3473_vm15 = vcmp.gt.f32.partialorder %v10780_v61, 20.0  ;;  %v9005_v1 = vadd.f32 1.0, %v8418_v34  ;;  %v10782_v15 = vld [vmem:[#allocation64_spill] sm:$0xff]  ;;  %10783 = vst [vmem:[#allocation43_spill] sm:$0xff] %v9010_v0 }
 0x2ac   : > { %v8990_v51 = vpop.eup %6054  ;;  %v3529_v62 = vmul.f32 0.6931472, %v6053_v3  ;;  %v3557_v3 = vmul.f32 -0.5, %v8558_v63  ;;  %6074 = vrcp.f32 %v10782_v15  ;;  %v3541_v11 = vmul.f32 %v10764_v36, %v3540_v48  ;;  %v10786_v15 = vld [vmem:[#allocation98_spill] sm:$0xff]  ;;  %v9022_v48 = vpop.permute.xlu0 %2734 }
 0x2ad   : > { %v8996_v16 = vpop.eup %6056  ;;  %10781 = vst [vmem:[#allocation101_spill] sm:$0xff] %v9005_v1  ;;  %6076 = vlog2.f32 %v9005_v1  ;;  %vm3474_vm1 = vcmp.gt.f32.partialorder %v10786_v15, 20.0  ;;  %vm3543_vm2 = vcmp.lt.f32.partialorder %v3542_v17, 0.0004427343  ;;  %v3551_v36 = vand.u32 2147483647, %v10771_v38 }
 0x2ae   : > { %v9000_v12 = vpop.eup %6058  ;;  %v3535_v59 = vsel %vm3534_vm14, %v3532_v58, %v3529_v62  ;;  %v3549_v58 = vadd.f32 1.0, %v3548_v2  ;;  %v9017_v62 = vadd.f32 1.0, %v8568_v46  ;;  %6078 = vrcp.f32 %v10785_v45  ;;  %10787 = vst [vmem:[#allocation50_spill] sm:$0xff] %v9022_v48  ;;  %v10789_v45 = vld [vmem:[#allocation33_spill] sm:$0xff] }
 0x2af   : > { %v6061_v29 = vpop.eup %6060  ;;  %v3613_v32 = vsel %vm3473_vm15, %v10780_v61, %v3535_v59  ;;  %v3558_v59 = vadd.f32 1.0, %v3557_v3  ;;  %vm3552_vm3 = vcmp.lt.f32.partialorder %v3551_v36, 0.0004427343  ;;  %v9050_v36 = vadd.f32 1.0, %v8692_v4 }
 0x2b0   : > { %v9012_v49 = vpop.eup %6062  ;;  %3632 = vrot.lane.b32.xlu1 %v3613_v32, %s6440_s23  ;;  %v3538_v25 = vmul.f32 0.6931472, %v6061_v29  ;;  %10784 = vst [vmem:[#allocation96_spill] sm:$0xff] %v9017_v62  ;;  %v3566_v32 = vmul.f32 -0.5, %v8418_v34  ;;  %6080 = vlog2.f32 %v9017_v62  ;;  %v10788_v29 = vld [vmem:[#allocation77_spill] sm:$0xff]  ;;  %v3550_v48 = vmul.f32 %v10771_v38, %v3549_v58  ;;  %v10793_v62 = vld [vmem:[#allocation40_spill] sm:$0xff]  ;;  %v9052_v5 = vpop.permute.xlu0 %2310 }
 0x2b1   : > { %v6065_v2 = vpop.eup %6064  ;;  %6082 = vrcp.f32 %v10788_v29  ;;  %v3929_v29 = vmul.f32 -0.5, %v8568_v46  ;;  %vm3475_vm4 = vcmp.gt.f32.partialorder %v10793_v62, 20.0  ;;  %v3559_v38 = vmul.f32 %v8558_v63, %v3558_v59  ;;  %10795 = vst [vmem:[#allocation65_spill] sm:$0xff] %v9050_v36  ;;  %10796 = vst [vmem:[#allocation98_spill] sm:$0xff] %v9052_v5 }
 0x2b2   : > { %v3544_v61 = vsel %vm3543_vm2, %v3541_v11, %v3538_v25  ;;  %v9028_v0 = vpop.eup %6066  ;;  %6084 = vrcp.f32 %v10789_v45  ;;  %v3547_v17 = vmul.f32 0.6931472, %v6065_v2  ;;  %v3560_v25 = vand.u32 2147483647, %v8558_v63  ;;  %v10790_v11 = vld [vmem:[#allocation16_spill] sm:$0xff] }
 0x2b3   : > { %v3614_v1 = vsel %vm3474_vm1, %v10786_v15, %v3544_v61  ;;  %v9034_v3 = vpop.eup %6068  ;;  %6086 = vrcp.f32 %v10790_v11  ;;  %v9039_v15 = vadd.f32 1.0, %v8536_v21  ;;  %v9041_v61 = vpop.permute.xlu1 %2736  ;;  %v3567_v58 = vadd.f32 1.0, %v3566_v32 }
 0x2b4   : > { %3634 = vrot.lane.b32.xlu0 %v3614_v1, %s6440_s23  ;;  %10792 = vst [vmem:[#allocation11_spill] sm:$0xff] %v9041_v61  ;;  %v6071_v45 = vpop.eup %6070  ;;  %v3553_v1 = vsel %vm3552_vm3, %v3550_v48, %v3547_v17  ;;  %v10797_v61 = vld [vmem:[#allocation42_spill] sm:$0xff]  ;;  %vm3476_vm5 = vcmp.gt.f32.partialorder %v8330_v27, 20.0  ;;  %vm3561_vm6 = vcmp.lt.f32.partialorder %v3560_v25, 0.0004427343  ;;  %v3930_v59 = vadd.f32 1.0, %v3929_v29 }
 0x2b5   : > { %10791 = vst [vmem:[#allocation56_spill] sm:$0xff] %v9039_v15  ;;  %v9045_v2 = vpop.eup %6072  ;;  %v3615_v7 = vsel %vm3475_vm4, %v10793_v62, %v3553_v1  ;;  %v3556_v11 = vmul.f32 0.6931472, %v6071_v45  ;;  %6088 = vlog2.f32 %v9039_v15  ;;  %v3569_v63 = vand.u32 2147483647, %v8418_v34  ;;  %v10798_v45 = vld [vmem:[#allocation46_spill] sm:$0xff] }
 0x2b6   : > { %10794 = vst [vmem:[#allocation64_spill] sm:$0xff] %v9045_v2  ;;  %6090 = vrcp.f32 %v10797_v61  ;;  %3636 = vrot.lane.b32.xlu1 %v3615_v7, %s6440_s23  ;;  %v9058_v48 = vpop.eup %6074  ;;  %v3932_v32 = vand.u32 2147483647, %v8568_v46  ;;  %v3938_v7 = vmul.f32 -0.5, %v8536_v21  ;;  %v10800_v25 = vld [vmem:[#allocation38_spill] sm:$0xff]  ;;  %v3568_v29 = vmul.f32 %v8418_v34, %v3567_v58 }
 0x2b7   : > { %v3562_v62 = vsel %vm3561_vm6, %v3559_v38, %v3556_v11  ;;  %6092 = vlog2.f32 %v9050_v36  ;;  %v6077_v17 = vpop.eup %6076  ;;  %v9070_v38 = vpop.permute.xlu1 %2312  ;;  %v10801_v36 = vld [vmem:[#allocation100_spill] sm:$0xff]  ;;  %vm3570_vm8 = vcmp.lt.f32.partialorder %v3569_v63, 0.0004427343  ;;  %v9087_v63 = vadd.f32 1.0, %v8724_v35 }
 0x2b8   : > { %6094 = vrcp.f32 %v10798_v45  ;;  %v3616_v61 = vsel %vm3476_vm5, %v8330_v27, %v3562_v62  ;;  %v9065_v1 = vpop.eup %6078  ;;  %v3565_v15 = vmul.f32 0.6931472, %v6077_v17  ;;  %vm3477_vm7 = vcmp.gt.f32.partialorder %v10801_v36, 20.0  ;;  %v9080_v17 = vpop.permute.xlu0 %2738 }
 0x2b9   : > { %10799 = vst [vmem:[#allocation77_spill] sm:$0xff] %v9065_v1  ;;  %6096 = vrcp.f32 %v10800_v25  ;;  %3638 = vrot.lane.b32.xlu0 %v3616_v61, %s6440_s23  ;;  %v3575_v45 = vmul.f32 -0.5, %v8692_v4  ;;  %v9075_v27 = vadd.f32 1.0, %v8652_v26  ;;  %v3931_v61 = vmul.f32 %v8568_v46, %v3930_v59  ;;  %10804 = vst [vmem:[#allocation40_spill] sm:$0xff] %v9080_v17 }
 0x2ba   : > { %v6081_v11 = vpop.eup %6080  ;;  %v3571_v5 = vsel %vm3570_vm8, %v3568_v29, %v3565_v15  ;;  %vm3933_vm9 = vcmp.lt.f32.partialorder %v3932_v32, 0.0004427343  ;;  %v3939_v1 = vadd.f32 1.0, %v3938_v7  ;;  %10805 = vst [vmem:[#allocation42_spill] sm:$0xff] %v9087_v63  ;;  %vm3912_vm10 = vcmp.gt.f32.partialorder %v8364_v44, 20.0  ;;  %v10807_v32 = vld [vmem:[#allocation51_spill] sm:$0xff] }
 0x2bb   : > { %10802 = vst [vmem:[#allocation33_spill] sm:$0xff] %v9075_v27  ;;  %v9077_v62 = vpop.eup %6082  ;;  %v3928_v25 = vmul.f32 0.6931472, %v6081_v11  ;;  %v3617_v58 = vsel %vm3477_vm7, %v10801_v36, %v3571_v5  ;;  %6098 = vlog2.f32 %v9075_v27  ;;  %v3941_v15 = vand.u32 2147483647, %v8536_v21  ;;  %v9101_v11 = vpop.permute.xlu1 %2740 }
 0x2bc   : > { %10803 = vst [vmem:[#allocation16_spill] sm:$0xff] %v9077_v62  ;;  %v9082_v34 = vpop.eup %6084  ;;  %v10806_v62 = vld [vmem:[#allocation53_spill] sm:$0xff]  ;;  %3640 = vrot.lane.b32.xlu1 %v3617_v58, %s6440_s23  ;;  %v3576_v5 = vadd.f32 1.0, %v3575_v45  ;;  %v3578_v7 = vand.u32 2147483647, %v8692_v4  ;;  %v3584_v29 = vmul.f32 -0.5, %v8652_v26 }
 0x2bd   : > { %v9089_v2 = vpop.eup %6086  ;;  %6100 = vrcp.f32 %v10806_v62  ;;  %v3934_v46 = vsel %vm3933_vm9, %v3931_v61, %v3928_v25  ;;  %10808 = vst [vmem:[#allocation46_spill] sm:$0xff] %v9101_v11  ;;  %v3940_v61 = vmul.f32 %v8536_v21, %v3939_v1  ;;  %v9108_v45 = vadd.f32 1.0, %v8674_v24 }
 0x2be   : > { %v4052_v59 = vsel %vm3912_vm10, %v8364_v44, %v3934_v46  ;;  %6102 = vlog2.f32 %v9087_v63  ;;  %v3947_v44 = vmul.f32 -0.5, %v8724_v35  ;;  %v10810_v46 = vld [vmem:[#allocation59_spill] sm:$0xff]  ;;  %vm3942_vm12 = vcmp.lt.f32.partialorder %v3941_v15, 0.0004427343 }
 0x2bf   : > { %v6089_v36 = vpop.eup %6088  ;;  %6104 = vrcp.f32 %v10807_v32  ;;  %4066 = vrot.lane.b32.xlu0 %v4052_v59, %s6440_s23  ;;  %10809 = vst [vmem:[#allocation38_spill] sm:$0xff] %v9108_v45  ;;  %v10811_v59 = vld [vmem:[#allocation99_spill] sm:$0xff]  ;;  %v9112_v32 = vpop.permute.xlu0 %2314  ;;  %vm3579_vm13 = vcmp.lt.f32.partialorder %v3578_v7, 0.0004427343  ;;  %v3585_v63 = vadd.f32 1.0, %v3584_v29  ;;  %vm3478_vm14 = vcmp.gt.f32.partialorder %v8548_v33, 20.0 }
 0x2c0   : > { %v9103_v62 = vpop.eup %6090  ;;  %v3937_v25 = vmul.f32 0.6931472, %v6089_v36  ;;  %6106 = vrcp.f32 %v10810_v46  ;;  %vm3913_vm11 = vcmp.gt.f32.partialorder %v10811_v59, 20.0  ;;  %10812 = vst [vmem:[#allocation100_spill] sm:$0xff] %v9112_v32  ;;  %v3577_v36 = vmul.f32 %v8692_v4, %v3576_v5  ;;  %v10814_v29 = vld [vmem:[#allocation54_spill] sm:$0xff] }
 0x2c1   : > { %v6093_v58 = vpop.eup %6092  ;;  %6108 = vlog2.f32 %v9108_v45  ;;  %v9122_v46 = vadd.f32 1.0, %v8789_v9  ;;  %v3956_v5 = vmul.f32 -0.5, %v8674_v24  ;;  %vm3479_vm15 = vcmp.gt.f32.partialorder %v8502_v23, 20.0 }
 0x2c2   : > { %v9114_v27 = vpop.eup %6094  ;;  %v3943_v11 = vsel %vm3942_vm12, %v3940_v61, %v3937_v25  ;;  %v3574_v17 = vmul.f32 0.6931472, %v6093_v58  ;;  %v3587_v25 = vand.u32 2147483647, %v8652_v26  ;;  %v3948_v61 = vadd.f32 1.0, %v3947_v44 }
 0x2c3   : > { %v9118_v21 = vpop.eup %6096  ;;  %v4053_v1 = vsel %vm3913_vm11, %v10811_v59, %v3943_v11  ;;  %10813 = vst [vmem:[#allocation53_spill] sm:$0xff] %v9122_v46  ;;  %6110 = vlog2.f32 %v9122_v46  ;;  %v9130_v11 = vpop.permute.xlu1 %2316  ;;  %v3950_v58 = vand.u32 2147483647, %v8724_v35  ;;  %v3586_v44 = vmul.f32 %v8652_v26, %v3585_v63 }
 0x2c4   : > { %4068 = vrot.lane.b32.xlu1 %v4053_v1, %s6440_s23  ;;  %v3580_v15 = vsel %vm3579_vm13, %v3577_v36, %v3574_v17  ;;  %6112 = vrcp.f32 %v10814_v29  ;;  %v9140_v36 = vadd.f32 1.0, %v8767_v54  ;;  %v9142_v1 = vpop.permute.xlu0 %2742  ;;  %vm3588_vm1 = vcmp.lt.f32.partialorder %v3587_v25, 0.0004427343 }
 0x2c5   : > { %v3618_v4 = vsel %vm3478_vm14, %v8548_v33, %v3580_v15  ;;  %v6099_v7 = vpop.eup %6098  ;;  %v3593_v33 = vmul.f32 -0.5, %v8789_v9  ;;  %v9147_v29 = vadd.f32 1.0, %v8846_v37  ;;  %v3957_v63 = vadd.f32 1.0, %v3956_v5 }
 0x2c6   : > { %3642 = vrot.lane.b32.xlu0 %v3618_v4, %s6440_s23  ;;  %v3583_v17 = vmul.f32 0.6931472, %v6099_v7  ;;  %10815 = vst [vmem:[#allocation51_spill] sm:$0xff] %v9140_v36  ;;  %v3949_v4 = vmul.f32 %v8724_v35, %v3948_v61  ;;  %6114 = vlog2.f32 %v9140_v36  ;;  %vm3951_vm2 = vcmp.lt.f32.partialorder %v3950_v58, 0.0004427343  ;;  %v10817_v35 = vld [vmem:[#allocation124_spill] sm:$0xff] }
 0x2c7   : > { %v9135_v59 = vpop.eup %6100  ;;  %10816 = vst [vmem:[#allocation59_spill] sm:$0xff] %v9147_v29  ;;  %v3959_v32 = vand.u32 2147483647, %v8674_v24  ;;  %6116 = vlog2.f32 %v9147_v29  ;;  %vm3914_vm3 = vcmp.gt.f32.partialorder %v8581_v8, 20.0  ;;  %v9160_v5 = vpop.permute.xlu1 %2744  ;;  %vm3915_vm4 = vcmp.gt.f32.partialorder %v8529_v28, 20.0 }
 0x2c8   : > { %v6103_v15 = vpop.eup %6102  ;;  %v3589_v7 = vsel %vm3588_vm1, %v3586_v44, %v3583_v17  ;;  %6118 = vrcp.f32 %v10817_v35  ;;  %v3594_v17 = vadd.f32 1.0, %v3593_v33  ;;  %v3958_v35 = vmul.f32 %v8674_v24, %v3957_v63 }
 0x2c9   : > { %v9149_v46 = vpop.eup %6104  ;;  %v3946_v26 = vmul.f32 0.6931472, %v6103_v15  ;;  %v3619_v45 = vsel %vm3479_vm15, %v8502_v23, %v3589_v7  ;;  %v10818_v23 = vld [vmem:[#allocation30_spill] sm:$0xff]  ;;  %v3602_v15 = vmul.f32 -0.5, %v8767_v54  ;;  %v3965_v33 = vmul.f32 -0.5, %v8846_v37 }
 0x2ca   : > { %v9155_v25 = vpop.eup %6106  ;;  %3644 = vrot.lane.b32.xlu1 %v3619_v45, %s6440_s23  ;;  %6120 = vrcp.f32 %v10818_v23  ;;  %v3596_v45 = vand.u32 2147483647, %v8789_v9  ;;  %vm3481_vm5 = vcmp.gt.f32.partialorder %v8631_v50, 20.0  ;;  %vm3960_vm6 = vcmp.lt.f32.partialorder %v3959_v32, 0.0004427343  ;;  %v10821_v23 = vld [vmem:[#allocation32_spill] sm:$0xff] }
 0x2cb   : > { %v3952_v61 = vsel %vm3951_vm2, %v3949_v4, %v3946_v26  ;;  %v6109_v44 = vpop.eup %6108  ;;  %v9170_v4 = vpop.permute.xlu0 %2746  ;;  %v10819_v26 = vld [vmem:[#allocation39_spill] sm:$0xff]  ;;  %v3595_v24 = vmul.f32 %v8789_v9, %v3594_v17  ;;  %v9180_v63 = vadd.f32 1.0, %v8888_v42  ;;  %v3603_v32 = vadd.f32 1.0, %v3602_v15 }
 0x2cc   : > { %v4054_v58 = vsel %vm3914_vm3, %v8581_v8, %v3952_v61  ;;  %v3955_v7 = vmul.f32 0.6931472, %v6109_v44  ;;  %6122 = vrcp.f32 %v10819_v26  ;;  %v9175_v8 = vadd.f32 1.0, %v8773_v47  ;;  %v9191_v9 = vpop.permute.xlu1 %2748  ;;  %v10823_v17 = vld [vmem:[#allocation47_spill] sm:$0xff] }
 0x2cd   : > { %4070 = vrot.lane.b32.xlu0 %v4054_v58, %s6440_s23  ;;  %v6111_v61 = vpop.eup %6110  ;;  %6124 = vrcp.f32 %v10821_v23  ;;  %10822 = vst [vmem:[#allocation54_spill] sm:$0xff] %v9180_v63  ;;  %vm3597_vm7 = vcmp.lt.f32.partialorder %v3596_v45, 0.0004427343  ;;  %vm3480_vm8 = vcmp.gt.f32.partialorder %v8668_v20, 20.0  ;;  %vm3916_vm9 = vcmp.gt.f32.partialorder %v8706_v13, 20.0 }
 0x2ce   : > { %10820 = vst [vmem:[#allocation99_spill] sm:$0xff] %v9175_v8  ;;  %v3961_v44 = vsel %vm3960_vm6, %v3958_v35, %v3955_v7  ;;  %v9182_v58 = vpop.eup %6112  ;;  %v3592_v26 = vmul.f32 0.6931472, %v6111_v61  ;;  %6126 = vlog2.f32 %v9175_v8  ;;  %v3605_v7 = vand.u32 2147483647, %v8767_v54  ;;  %v10824_v61 = vld [vmem:[#allocation87_spill] sm:$0xff] }
 0x2cf   : > { %v4055_v36 = vsel %vm3915_vm4, %v8529_v28, %v3961_v44  ;;  %v3966_v35 = vadd.f32 1.0, %v3965_v33  ;;  %6128 = vlog2.f32 %v9180_v63  ;;  %v3968_v28 = vand.u32 2147483647, %v8846_v37  ;;  %v9200_v33 = vpop.permute.xlu0 %2750  ;;  %v10825_v63 = vld [vmem:[#allocation74_spill] sm:$0xff] }
 0x2d0   : > { %4072 = vrot.lane.b32.xlu1 %v4055_v36, %s6440_s23  ;;  %6130 = vrcp.f32 %v10823_v17  ;;  %v3598_v23 = vsel %vm3597_vm7, %v3595_v24, %v3592_v26  ;;  %v6115_v15 = vpop.eup %6114  ;;  %v3974_v45 = vmul.f32 -0.5, %v8773_v47  ;;  %v3604_v24 = vmul.f32 %v8767_v54, %v3603_v32 }
 0x2d1   : > { %6132 = vrcp.f32 %v10824_v61  ;;  %v3620_v36 = vsel %vm3480_vm8, %v8668_v20, %v3598_v23  ;;  %v6117_v44 = vpop.eup %6116  ;;  %v3601_v17 = vmul.f32 0.6931472, %v6115_v15  ;;  %v3983_v26 = vmul.f32 -0.5, %v8888_v42 }
 0x2d2   : > { %6134 = vrcp.f32 %v10825_v63  ;;  %3646 = vrot.lane.b32.xlu0 %v3620_v36, %s6440_s23  ;;  %v9206_v8 = vpop.eup %6118  ;;  %vm3917_vm10 = vcmp.gt.f32.partialorder %v8645_v19, 20.0  ;;  %vm3606_vm11 = vcmp.lt.f32.partialorder %v3605_v7, 0.0004427343  ;;  %v3964_v20 = vmul.f32 0.6931472, %v6117_v44  ;;  %v10827_v63 = vld [vmem:[#allocation94_spill] sm:$0xff] }
 0x2d3   : > { %v3967_v23 = vmul.f32 %v8846_v37, %v3966_v35  ;;  %v9211_v61 = vadd.f32 1.0, %v8870_v52  ;;  %6136 = vrcp.f32 %v10827_v63  ;;  %v3607_v15 = vsel %vm3606_vm11, %v3604_v24, %v3601_v17  ;;  %v9223_v37 = vpop.permute.xlu1 %2752 }
 0x2d4   : > { %v9213_v29 = vpop.eup %6120  ;;  %vm3969_vm12 = vcmp.lt.f32.partialorder %v3968_v28, 0.0004427343  ;;  %v9217_v54 = vadd.f32 1.0, %v8974_v10  ;;  %v3621_v32 = vsel %vm3481_vm5, %v8631_v50, %v3607_v15  ;;  %v3975_v36 = vadd.f32 1.0, %v3974_v45  ;;  %10829 = vst [vmem:[#allocation39_spill] sm:$0xff] %v9223_v37  ;;  %v10830_v45 = vld [vmem:[#allocation138_spill] sm:$0xff] }
 0x2d5   : > { %10826 = vst [vmem:[#allocation124_spill] sm:$0xff] %v9211_v61  ;;  %v3970_v7 = vsel %vm3969_vm12, %v3967_v23, %v3964_v20  ;;  %6138 = vlog2.f32 %v9211_v61  ;;  %3648 = vrot.lane.b32.xlu1 %v3621_v32, %s6440_s23  ;;  %v3977_v44 = vand.u32 2147483647, %v8773_v47  ;;  %v3984_v17 = vadd.f32 1.0, %v3983_v26  ;;  %v10831_v20 = vld [vmem:[#allocation75_spill] sm:$0xff]  ;;  %v10833_v26 = vld [vmem:[#allocation14_spill] sm:$0xff] }
 0x2d6   : > { %10828 = vst [vmem:[#allocation30_spill] sm:$0xff] %v9217_v54  ;;  %v9225_v35 = vpop.eup %6122  ;;  %v4056_v28 = vsel %vm3916_vm9, %v8706_v13, %v3970_v7  ;;  %6140 = vlog2.f32 %v9217_v54  ;;  %vm3918_vm13 = vcmp.gt.f32.partialorder %v8752_v31, 20.0  ;;  %v9238_v24 = vmul.f32 %v9012_v49, %v10830_v45  ;;  %v9243_v13 = vpop.permute.xlu0 %3178  ;;  %v10834_v32 = vld [vmem:[#allocation83_spill] sm:$0xff] }
 0x2d7   : > { %v9233_v50 = vpop.eup %6124  ;;  %6142 = vrcp.f32 %v10831_v20  ;;  %4074 = vrot.lane.b32.xlu0 %v4056_v28, %s6440_s23  ;;  %v3986_v23 = vand.u32 2147483647, %v8888_v42  ;;  %10832 = vst [vmem:[#allocation32_spill] sm:$0xff] %v9243_v13  ;;  %v9247_v15 = vmul.f32 %v9028_v0, %v10833_v26  ;;  %v3992_v7 = vmul.f32 -0.5, %v8870_v52  ;;  %v10836_v20 = vld [vmem:[#allocation12_spill] sm:$0xff] }
 0x2d8   : > { %v6127_v63 = vpop.eup %6126  ;;  %6144 = vrcp.f32 %v10834_v32  ;;  %v9252_v49 = vadd.f32 1.0, %v8920_v43  ;;  %v3976_v54 = vmul.f32 %v8773_v47, %v3975_v36  ;;  %v4001_v61 = vmul.f32 -0.5, %v8974_v10 }
 0x2d9   : > { %v6129_v45 = vpop.eup %6128  ;;  %6146 = vrcp.f32 %v10836_v20  ;;  %v3973_v28 = vmul.f32 0.6931472, %v6127_v63  ;;  %vm3919_vm14 = vcmp.gt.f32.partialorder %v8744_v6, 20.0  ;;  %vm3978_vm15 = vcmp.lt.f32.partialorder %v3977_v44, 0.0004427343  ;;  %v9269_v63 = vpop.permute.xlu1 %3180  ;;  %v10839_v44 = vld [vmem:[#allocation37_spill] sm:$0xff] }
 0x2da   : > { %10835 = vst [vmem:[#allocation47_spill] sm:$0xff] %v9252_v49  ;;  %v9257_v13 = vpop.eup %6130  ;;  %v3982_v0 = vmul.f32 0.6931472, %v6129_v45  ;;  %v3985_v26 = vmul.f32 %v8888_v42, %v3984_v17  ;;  %6148 = vlog2.f32 %v9252_v49  ;;  %vm3920_vm1 = vcmp.gt.f32.partialorder %v8835_v57, 20.0  ;;  %10838 = vst [vmem:[#allocation74_spill] sm:$0xff] %v9269_v63  ;;  %v9283_v49 = vpop.permute.xlu0 %2754  ;;  %v10841_v63 = vld [vmem:[#allocation142_spill] sm:$0xff] }
 0x2db   : > { %v9262_v32 = vpop.eup %6132  ;;  %v3979_v20 = vsel %vm3978_vm15, %v3976_v54, %v3973_v28  ;;  %vm3987_vm2 = vcmp.lt.f32.partialorder %v3986_v23, 0.0004427343  ;;  %v3995_v47 = vand.u32 2147483647, %v8870_v52  ;;  %v9267_v36 = vadd.f32 1.0, %v9000_v12  ;;  %10840 = vst [vmem:[#allocation94_spill] sm:$0xff] %v9283_v49 }
 0x2dc   : > { %v9271_v37 = vpop.eup %6134  ;;  %6150 = vrcp.f32 %v10839_v44  ;;  %v4057_v42 = vsel %vm3917_vm10, %v8645_v19, %v3979_v20  ;;  %v3988_v17 = vsel %vm3987_vm2, %v3985_v26, %v3982_v0  ;;  %v3993_v45 = vadd.f32 1.0, %v3992_v7  ;;  %v10842_v7 = vld [vmem:[#allocation109_spill] sm:$0xff] }
 0x2dd   : > { %10837 = vst [vmem:[#allocation87_spill] sm:$0xff] %v9267_v36  ;;  %4076 = vrot.lane.b32.xlu1 %v4057_v42, %s6440_s23  ;;  %v4058_v54 = vsel %vm3918_vm13, %v8752_v31, %v3988_v17  ;;  %v4002_v23 = vadd.f32 1.0, %v4001_v61  ;;  %v4010_v28 = vmul.f32 -0.5, %v8920_v43  ;;  %6152 = vlog2.f32 %v9267_v36  ;;  %v9285_v44 = vpop.eup %6136  ;;  %v10843_v26 = vld [vmem:[#allocation45_spill] sm:$0xff]  ;;  %v10844_v42 = vld [vmem:[#allocation95_spill] sm:$0xff] }
 0x2de   : > { %v9289_v19 = vmul.f32 %v9034_v3, %v10841_v63  ;;  %v9293_v0 = vmul.f32 %v9058_v48, %v10842_v7  ;;  %6154 = vrcp.f32 %v10843_v26  ;;  %4078 = vrot.lane.b32.xlu0 %v4058_v54, %s6440_s23  ;;  %v4004_v31 = vand.u32 2147483647, %v8974_v10 }
 0x2df   : > { %v6139_v61 = vpop.eup %6138  ;;  %vm3921_vm3 = vcmp.gt.f32.partialorder %v8793_v56, 20.0  ;;  %v1434_v20 = vmul.f32 %v9114_v27, %v8534_v18  ;;  %6156 = vrcp.f32 %v10844_v42  ;;  %vm9302_vm4 = vcmp.lt.f32.partialorder %v3995_v47, 0.0004427343  ;;  %v9318_v42 = vpop.permute.xlu1 %2756 }
 0x2e0   : > { %v9307_v48 = vadd.f32 1.0, %v8996_v16  ;;  %v6141_v63 = vpop.eup %6140  ;;  %v3991_v17 = vmul.f32 0.6931472, %v6139_v61  ;;  %v3994_v54 = vmul.f32 %v8870_v52, %v3993_v45  ;;  %v4019_v7 = vmul.f32 -0.5, %v9000_v12 }
 0x2e1   : > { %v9312_v26 = vadd.f32 1.0, %v8990_v51  ;;  %v9314_v36 = vpop.eup %6142  ;;  %v4000_v18 = vmul.f32 0.6931472, %v6141_v63  ;;  %v4003_v27 = vmul.f32 %v8974_v10, %v4002_v23  ;;  %v4011_v47 = vadd.f32 1.0, %v4010_v28  ;;  %v10848_v23 = vld [vmem:[#allocation15_spill] sm:$0xff]  ;;  %v9337_v3 = vpop.permute.xlu0 %3182 }
 0x2e2   : > { %6158 = vlog2.f32 %v9307_v48  ;;  %v9320_v49 = vpop.eup %6144  ;;  %vm3922_vm5 = vcmp.gt.f32.partialorder %v8885_v30, 20.0  ;;  %v3997_v52 = vsel %vm9302_vm4, %v3994_v54, %v3991_v17  ;;  %vm4005_vm6 = vcmp.lt.f32.partialorder %v4004_v31, 0.0004427343 }
 0x2e3   : > { %10847 = vst [vmem:[#allocation138_spill] sm:$0xff] %v9312_v26  ;;  %v4013_v45 = vand.u32 2147483647, %v8920_v43  ;;  %6160 = vlog2.f32 %v9312_v26  ;;  %v9327_v61 = vpop.eup %6146  ;;  %v9331_v10 = vmul.f32 %v9082_v34, %v8470_v53  ;;  %v4059_v28 = vsel %vm3919_vm14, %v8744_v6, %v3997_v52 }
 0x2e4   : > { %6162 = vrcp.f32 %v10848_v23  ;;  %v4006_v63 = vsel %vm4005_vm6, %v4003_v27, %v4000_v18  ;;  %v6149_v31 = vpop.eup %6148  ;;  %4080 = vrot.lane.b32.xlu1 %v4059_v28, %s6440_s23  ;;  %v4020_v54 = vadd.f32 1.0, %v4019_v7  ;;  %v4022_v53 = vand.u32 2147483647, %v9000_v12  ;;  %v10850_v28 = vld [vmem:[#allocation52_spill] sm:$0xff] }
 0x2e5   : > { %v4060_v17 = vsel %vm3920_vm1, %v8835_v57, %v4006_v63  ;;  %v4028_v34 = vmul.f32 -0.5, %v8996_v16  ;;  %v4009_v23 = vmul.f32 0.6931472, %v6149_v31  ;;  %v4012_v6 = vmul.f32 %v8920_v43, %v4011_v47  ;;  %v10851_v63 = vld [vmem:[#allocation125_spill] sm:$0xff] }
 0x2e6   : > { %4082 = vrot.lane.b32.xlu0 %v4060_v17, %s6440_s23  ;;  %v4037_v18 = vmul.f32 -0.5, %v8990_v51  ;;  %v9349_v27 = vadd.f32 1.0, %v8964_v55  ;;  %v9351_v52 = vpop.eup %6150  ;;  %vm3923_vm7 = vcmp.gt.f32.partialorder %v8881_v40, 20.0  ;;  %v9356_v57 = vmul.f32 %v9103_v62, %v8523_v39  ;;  %v9368_v39 = vpop.permute.xlu1 %3184 }
 0x2e7   : > { %v9359_v7 = vadd.f32 %v1434_v20, %v9238_v24  ;;  %6164 = vrcp.f32 %v10850_v28  ;;  %vm4014_vm8 = vcmp.lt.f32.partialorder %v4013_v45, 0.0004427343  ;;  %v6153_v43 = vpop.eup %6152  ;;  %vm3924_vm9 = vcmp.gt.f32.partialorder %v8862_v22, 20.0 }
 0x2e8   : > { %10849 = vst [vmem:[#allocation75_spill] sm:$0xff] %v9349_v27  ;;  %v1435_v47 = vmul.f32 %v9118_v21, %v8556_v14  ;;  %v1436_v31 = vmul.f32 %v9135_v59, %v10851_v63  ;;  %v4015_v17 = vsel %vm4014_vm8, %v4012_v6, %v4009_v23  ;;  %6166 = vlog2.f32 %v9349_v27  ;;  %v9370_v62 = vpop.eup %6154  ;;  %v10852_v14 = vld [vmem:[#allocation135_spill] sm:$0xff]  ;;  %v9379_v23 = vpop.permute.xlu0 %2758  ;;  %v10853_v6 = vld [vmem:[#allocation136_spill] sm:$0xff] }
 0x2e9   : > { %v4061_v24 = vsel %vm3921_vm3, %v8793_v56, %v4015_v17  ;;  %v4018_v20 = vmul.f32 0.6931472, %v6153_v43  ;;  %v4021_v45 = vmul.f32 %v9000_v12, %v4020_v54  ;;  %v4029_v28 = vadd.f32 1.0, %v4028_v34  ;;  %v6157_v26 = vpop.eup %6156  ;;  %v10854_v17 = vld [vmem:[#allocation139_spill] sm:$0xff] }
 0x2ea   : > { %6168 = vrcp.f32 %v10852_v14  ;;  %4084 = vrot.lane.b32.xlu1 %v4061_v24, %s6440_s23  ;;  %vm4023_vm10 = vcmp.lt.f32.partialorder %v4022_v53, 0.0004427343  ;;  %v4031_v21 = vand.u32 2147483647, %v8996_v16  ;;  %v4038_v59 = vadd.f32 1.0, %v4037_v18  ;;  %v10855_v24 = vld [vmem:[#allocation22_spill] sm:$0xff] }
 0x2eb   : > { %6170 = vrcp.f32 %v10853_v6  ;;  %v4024_v63 = vsel %vm4023_vm10, %v4021_v45, %v4018_v20  ;;  %v4040_v56 = vand.u32 2147483647, %v8990_v51  ;;  %v4046_v43 = vmul.f32 -0.5, %v8964_v55  ;;  %v10856_v14 = vld [vmem:[#allocation105_spill] sm:$0xff] }
 0x2ec   : > { %v6159_v12 = vpop.eup %6158  ;;  %v1449_v54 = vadd.f32 %v1435_v47, %v9247_v15  ;;  %v1450_v34 = vadd.f32 %v1436_v31, %v9289_v19  ;;  %6172 = vrcp.f32 %v10854_v17  ;;  %v4062_v53 = vsel %vm3922_vm5, %v8885_v30, %v4024_v63  ;;  %v10857_v15 = vld [vmem:[#allocation149_spill] sm:$0xff]  ;;  %v10858_v17 = vld [vmem:[#allocation23_spill] sm:$0xff]  ;;  %v9398_v30 = vpop.permute.xlu1 %2760 }
 0x2ed   : > { %v6161_v18 = vpop.eup %6160  ;;  %vm3925_vm11 = vcmp.gt.f32.partialorder %v10855_v24, 20.0  ;;  %v1438_v20 = vmul.f32 %v9155_v25, %v10856_v14  ;;  %4086 = vrot.lane.b32.xlu0 %v4062_v53, %s6440_s23  ;;  %v4027_v45 = vmul.f32 0.6931472, %v6159_v12  ;;  %v4030_v6 = vmul.f32 %v8996_v16, %v4029_v28  ;;  %v10859_v25 = vld [vmem:[#allocation122_spill] sm:$0xff] }
 0x2ee   : > { %6174 = vrcp.f32 %v10857_v15  ;;  %v6163_v19 = vpop.eup %6162  ;;  %vm4032_vm12 = vcmp.lt.f32.partialorder %v4031_v21, 0.0004427343  ;;  %v4036_v47 = vmul.f32 0.6931472, %v6161_v18  ;;  %v4039_v31 = vmul.f32 %v8990_v51, %v4038_v59  ;;  %v10860_v21 = vld [vmem:[#allocation24_spill] sm:$0xff]  ;;  %v9406_v53 = vpop.permute.xlu0 %3186  ;;  %v10861_v18 = vld [vmem:[#allocation10_spill] sm:$0xff] }
 0x2ef   : > { %6176 = vrcp.f32 %v10858_v17  ;;  %v4033_v63 = vsel %vm4032_vm12, %v4030_v6, %v4027_v45  ;;  %vm4041_vm13 = vcmp.lt.f32.partialorder %v4040_v56, 0.0004427343  ;;  %v4047_v27 = vadd.f32 1.0, %v4046_v43  ;;  %v10862_v43 = vld [vmem:[#allocation140_spill] sm:$0xff]  ;;  %v10863_v45 = vld [vmem:[#allocation130_spill] sm:$0xff] }
 0x2f0   : > { %6178 = vrcp.f32 %v10859_v25  ;;  %v4063_v16 = vsel %vm3923_vm7, %v8881_v40, %v4033_v63  ;;  %v4042_v28 = vsel %vm4041_vm13, %v4039_v31, %v4036_v47  ;;  %v4049_v12 = vand.u32 2147483647, %v8964_v55  ;;  %v10864_v15 = vld [vmem:[#allocation36_spill] sm:$0xff]  ;;  %v10867_v31 = vld [vmem:[#allocation19_spill] sm:$0xff]  ;;  %v10868_v25 = vld [vmem:[#allocation58_spill] sm:$0xff] }
 0x2f1   : > { %6180 = vrcp.f32 %v10860_v21  ;;  %v6165_v51 = vpop.eup %6164  ;;  %v1452_v59 = vadd.f32 %v1438_v20, %v9293_v0  ;;  %v1443_v56 = vmul.f32 %v9233_v50, %v10861_v18  ;;  %4088 = vrot.lane.b32.xlu1 %v4063_v16, %s6440_s23  ;;  %v4064_v40 = vsel %vm3924_vm9, %v8862_v22, %v4042_v28  ;;  %v10865_v0 = vld [vmem:[#allocation131_spill] sm:$0xff]  ;;  %v10866_v50 = vld [vmem:[#allocation82_spill] sm:$0xff]  ;;  %v10869_v16 = vld [vmem:[#allocation57_spill] sm:$0xff] }
 0x2f2   : > { %6182 = vrcp.f32 %v10862_v43  ;;  %v6167_v14 = vpop.eup %6166  ;;  %v9418_v6 = vmul.f32 %v9213_v29, %v10863_v45  ;;  %v1878_v47 = vmul.f32 %v9257_v13, %v10864_v15  ;;  %v1879_v20 = vmul.f32 %v9262_v32, %v10865_v0  ;;  %4090 = vrot.lane.b32.xlu0 %v4064_v40, %s6440_s23  ;;  %v10870_v21 = vld [vmem:[#allocation110_spill] sm:$0xff]  ;;  %v9434_v32 = vpop.permute.xlu1 %3188  ;;  %v10875_v0 = vld [vmem:[#allocation63_spill] sm:$0xff] }
 0x2f3   : > { %6184 = vrcp.f32 %v10866_v50  ;;  %v1880_v17 = vmul.f32 %v9271_v37, %v10867_v31  ;;  %v4045_v63 = vmul.f32 0.6931472, %v6167_v14  ;;  %v4048_v22 = vmul.f32 %v8964_v55, %v4047_v27  ;;  %v10871_v27 = vld [vmem:[#allocation117_spill] sm:$0xff]  ;;  %v10876_v31 = vld [vmem:[#allocation28_spill] sm:$0xff] }
 0x2f4   : > { %6186 = vrcp.f32 %v10868_v25  ;;  %v6169_v29 = vpop.eup %6168  ;;  %v1882_v28 = vmul.f32 %v9314_v36, %v10869_v16  ;;  %v1887_v13 = vmul.f32 %v6157_v26, %v8933_v41  ;;  %vm4050_vm14 = vcmp.lt.f32.partialorder %v4049_v12, 0.0004427343  ;;  %v10872_v36 = vld [vmem:[#allocation137_spill] sm:$0xff] }
 0x2f5   : > { %6188 = vrcp.f32 %v10870_v21  ;;  %v9436_v18 = vpop.eup %6170  ;;  %v1457_v37 = vadd.f32 %v1443_v56, %v9356_v57  ;;  %v2322_v43 = vmul.f32 %v6163_v19, %v8941_v60  ;;  %v4051_v55 = vsel %vm4050_vm14, %v4048_v22, %v4045_v63  ;;  %v10873_v26 = vld [vmem:[#allocation25_spill] sm:$0xff]  ;;  %v9447_v12 = vpop.permute.xlu0 %3190  ;;  %v10874_v60 = vld [vmem:[#allocation91_spill] sm:$0xff] }
 0x2f6   : > { %6190 = vrcp.f32 %v10871_v27  ;;  %v6173_v40 = vpop.eup %6172  ;;  %v1892_v14 = vadd.f32 %v1878_v47, %v9359_v7  ;;  %v2323_v45 = vmul.f32 %v6165_v51, %v10872_v36  ;;  %v4065_v41 = vsel %vm3925_vm11, %v10855_v24, %v4051_v55  ;;  %v10877_v22 = vld [vmem:[#allocation13_spill] sm:$0xff]  ;;  %v10881_v55 = vld [vmem:[#allocation72_spill] sm:$0xff] }
 0x2f7   : > { %6192 = vrcp.f32 %v10873_v26  ;;  %v1893_v57 = vadd.f32 %v1879_v20, %v1449_v54  ;;  %v1894_v56 = vadd.f32 %v1880_v17, %v1450_v34  ;;  %v2324_v19 = vmul.f32 %v6169_v29, %v10874_v60  ;;  %4092 = vrot.lane.b32.xlu1 %v4065_v41, %s6440_s23  ;;  %v10878_v34 = vld [vmem:[#allocation128_spill] sm:$0xff]  ;;  %v10885_v60 = vld [vmem:[#allocation103_spill] sm:$0xff] }
 0x2f8   : > { %v6175_v15 = vpop.eup %6174  ;;  %6194 = vrcp.f32 %v10875_v0  ;;  %v1896_v47 = vadd.f32 %v1882_v28, %v1452_v59  ;;  %v1901_v51 = vadd.f32 %v1887_v13, %v1457_v37  ;;  %v2336_v63 = vadd.f32 %v2322_v43, %v1892_v14  ;;  %v10879_v59 = vld [vmem:[#allocation106_spill] sm:$0xff]  ;;  %v10883_v36 = vld [vmem:[#allocation80_spill] sm:$0xff] }
 0x2f9   : > { %v6177_v7 = vpop.eup %6176  ;;  %v2331_v50 = vmul.f32 %v6175_v15, %v9130_v11  ;;  %6196 = vrcp.f32 %v10876_v31  ;;  %v2326_v25 = vmul.f32 %v6173_v40, %v10877_v22  ;;  %v2337_v17 = vadd.f32 %v2323_v45, %v1893_v57  ;;  %v9461_v28 = vpop.permute.xlu1 %3192  ;;  %v10880_v43 = vld [vmem:[#allocation62_spill] sm:$0xff]  ;;  %v10882_v40 = vld [vmem:[#allocation116_spill] sm:$0xff] }
 0x2fa   : > { %v6179_v24 = vpop.eup %6178  ;;  %v2766_v54 = vmul.f32 %v6177_v7, %v9142_v1  ;;  %6198 = vrcp.f32 %v10878_v34  ;;  %v2338_v13 = vadd.f32 %v2324_v19, %v1894_v56  ;;  %v1442_v27 = vmul.f32 %v9225_v35, %v10881_v55  ;;  %v10884_v57 = vld [vmem:[#allocation76_spill] sm:$0xff] }
 0x2fb   : > { %v6181_v20 = vpop.eup %6180  ;;  %v9457_v29 = vadd.f32 %v2331_v50, %v1901_v51  ;;  %v2767_v16 = vmul.f32 %v6179_v24, %v9160_v5  ;;  %6200 = vrcp.f32 %v10879_v59  ;;  %v1885_v14 = vmul.f32 %v9351_v52, %v10882_v40  ;;  %v10886_v0 = vld [vmem:[#allocation108_spill] sm:$0xff]  ;;  %v10887_v51 = vld [vmem:[#allocation123_spill] sm:$0xff]  ;;  %v10888_v50 = vld [vmem:[#allocation93_spill] sm:$0xff] }
 0x2fc   : > { %v6183_v11 = vpop.eup %6182  ;;  %v9463_v21 = vadd.f32 %v2766_v54, %v2336_v63  ;;  %v2768_v37 = vmul.f32 %v6181_v20, %v9170_v4  ;;  %6202 = vrcp.f32 %v10880_v43  ;;  %v9474_v45 = vpop.permute.xlu0 %3194  ;;  %v2340_v26 = vadd.f32 %v2326_v25, %v1896_v47  ;;  %v10889_v24 = vld [vmem:[#allocation132_spill] sm:$0xff]  ;;  %v10893_v54 = vld [vmem:[#allocation90_spill] sm:$0xff]  ;;  %v10899_v40 = vld [vmem:[#allocation81_spill] sm:$0xff] }
 0x2fd   : > { %v6185_v1 = vpop.eup %6184  ;;  %v9471_v5 = vadd.f32 %v2767_v16, %v2337_v17  ;;  %6204 = vrcp.f32 %v10883_v36  ;;  %v998_v35 = vmul.f32 %v9089_v2, %v10885_v60  ;;  %v1455_v52 = vadd.f32 %v9418_v6, %v9331_v10  ;;  %v10890_v2 = vld [vmem:[#allocation144_spill] sm:$0xff]  ;;  %v10892_v10 = vld [vmem:[#allocation127_spill] sm:$0xff]  ;;  %v10895_v17 = vld [vmem:[#allocation77_spill] sm:$0xff] }
 0x2fe   : > { %v6187_v41 = vpop.eup %6186  ;;  %v9476_v15 = vadd.f32 %v2768_v37, %v2338_v13  ;;  %v2770_v4 = vmul.f32 %v6185_v1, %v9200_v33  ;;  %6206 = vrcp.f32 %v10884_v57  ;;  %v1437_v47 = vmul.f32 %v9149_v46, %v10887_v51  ;;  %v10891_v22 = vld [vmem:[#allocation64_spill] sm:$0xff]  ;;  %v10894_v46 = vld [vmem:[#allocation18_spill] sm:$0xff] }
 0x2ff   : > { %v6189_v56 = vpop.eup %6188  ;;  %v2329_v19 = vmul.f32 %v6187_v41, %v9070_v38  ;;  %6208 = vrcp.f32 %v10886_v0  ;;  %v1886_v33 = vmul.f32 %v9370_v62, %v10888_v50  ;;  %v993_v25 = vmul.f32 %v10891_v22, %v10890_v2  ;;  %v10896_v59 = vld [vmem:[#allocation100_spill] sm:$0xff]  ;;  %v10897_v37 = vld [vmem:[#allocation78_spill] sm:$0xff] }
 0x300   : > { %v6191_v7 = vpop.eup %6190  ;;  %v9490_v31 = vadd.f32 %v2770_v4, %v2340_v26  ;;  %6210 = vrcp.f32 %v10889_v24  ;;  %v1439_v38 = vmul.f32 %v9182_v58, %v10892_v10  ;;  %v1899_v6 = vadd.f32 %v1885_v14, %v1455_v52  ;;  %v3197_v34 = vpop.permute.xlu1 %3196  ;;  %v10898_v1 = vld [vmem:[#allocation84_spill] sm:$0xff]  ;;  %v10900_v4 = vld [vmem:[#allocation150_spill] sm:$0xff]  ;;  %v10905_v24 = vld [vmem:[#allocation43_spill] sm:$0xff] }
 0x301   : > { %v6193_v63 = vpop.eup %6192  ;;  %6212 = vrcp.f32 %v10893_v54  ;;  %v995_v16 = vmul.f32 %v10895_v17, %v10894_v46  ;;  %v1456_v62 = vadd.f32 %v1442_v27, %v998_v35  ;;  %v2330_v13 = vmul.f32 %v6191_v7, %v10896_v59  ;;  %v9507_v41 = vpop.permute.xlu0 %3622  ;;  %v10901_v57 = vld [vmem:[#allocation16_spill] sm:$0xff]  ;;  %v10902_v35 = vld [vmem:[#allocation67_spill] sm:$0xff] }
 0x302   : > { %v6195_v20 = vpop.eup %6194  ;;  %6214 = vrcp.f32 %v10897_v37  ;;  %v1440_v55 = vmul.f32 %v9206_v8, %v10898_v1  ;;  %v1881_v58 = vmul.f32 %v9285_v44, %v10899_v40  ;;  %v2343_v14 = vadd.f32 %v2329_v19, %v1899_v6  ;;  %v10903_v8 = vld [vmem:[#allocation35_spill] sm:$0xff]  ;;  %v10904_v19 = vld [vmem:[#allocation60_spill] sm:$0xff] }
 0x303   : > { %v6197_v43 = vpop.eup %6196  ;;  %v2773_v36 = vmul.f32 %v6195_v20, %v9318_v42  ;;  %v996_v27 = vmul.f32 %v10901_v57, %v10900_v4  ;;  %v1451_v60 = vadd.f32 %v1437_v47, %v993_v25  ;;  %v1883_v52 = vmul.f32 %v9320_v49, %v10902_v35  ;;  %v10906_v6 = vld [vmem:[#allocation115_spill] sm:$0xff]  ;;  %v10907_v46 = vld [vmem:[#allocation152_spill] sm:$0xff]  ;;  %v10911_v57 = vld [vmem:[#allocation94_spill] sm:$0xff] }
 0x304   : > { %v6199_v26 = vpop.eup %6198  ;;  %v1900_v0 = vadd.f32 %v1886_v33, %v1456_v62  ;;  %v1453_v51 = vadd.f32 %v1439_v38, %v995_v16  ;;  %v2325_v50 = vmul.f32 %v9436_v18, %v10903_v8  ;;  %6216 = vrcp.f32 %v10904_v19  ;;  %v10908_v59 = vld [vmem:[#allocation39_spill] sm:$0xff] }
 0x305   : > { %v6201_v7 = vpop.eup %6200  ;;  %v2787_v44 = vadd.f32 %v2773_v36, %v2343_v14  ;;  %v2327_v2 = vmul.f32 %v6183_v11, %v10905_v24  ;;  %6218 = vrcp.f32 %v10906_v6  ;;  %v1454_v25 = vadd.f32 %v1440_v55, %v996_v27  ;;  %v10909_v55 = vld [vmem:[#allocation98_spill] sm:$0xff]  ;;  %v10915_v6 = vld [vmem:[#allocation29_spill] sm:$0xff] }
 0x306   : > { %v6203_v42 = vpop.eup %6202  ;;  %v2344_v22 = vadd.f32 %v2330_v13, %v1900_v0  ;;  %v2774_v10 = vmul.f32 %v6201_v7, %v9379_v23  ;;  %v1895_v49 = vadd.f32 %v1881_v58, %v1451_v60  ;;  %v2769_v33 = vmul.f32 %v6193_v63, %v9191_v9 }
 0x307   : > { %v6205_v47 = vpop.eup %6204  ;;  %v2775_v38 = vmul.f32 %v6203_v42, %v9398_v30  ;;  %v9521_v54 = vpop.permute.xlu1 %3624  ;;  %v1897_v20 = vadd.f32 %v1883_v52, %v1453_v51  ;;  %v1884_v17 = vmul.f32 %v9327_v61, %v10907_v46  ;;  %v2771_v13 = vmul.f32 %v6197_v43, %v10908_v59  ;;  %v10923_v59 = vld [vmem:[#allocation55_spill] sm:$0xff] }
 0x308   : > { %v6207_v18 = vpop.eup %6206  ;;  %v2788_v11 = vadd.f32 %v2774_v10, %v2344_v22  ;;  %v3210_v16 = vmul.f32 %v6205_v47, %v9406_v53  ;;  %v2339_v62 = vadd.f32 %v2325_v50, %v1895_v49  ;;  %v2328_v40 = vmul.f32 %v6189_v56, %v10909_v55  ;;  %v10914_v10 = vld [vmem:[#allocation27_spill] sm:$0xff]  ;;  %v10916_v49 = vld [vmem:[#allocation68_spill] sm:$0xff] }
 0x309   : > { %v6209_v23 = vpop.eup %6208  ;;  %v2789_v37 = vadd.f32 %v2775_v38, %v9457_v29  ;;  %v3211_v9 = vmul.f32 %v6207_v18, %v9434_v32  ;;  %v3199_v63 = vpop.permute.xlu0 %3198  ;;  %v2341_v1 = vadd.f32 %v2327_v2, %v1897_v20  ;;  %v10910_v29 = vld [vmem:[#allocation118_spill] sm:$0xff]  ;;  %v1898_v4 = vadd.f32 %v1884_v17, %v1454_v25  ;;  %v10913_v2 = vld [vmem:[#allocation21_spill] sm:$0xff] }
 0x30a   : > { %v6211_v30 = vpop.eup %6210  ;;  %v9531_v58 = vadd.f32 %v3210_v16, %v9463_v21  ;;  %v3212_v61 = vmul.f32 %v6209_v23, %v9447_v12  ;;  %v2783_v53 = vadd.f32 %v2769_v33, %v2339_v62  ;;  %6220 = vrcp.f32 %v10910_v29  ;;  %v10917_v38 = vld [vmem:[#allocation34_spill] sm:$0xff]  ;;  %v10918_v18 = vld [vmem:[#allocation121_spill] sm:$0xff]  ;;  %v10922_v23 = vld [vmem:[#allocation48_spill] sm:$0xff] }
 0x30b   : > { %v6213_v14 = vpop.eup %6212  ;;  %v9535_v36 = vadd.f32 %v3211_v9, %v9471_v5  ;;  %v3213_v43 = vmul.f32 %v6211_v30, %v9461_v28  ;;  %v2772_v27 = vmul.f32 %v6199_v26, %v10911_v57  ;;  %v2785_v60 = vadd.f32 %v2771_v13, %v2341_v1  ;;  %v10912_v26 = vld [vmem:[#allocation8_spill] sm:$0xff]  ;;  %v10919_v20 = vld [vmem:[#allocation69_spill] sm:$0xff]  ;;  %v10920_v17 = vld [vmem:[#allocation86_spill] sm:$0xff] }
 0x30c   : > { %v6215_v32 = vpop.eup %6214  ;;  %v9541_v56 = vadd.f32 %v3212_v61, %v9476_v15  ;;  %v3214_v21 = vmul.f32 %v6213_v14, %v9474_v45  ;;  %v2342_v5 = vadd.f32 %v2328_v40, %v1898_v4  ;;  %6222 = vrcp.f32 %v10912_v26  ;;  %v10921_v16 = vld [vmem:[#allocation89_spill] sm:$0xff]  ;;  %v10924_v9 = vld [vmem:[#allocation102_spill] sm:$0xff]  ;;  %v10925_v30 = vld [vmem:[#allocation88_spill] sm:$0xff] }
 0x30d   : > { %v9544_v12 = vadd.f32 %v3213_v43, %v2783_v53  ;;  %v3215_v35 = vmul.f32 %v6215_v32, %v3197_v34  ;;  %6224 = vrcp.f32 %v10913_v2  ;;  %v10926_v1 = vld [vmem:[#allocation112_spill] sm:$0xff]  ;;  %v10927_v40 = vld [vmem:[#allocation146_spill] sm:$0xff]  ;;  %v10928_v14 = vld [vmem:[#allocation143_spill] sm:$0xff] }
 0x30e   : > { %v3201_v52 = vpop.permute.xlu1 %3200  ;;  %v9547_v0 = vadd.f32 %v3214_v21, %v9490_v31  ;;  %v6217_v28 = vpop.eup %6216  ;;  %v2786_v8 = vadd.f32 %v2772_v27, %v2342_v5  ;;  %6226 = vrcp.f32 %v10914_v10  ;;  %v10929_v29 = vld [vmem:[#allocation31_spill] sm:$0xff]  ;;  %v10930_v57 = vld [vmem:[#allocation97_spill] sm:$0xff]  ;;  %v10931_v21 = vld [vmem:[#allocation70_spill] sm:$0xff] }
 0x30f   : > { %v9549_v7 = vadd.f32 %v3215_v35, %v2785_v60  ;;  %v6219_v15 = vpop.eup %6218  ;;  %v3216_v50 = vmul.f32 %v6217_v28, %v3199_v63  ;;  %6228 = vrcp.f32 %v10915_v6  ;;  %v10932_v35 = vld [vmem:[#allocation104_spill] sm:$0xff]  ;;  %v10937_v2 = vld [vmem:[#allocation126_spill] sm:$0xff] }
 0x310   : > { %v9551_v51 = vpop.permute.xlu0 %3626  ;;  %v3217_v45 = vmul.f32 %v6219_v15, %v3201_v52  ;;  %6230 = vrcp.f32 %v10916_v49  ;;  %v10933_v5 = vld [vmem:[#allocation96_spill] sm:$0xff]  ;;  %v10934_v15 = vld [vmem:[#allocation73_spill] sm:$0xff]  ;;  %v10938_v6 = vld [vmem:[#allocation26_spill] sm:$0xff] }
 0x311   : > { %v9554_v19 = vadd.f32 %v3216_v50, %v2786_v8  ;;  %6232 = vrcp.f32 %v10917_v38  ;;  %v10935_v50 = vld [vmem:[#allocation114_spill] sm:$0xff] }
 0x312   : > { %v9556_v42 = vadd.f32 %v3217_v45, %v2787_v44  ;;  %6234 = vrcp.f32 %v10918_v18 }
 0x313   : > { %v9558_v34 = vpop.permute.xlu1 %3628  ;;  %6236 = vrcp.f32 %v10919_v20  ;;  %v10941_v20 = vld [vmem:[#allocation107_spill] sm:$0xff] }
 0x314   : > { %v6221_v24 = vpop.eup %6220  ;;  %6238 = vrcp.f32 %v10920_v17 }
 0x315   : > { %6240 = vrcp.f32 %v10921_v16  ;;  %v10942_v16 = vld [vmem:[#allocation92_spill] sm:$0xff] }
 0x316   : > { %v3203_v31 = vpop.permute.xlu0 %3202  ;;  %v6223_v25 = vpop.eup %6222  ;;  %6242 = vrcp.f32 %v10922_v23 }
 0x317   : > { %v3218_v22 = vmul.f32 %v6221_v24, %v3203_v31  ;;  %v6225_v62 = vpop.eup %6224  ;;  %6244 = vrcp.f32 %v10923_v59  ;;  %v10936_v24 = vld [vmem:[#allocation148_spill] sm:$0xff] }
 0x318   : > { %v9577_v13 = vpop.eup %6226  ;;  %6246 = vrcp.f32 %v10924_v9 }
 0x319   : > { %v9563_v47 = vadd.f32 %v3218_v22, %v2788_v11  ;;  %v6229_v63 = vpop.eup %6228  ;;  %6248 = vrcp.f32 %v10925_v30 }
 0x31a   : > { %v3205_v33 = vpop.permute.xlu1 %3204  ;;  %6250 = vrcp.f32 %v10926_v1  ;;  %v986_v27 = vmul.f32 %v6229_v63, %v10930_v57  ;;  %v10943_v63 = vld [vmem:[#allocation32_spill] sm:$0xff] }
 0x31b   : > { %v3219_v44 = vmul.f32 %v6223_v25, %v3205_v33  ;;  %6252 = vrcp.f32 %v10928_v14  ;;  %v10939_v25 = vld [vmem:[#allocation50_spill] sm:$0xff] }
 0x31c   : > { %6254 = vrcp.f32 %v10929_v29 }
 0x31d   : > { %v9569_v46 = vadd.f32 %v3219_v44, %v2789_v37  ;;  %v9574_v11 = vpop.permute.xlu0 %3630  ;;  %v6231_v37 = vpop.eup %6230  ;;  %6256 = vrcp.f32 %v10932_v35  ;;  %v10940_v44 = vld [vmem:[#allocation17_spill] sm:$0xff] }
 0x31e   : > { %v9582_v55 = vpop.eup %6232  ;;  %v1430_v61 = vmul.f32 %v6231_v37, %v10927_v40  ;;  %6258 = vrcp.f32 %v10933_v5  ;;  %v987_v18 = vmul.f32 %v6225_v62, %v10940_v44  ;;  %v10944_v37 = vld [vmem:[#allocation56_spill] sm:$0xff] }
 0x31f   : > { %v6235_v43 = vpop.eup %6234  ;;  %6260 = vrcp.f32 %v10935_v50  ;;  %v10947_v62 = vld [vmem:[#allocation20_spill] sm:$0xff] }
 0x320   : > { %v6237_v4 = vpop.eup %6236  ;;  %v1874_v60 = vmul.f32 %v6235_v43, %v10931_v21  ;;  %v1444_v26 = vadd.f32 %v1430_v61, %v986_v27  ;;  %6262 = vrcp.f32 %v10937_v2  ;;  %v10945_v61 = vld [vmem:[#allocation66_spill] sm:$0xff]  ;;  %v10946_v43 = vld [vmem:[#allocation113_spill] sm:$0xff] }
 0x321   : > { %v6239_v52 = vpop.eup %6238  ;;  %v1431_v31 = vmul.f32 %v6237_v4, %v10936_v24  ;;  %6264 = vrcp.f32 %v10938_v6  ;;  %v10951_v24 = vld [vmem:[#allocation74_spill] sm:$0xff]  ;;  %v10952_v2 = vld [vmem:[#allocation133_spill] sm:$0xff] }
 0x322   : > { %v9586_v53 = vpop.permute.xlu1 %3632  ;;  %v6241_v28 = vpop.eup %6240  ;;  %v2318_v8 = vmul.f32 %v6239_v52, %v10934_v15  ;;  %v1888_v10 = vadd.f32 %v1874_v60, %v1444_v26  ;;  %6266 = vrcp.f32 %v10942_v16  ;;  %v10948_v60 = vld [vmem:[#allocation11_spill] sm:$0xff]  ;;  %v10949_v52 = vld [vmem:[#allocation129_spill] sm:$0xff] }
 0x323   : > { %v6243_v45 = vpop.eup %6242  ;;  %6268 = vrcp.f32 %v10944_v37  ;;  %v1445_v40 = vadd.f32 %v1431_v31, %v987_v18  ;;  %v10950_v26 = vld [vmem:[#allocation147_spill] sm:$0xff] }
 0x324   : > { %v6245_v22 = vpop.eup %6244  ;;  %v2762_v49 = vmul.f32 %v6243_v45, %v10939_v25  ;;  %v2332_v9 = vadd.f32 %v2318_v8, %v1888_v10  ;;  %6270 = vrcp.f32 %v10946_v43  ;;  %v10953_v10 = vld [vmem:[#allocation119_spill] sm:$0xff]  ;;  %v10959_v43 = vld [vmem:[#allocation42_spill] sm:$0xff] }
 0x325   : > { %v6247_v38 = vpop.eup %6246  ;;  %v1875_v17 = vmul.f32 %v6245_v22, %v10941_v20  ;;  %6272 = vrcp.f32 %v10947_v62  ;;  %v1432_v6 = vmul.f32 %v6241_v28, %v10953_v10  ;;  %v10954_v18 = vld [vmem:[#allocation79_spill] sm:$0xff]  ;;  %v10957_v28 = vld [vmem:[#allocation44_spill] sm:$0xff] }
 0x326   : > { %v9589_v32 = vpop.permute.xlu0 %3634  ;;  %v6249_v59 = vpop.eup %6248  ;;  %v3206_v30 = vmul.f32 %v6247_v38, %v10943_v63  ;;  %v2776_v4 = vadd.f32 %v2762_v49, %v2332_v9  ;;  %6274 = vrcp.f32 %v10949_v52  ;;  %v10956_v63 = vld [vmem:[#allocation111_spill] sm:$0xff]  ;;  %v10964_v10 = vld [vmem:[#allocation120_spill] sm:$0xff] }
 0x327   : > { %v6251_v1 = vpop.eup %6250  ;;  %v2319_v14 = vmul.f32 %v6249_v59, %v10945_v61  ;;  %v1889_v21 = vadd.f32 %v1875_v17, %v1445_v40  ;;  %6276 = vrcp.f32 %v10950_v26  ;;  %v9627_v17 = vld [vmem:[%s9952_s5] ss:$0 sm:$0xff]  ;;  %v10955_v59 = vld [vmem:[#allocation49_spill] sm:$0xff]  ;;  %v10958_v40 = vld [vmem:[#allocation151_spill] sm:$0xff] }
 0x328   : > { %v9601_v33 = vpop.permute.xlu1 %3636  ;;  %v6253_v29 = vpop.eup %6252  ;;  %v3650_v57 = vmul.f32 %v6251_v1, %v9507_v41  ;;  %v3220_v15 = vadd.f32 %v3206_v30, %v2776_v4  ;;  %6278 = vrcp.f32 %v10952_v2  ;;  %v988_v9 = vmul.f32 %v9582_v55, %v10955_v59  ;;  %v10960_v4 = vld [vmem:[#allocation134_spill] sm:$0xff] }
 0x329   : > { %v6255_v27 = vpop.eup %6254  ;;  %v2763_v35 = vmul.f32 %v6253_v29, %v10948_v60  ;;  %v2333_v45 = vadd.f32 %v2319_v14, %v1889_v21  ;;  %6280 = vrcp.f32 %v10954_v18 }
 0x32a   : > { %v6257_v5 = vpop.eup %6256  ;;  %v3664_v25 = vadd.f32 %v3650_v57, %v3220_v15  ;;  %6282 = vrcp.f32 %v10957_v28  ;;  %v1433_v61 = vmul.f32 %v6255_v27, %v10958_v40  ;;  %v1446_v62 = vadd.f32 %v1432_v6, %v988_v9  ;;  %v10962_v27 = vld [vmem:[#allocation71_spill] sm:$0xff]  ;;  %v10967_v40 = vld [vmem:[#allocation85_spill] sm:$0xff] }
 0x32b   : > { %v9606_v23 = vpop.permute.xlu0 %3638  ;;  %v6259_v50 = vpop.eup %6258  ;;  %v3207_v31 = vmul.f32 %v6257_v5, %v10951_v24  ;;  %v2777_v44 = vadd.f32 %v2763_v35, %v2333_v45  ;;  %6284 = vrcp.f32 %v10959_v43  ;;  %v10961_v35 = vld [vmem:[#allocation61_spill] sm:$0xff]  ;;  %v10963_v24 = vld [vmem:[#allocation40_spill] sm:$0xff] }
 0x32c   : > { %v6261_v41 = vpop.eup %6260  ;;  %v989_v52 = vmul.f32 %v9577_v13, %v10961_v35 }
 0x32d   : > { %v6263_v38 = vpop.eup %6262  ;;  %v3651_v20 = vmul.f32 %v6261_v41, %v9521_v54  ;;  %v3221_v14 = vadd.f32 %v3207_v31, %v2777_v44  ;;  %v9637_v54 = vld [vmem:[%s9953_s6] ss:$0 sm:$0xff] }
 0x32e   : > { %v9617_v8 = vpop.permute.xlu1 %3640  ;;  %v6265_v16 = vpop.eup %6264  ;;  %v1876_v30 = vmul.f32 %v6263_v38, %v10956_v63  ;;  %v1447_v41 = vadd.f32 %v1433_v61, %v989_v52  ;;  %v10965_v38 = vld [vmem:[#allocation38_spill] sm:$0xff]  ;;  %v10970_v52 = vld [vmem:[#allocation145_spill] sm:$0xff] }
 0x32f   : > { %v6267_v1 = vpop.eup %6266  ;;  %v1877_v5 = vmul.f32 %v6265_v16, %v10962_v27  ;;  %v3665_v26 = vadd.f32 %v3651_v20, %v3221_v14  ;;  %6286 = vrcp.f32 %v10965_v38  ;;  %v6384_v20 = vld [vmem:[%s6593_s30] sm:$0xff]  ;;  %v10966_v63 = vld [vmem:[#allocation46_spill] sm:$0xff]  ;;  %v6385_v27 = vld [vmem:[%s6593_s30 + $0x8] sm:$0xff] }
 0x330   : > { %v6269_v29 = vpop.eup %6268  ;;  %v2320_v55 = vmul.f32 %v6267_v1, %v10960_v4  ;;  %v1890_v45 = vadd.f32 %v1876_v30, %v1446_v62  ;;  %6288 = vrcp.f32 %v10967_v40  ;;  %v6386_v40 = vld [vmem:[%s6593_s30 + $0x10] sm:$0xff] }
 0x331   : > { %v4067_v22 = vpop.permute.xlu0 %4066  ;;  %v6271_v60 = vpop.eup %6270  ;;  %v1891_v9 = vadd.f32 %v1877_v5, %v1447_v41 }
 0x332   : > { %v4094_v49 = vmul.f32 %v6259_v50, %v4067_v22  ;;  %v6273_v50 = vpop.eup %6272  ;;  %v2764_v31 = vmul.f32 %v6271_v60, %v10963_v24  ;;  %v2334_v44 = vadd.f32 %v2320_v55, %v1890_v45 }
 0x333   : > { %v6275_v22 = vpop.eup %6274  ;;  %v2321_v6 = vmul.f32 %v6273_v50, %v10964_v10  ;;  %v10973_v10 = vld [vmem:[#allocation101_spill] sm:$0xff] }
 0x334   : > { %v4108_v37 = vadd.f32 %v4094_v49, %v3664_v25  ;;  %v6277_v13 = vpop.eup %6276  ;;  %v3208_v18 = vmul.f32 %v6275_v22, %v9337_v3  ;;  %v10968_v3 = vld [vmem:[#allocation141_spill] sm:$0xff] }
 0x335   : > { %v6279_v59 = vpop.eup %6278  ;;  %v2765_v30 = vmul.f32 %v6277_v13, %v10966_v63  ;;  %v2335_v43 = vadd.f32 %v2321_v6, %v1891_v9  ;;  %6290 = vrcp.f32 %v10968_v3  ;;  %v10974_v13 = vld [vmem:[#allocation65_spill] sm:$0xff] }
 0x336   : > { %v4129_v57 = vmul.f32 %v9627_v17, %v4108_v37  ;;  %v4069_v21 = vpop.permute.xlu1 %4068  ;;  %v2778_v37 = vadd.f32 %v2764_v31, %v2334_v44  ;;  %v3652_v1 = vmul.f32 %v6279_v59, %v9551_v51  ;;  %v6281_v14 = vpop.eup %6280  ;;  %v10971_v31 = vld [vmem:[#allocation59_spill] sm:$0xff] }
 0x337   : > { %v4095_v15 = vmul.f32 %v6269_v29, %v4069_v21  ;;  %v6283_v4 = vpop.eup %6282  ;;  %v10969_v21 = vld [vmem:[#allocation41_spill] sm:$0xff]  ;;  %v2779_v35 = vadd.f32 %v2765_v30, %v2335_v43  ;;  %v10977_v43 = vld [vmem:[#allocation54_spill] sm:$0xff] }
 0x338   : > { %v4150_v2 = vadd.f32 %v9637_v54, %v4129_v57  ;;  %v9648_v49 = vpop.permute.xlu0 %3642  ;;  %v3222_v55 = vadd.f32 %v3208_v18, %v2778_v37  ;;  %v3209_v57 = vmul.f32 %v6281_v14, %v9368_v39  ;;  %6292 = vrcp.f32 %v10969_v21  ;;  %v6285_v60 = vpop.eup %6284  ;;  %v10979_v21 = vld [vmem:[#allocation51_spill] sm:$0xff] }
 0x339   : > { %v4109_v25 = vadd.f32 %v4095_v15, %v3665_v26  ;;  %6294 = vrcp.f32 %v10970_v52  ;;  %v3653_v50 = vmul.f32 %v6283_v4, %v9558_v34  ;;  %v6287_v41 = vpop.eup %6286  ;;  %v10980_v52 = vld [vmem:[#allocation124_spill] sm:$0xff] }
 0x33a   : > { %v9653_v16 = vadd.f32 %v6384_v20, %v4150_v2  ;;  %v3666_v15 = vadd.f32 %v3652_v1, %v3222_v55  ;;  %v3223_v39 = vadd.f32 %v3209_v57, %v2779_v35  ;;  %v10972_v2 = vld [vmem:[#allocation9_spill] sm:$0xff]  ;;  %v6289_v18 = vpop.eup %6288 }
 0x33b   : > { %v4130_v28 = vmul.f32 %v9627_v17, %v4109_v25  ;;  %v10975_v20 = vld [vmem:[#allocation33_spill] sm:$0xff]  ;;  %v3654_v1 = vmul.f32 %v6289_v18, %v9574_v11 }
 0x33c   : > { %v4192_v61 = vmin.f32 %v9653_v16, 20.0  ;;  %v9662_v62 = vpop.permute.xlu1 %3644  ;;  %v3667_v38 = vadd.f32 %v3653_v50, %v3223_v39  ;;  %v6387_v50 = vld [vmem:[%s6593_s30 + $0x18] sm:$0xff]  ;;  %vm4178_vm15 = vcmp.gt.f32.partialorder %v9653_v16, 20.0 }
 0x33d   : > { %v4151_v29 = vadd.f32 %v9637_v54, %v4130_v28  ;;  %v10976_v28 = vld [vmem:[#allocation99_spill] sm:$0xff] }
 0x33e   : > { %v4206_v51 = vmul.f32 1.442695, %v4192_v61 }
 0x33f   : > { %v9668_v5 = vadd.f32 %v6385_v27, %v4151_v29  ;;  %v4071_v26 = vpop.permute.xlu0 %4070  ;;  %v6291_v30 = vpop.eup %6290  ;;  %v10978_v29 = vld [vmem:[#allocation53_spill] sm:$0xff] }
 0x340   : > { %6296 = vpow2.f32 %v4206_v51  ;;  %v4096_v45 = vmul.f32 %v6285_v60, %v4071_v26  ;;  %v3668_v26 = vadd.f32 %v3654_v1, %v9531_v58 }
 0x341   : > { %v4193_v24 = vmin.f32 %v9668_v5, 20.0  ;;  %6298 = vrcp.f32 %v10971_v31  ;;  %vm4179_vm3 = vcmp.gt.f32.partialorder %v9668_v5, 20.0 }
 0x342   : > { %6300 = vrcp.f32 %v10972_v2  ;;  %v4110_v22 = vadd.f32 %v4096_v45, %v3666_v15  ;;  %v4073_v25 = vpop.permute.xlu1 %4072  ;;  %v6293_v37 = vpop.eup %6292  ;;  %v3655_v2 = vmul.f32 %v6291_v30, %v9586_v53 }
 0x343   : > { %6302 = vrcp.f32 %v10973_v10  ;;  %v4208_v6 = vmul.f32 1.442695, %v4193_v24  ;;  %v4097_v44 = vmul.f32 %v6287_v41, %v4073_v25  ;;  %v6295_v3 = vpop.eup %6294  ;;  %v3656_v58 = vmul.f32 %v6293_v37, %v9589_v32 }
 0x344   : > { %6304 = vrcp.f32 %v10974_v13  ;;  %v4131_v34 = vmul.f32 %v9627_v17, %v4110_v22  ;;  %v9679_v63 = vpop.permute.xlu0 %3646  ;;  %v3669_v32 = vadd.f32 %v3655_v2, %v9535_v36  ;;  %v3657_v30 = vmul.f32 %v6295_v3, %v9601_v33 }
 0x345   : > { %6306 = vpow2.f32 %v4208_v6  ;;  %v4111_v9 = vadd.f32 %v4097_v44, %v3667_v38  ;;  %v10981_v6 = vld [vmem:[#allocation30_spill] sm:$0xff]  ;;  %v10982_v44 = vld [vmem:[#allocation47_spill] sm:$0xff] }
 0x346   : > { %6308 = vrcp.f32 %v10975_v20  ;;  %v4152_v59 = vadd.f32 %v9637_v54, %v4131_v34 }
 0x347   : > { %6310 = vrcp.f32 %v10976_v28  ;;  %v4132_v14 = vmul.f32 %v9627_v17, %v4111_v9  ;;  %v9695_v60 = vpop.permute.xlu1 %3648 }
 0x348   : > { %v9684_v61 = vadd.f32 %v6386_v40, %v4152_v59  ;;  %6312 = vrcp.f32 %v10977_v43  ;;  %v10983_v59 = vld [vmem:[#allocation87_spill] sm:$0xff]  ;;  %v3670_v40 = vadd.f32 %v3656_v58, %v9541_v56  ;;  %v10984_v56 = vld [vmem:[#allocation138_spill] sm:$0xff] }
 0x349   : > { %6314 = vrcp.f32 %v10978_v29  ;;  %v4153_v57 = vadd.f32 %v9637_v54, %v4132_v14  ;;  %v4075_v35 = vpop.permute.xlu0 %4074 }
 0x34a   : > { %v9689_v4 = vpop.eup %6296  ;;  %v4194_v55 = vmin.f32 %v9684_v61, 20.0  ;;  %6316 = vrcp.f32 %v10979_v21  ;;  %v6388_v21 = vld [vmem:[%s6593_s30 + $0x20] sm:$0xff]  ;;  %vm4180_vm4 = vcmp.gt.f32.partialorder %v9684_v61, 20.0 }
 0x34b   : > { %v6299_v11 = vpop.eup %6298  ;;  %v4234_v51 = vadd.f32 1.0, %v9689_v4  ;;  %6318 = vrcp.f32 %v10980_v52  ;;  %v9700_v45 = vadd.f32 %v6387_v50, %v4153_v57  ;;  %v4237_v38 = vmul.f32 -0.5, %v9689_v4 }
 0x34c   : > { %v6301_v27 = vpop.eup %6300  ;;  %v4210_v15 = vmul.f32 1.442695, %v4194_v55  ;;  %v4098_v24 = vmul.f32 %v6299_v11, %v4075_v35  ;;  %v4240_v57 = vand.u32 2147483647, %v9689_v4  ;;  %v3671_v35 = vadd.f32 %v3657_v30, %v9544_v12 }
 0x34d   : > { %v9702_v31 = vpop.eup %6302  ;;  %6320 = vlog2.f32 %v4234_v51  ;;  %v4195_v22 = vmin.f32 %v9700_v45, 20.0  ;;  %v4238_v55 = vadd.f32 1.0, %v4237_v38  ;;  %v3658_v50 = vmul.f32 %v6301_v27, %v9606_v23 }
 0x34e   : > { %v9704_v39 = vpop.eup %6304  ;;  %6322 = vpow2.f32 %v4210_v15  ;;  %v4112_v41 = vadd.f32 %v4098_v24, %v3668_v26  ;;  %v10985_v26 = vld [vmem:[#allocation75_spill] sm:$0xff]  ;;  %vm9744_vm1 = vcmp.lt.f32.partialorder %v4240_v57, 0.0004427343  ;;  %vm4181_vm7 = vcmp.gt.f32.partialorder %v9700_v45, 20.0 }
 0x34f   : > { %v9708_v10 = vpop.eup %6306  ;;  %6324 = vrcp.f32 %v10981_v6  ;;  %v4212_v34 = vmul.f32 1.442695, %v4195_v22  ;;  %v4077_v20 = vpop.permute.xlu1 %4076  ;;  %v3672_v30 = vadd.f32 %v3658_v50, %v9547_v0 }
 0x350   : > { %v9712_v25 = vpop.eup %6308  ;;  %v4243_v13 = vadd.f32 1.0, %v9708_v10  ;;  %6326 = vrcp.f32 %v10982_v44  ;;  %v4133_v18 = vmul.f32 %v9627_v17, %v4112_v41  ;;  %v4079_v37 = vpop.permute.xlu0 %4078  ;;  %v4246_v3 = vmul.f32 -0.5, %v9708_v10 }
 0x351   : > { %v6311_v53 = vpop.eup %6310  ;;  %6328 = vrcp.f32 %v10983_v59  ;;  %v4239_v41 = vmul.f32 %v9689_v4, %v4238_v55  ;;  %v4249_v38 = vand.u32 2147483647, %v9708_v10  ;;  %v6390_v55 = vld [vmem:[%s6593_s30 + $0x30] sm:$0xff] }
 0x352   : > { %v6313_v9 = vpop.eup %6312  ;;  %6330 = vlog2.f32 %v4243_v13  ;;  %v4099_v28 = vmul.f32 %v6311_v53, %v4077_v20  ;;  %v4154_v14 = vadd.f32 %v9637_v54, %v4133_v18  ;;  %v4247_v27 = vadd.f32 1.0, %v4246_v3  ;;  %v6389_v53 = vld [vmem:[%s6593_s30 + $0x28] sm:$0xff] }
 0x353   : > { %v9721_v1 = vpop.eup %6314  ;;  %6332 = vpow2.f32 %v4212_v34  ;;  %v4100_v43 = vmul.f32 %v6313_v9, %v4079_v37  ;;  %vm4250_vm2 = vcmp.lt.f32.partialorder %v4249_v38, 0.0004427343  ;;  %v3660_v3 = vmul.f32 %v9704_v39, %v9648_v49 }
 0x354   : > { %v9725_v29 = vpop.eup %6316  ;;  %v4113_v36 = vadd.f32 %v4099_v28, %v3669_v32  ;;  %6334 = vrcp.f32 %v9307_v48  ;;  %v9731_v11 = vadd.f32 %v6388_v21, %v4154_v14  ;;  %v3659_v28 = vmul.f32 %v9702_v31, %v9617_v8 }
 0x355   : > { %v6319_v33 = vpop.eup %6318  ;;  %v4114_v51 = vadd.f32 %v4100_v43, %v3670_v40  ;;  %6336 = vrcp.f32 %v10984_v56  ;;  %v4248_v8 = vmul.f32 %v9708_v10, %v4247_v27  ;;  %v6391_v27 = vld [vmem:[%s6593_s30 + $0x38] sm:$0xff] }
 0x356   : > { %v4134_v52 = vmul.f32 %v9627_v17, %v4113_v36  ;;  %6338 = vrcp.f32 %v10985_v26  ;;  %v4196_v48 = vmin.f32 %v9731_v11, 20.0  ;;  %v4081_v6 = vpop.permute.xlu1 %4080  ;;  %v3673_v12 = vadd.f32 %v3659_v28, %v9549_v7 }
 0x357   : > { %v6321_v15 = vpop.eup %6320  ;;  %v4135_v24 = vmul.f32 %v9627_v17, %v4114_v51  ;;  %v4101_v59 = vmul.f32 %v6319_v33, %v4081_v6  ;;  %vm4182_vm8 = vcmp.gt.f32.partialorder %v9731_v11, 20.0 }
 0x358   : > { %v9741_v2 = vpop.eup %6322  ;;  %v4236_v22 = vmul.f32 0.6931472, %v6321_v15  ;;  %v4155_v58 = vadd.f32 %v9637_v54, %v4134_v52  ;;  %v4214_v13 = vmul.f32 1.442695, %v4196_v48  ;;  %v4083_v9 = vpop.permute.xlu0 %4082 }
 0x359   : > { %v6325_v23 = vpop.eup %6324  ;;  %v4252_v4 = vadd.f32 1.0, %v9741_v2  ;;  %v4156_v20 = vadd.f32 %v9637_v54, %v4135_v24  ;;  %v4255_v14 = vmul.f32 -0.5, %v9741_v2  ;;  %v4115_v31 = vadd.f32 %v4101_v59, %v3671_v35 }
 0x35a   : > { %v6327_v34 = vpop.eup %6326  ;;  %v4242_v44 = vsel %vm9744_vm1, %v4239_v41, %v4236_v22  ;;  %v9761_v18 = vadd.f32 %v6389_v53, %v4155_v58  ;;  %v4102_v33 = vmul.f32 %v6325_v23, %v4083_v9  ;;  %v4258_v49 = vand.u32 2147483647, %v9741_v2 }
 0x35b   : > { %v6329_v32 = vpop.eup %6328  ;;  %v4360_v37 = vsel %vm4178_vm15, %v9653_v16, %v4242_v44  ;;  %6340 = vlog2.f32 %v4252_v4  ;;  %v9775_v57 = vadd.f32 %v6390_v55, %v4156_v20  ;;  %v4136_v10 = vmul.f32 %v9627_v17, %v4115_v31  ;;  %v6392_v55 = vld [vmem:[%s6593_s30 + $0x40] sm:$0xff] }
 0x35c   : > { %v6331_v40 = vpop.eup %6330  ;;  %4374 = vst.msk [vmem:[%s9754_s17] sm:$0xff] %vm377_vm0, %v4360_v37  ;;  %6342 = vpow2.f32 %v4214_v13  ;;  %v4197_v43 = vmin.f32 %v9761_v18, 20.0  ;;  %v4085_v56 = vpop.permute.xlu1 %4084  ;;  %v4256_v48 = vadd.f32 1.0, %v4255_v14  ;;  %v4116_v41 = vadd.f32 %v4102_v33, %v3672_v30 }
 0x35d   : > { %v9777_v0 = vpop.eup %6332  ;;  %v4245_v36 = vmul.f32 0.6931472, %v6331_v40  ;;  %v4198_v15 = vmin.f32 %v9775_v57, 20.0  ;;  %v4157_v22 = vadd.f32 %v9637_v54, %v4136_v10  ;;  %v3674_v58 = vadd.f32 %v3660_v3, %v9554_v19 }
 0x35e   : > { %v6335_v16 = vpop.eup %6334  ;;  %v4261_v21 = vadd.f32 1.0, %v9777_v0  ;;  %v4216_v51 = vmul.f32 1.442695, %v4197_v43  ;;  %v4103_v6 = vmul.f32 %v6327_v34, %v4085_v56  ;;  %v4137_v4 = vmul.f32 %v9627_v17, %v4116_v41 }
 0x35f   : > { %v9783_v52 = vpop.eup %6336  ;;  %v4251_v26 = vsel %vm4250_vm2, %v4248_v8, %v4245_v36  ;;  %v4087_v39 = vpop.permute.xlu0 %4086  ;;  %v4218_v24 = vmul.f32 1.442695, %v4198_v15  ;;  %v9799_v38 = vadd.f32 %v6391_v27, %v4157_v22  ;;  %v3661_v13 = vmul.f32 %v9712_v25, %v9662_v62 }
 0x360   : > { %v9788_v35 = vpop.eup %6338  ;;  %v4361_v50 = vsel %vm4179_vm3, %v9668_v5, %v4251_v26  ;;  %6344 = vlog2.f32 %v4261_v21  ;;  %v4104_v23 = vmul.f32 %v6329_v32, %v4087_v39  ;;  %v4264_v5 = vmul.f32 -0.5, %v9777_v0  ;;  %v6393_v26 = vld [vmem:[%s6593_s30 + $0x48] sm:$0xff] }
 0x361   : > { %4375 = vst.msk [vmem:[%s9754_s17 + $0x8] sm:$0xff] %vm377_vm0, %v4361_v50  ;;  %6346 = vpow2.f32 %v4216_v51  ;;  %v4117_v44 = vadd.f32 %v4103_v6, %v3673_v12  ;;  %v4257_v34 = vmul.f32 %v9741_v2, %v4256_v48  ;;  %vm9806_vm5 = vcmp.lt.f32.partialorder %v4258_v49, 0.0004427343 }
 0x362   : > { %6348 = vpow2.f32 %v4218_v24  ;;  %v4118_v53 = vadd.f32 %v4104_v23, %v3674_v58  ;;  %v4199_v59 = vmin.f32 %v9799_v38, 20.0  ;;  %v4158_v9 = vadd.f32 %v9637_v54, %v4137_v4 }
 0x363   : > { %v4089_v7 = vpop.permute.xlu1 %4088  ;;  %v4267_v25 = vand.u32 2147483647, %v9777_v0  ;;  %v4138_v30 = vmul.f32 %v9627_v17, %v4117_v44  ;;  %v4265_v37 = vadd.f32 1.0, %v4264_v5  ;;  %v3675_v33 = vadd.f32 %v3661_v13, %v9556_v42 }
 0x364   : > { %v4139_v28 = vmul.f32 %v9627_v17, %v4118_v53  ;;  %v4220_v40 = vmul.f32 1.442695, %v4199_v59  ;;  %v4105_v14 = vmul.f32 %v6335_v16, %v4089_v7  ;;  %v9821_v36 = vadd.f32 %v6392_v55, %v4158_v9  ;;  %v4091_v15 = vpop.permute.xlu0 %4090 }
 0x365   : > { %v6341_v19 = vpop.eup %6340  ;;  %v4159_v8 = vadd.f32 %v9637_v54, %v4138_v30  ;;  %v3662_v21 = vmul.f32 %v9721_v1, %v9679_v63  ;;  %v3663_v51 = vmul.f32 %v9725_v29, %v9695_v60  ;;  %v4266_v63 = vmul.f32 %v9777_v0, %v4265_v37  ;;  %v6394_v29 = vld [vmem:[%s6593_s30 + $0x50] sm:$0xff] }
 0x366   : > { %v9812_v32 = vpop.eup %6342  ;;  %v4254_v62 = vmul.f32 0.6931472, %v6341_v19  ;;  %v4160_v31 = vadd.f32 %v9637_v54, %v4139_v28  ;;  %v4200_v56 = vmin.f32 %v9821_v36, 20.0  ;;  %v4119_v50 = vadd.f32 %v4105_v14, %v3675_v33  ;;  %v6396_v33 = vld [vmem:[%s6593_s30 + $0x60] sm:$0xff] }
 0x367   : > { %v4270_v2 = vadd.f32 1.0, %v9812_v32  ;;  %v9837_v42 = vadd.f32 %v6393_v26, %v4159_v8  ;;  %v4273_v1 = vmul.f32 -0.5, %v9812_v32  ;;  %vm4268_vm6 = vcmp.lt.f32.partialorder %v4267_v25, 0.0004427343 }
 0x368   : > { %v4260_v43 = vsel %vm9806_vm5, %v4257_v34, %v4254_v62  ;;  %v4222_v60 = vmul.f32 1.442695, %v4200_v56  ;;  %v9845_v49 = vadd.f32 %v6394_v29, %v4160_v31  ;;  %v4106_v41 = vmul.f32 %v9783_v52, %v4091_v15  ;;  %v6395_v62 = vld [vmem:[%s6593_s30 + $0x58] sm:$0xff] }
 0x369   : > { %v4362_v3 = vsel %vm4180_vm4, %v9684_v61, %v4260_v43  ;;  %6350 = vlog2.f32 %v4270_v2  ;;  %v4201_v22 = vmin.f32 %v9837_v42, 20.0  ;;  %v3676_v12 = vadd.f32 %v3662_v21, %v9563_v47  ;;  %v4093_v23 = vpop.permute.xlu1 %4092 }
 0x36a   : > { %v6345_v16 = vpop.eup %6344  ;;  %4376 = vst.msk [vmem:[%s9754_s17 + $0x10] sm:$0xff] %vm377_vm0, %v4362_v3  ;;  %6352 = vpow2.f32 %v4220_v40  ;;  %v4274_v58 = vadd.f32 1.0, %v4273_v1  ;;  %v3677_v5 = vadd.f32 %v3663_v51, %v9569_v46  ;;  %v4202_v4 = vmin.f32 %v9845_v49, 20.0 }
 0x36b   : > { %v9839_v10 = vpop.eup %6346  ;;  %v4263_v61 = vmul.f32 0.6931472, %v6345_v16  ;;  %v4224_v27 = vmul.f32 1.442695, %v4201_v22  ;;  %v4140_v13 = vmul.f32 %v9627_v17, %v4119_v50  ;;  %v4276_v52 = vand.u32 2147483647, %v9812_v32 }
 0x36c   : > { %v4279_v48 = vadd.f32 1.0, %v9839_v10  ;;  %v9847_v39 = vpop.eup %6348  ;;  %v4120_v44 = vadd.f32 %v4106_v41, %v3676_v12  ;;  %v4226_v47 = vmul.f32 1.442695, %v4202_v4  ;;  %v4107_v7 = vmul.f32 %v9788_v35, %v4093_v23 }
 0x36d   : > { %v4269_v24 = vsel %vm4268_vm6, %v4266_v63, %v4263_v61  ;;  %v4288_v6 = vadd.f32 1.0, %v9847_v39  ;;  %v4161_v53 = vadd.f32 %v9637_v54, %v4140_v13  ;;  %v4275_v46 = vmul.f32 %v9812_v32, %v4274_v58 }
 0x36e   : > { %v4363_v0 = vsel %vm4181_vm7, %v9700_v45, %v4269_v24  ;;  %6354 = vlog2.f32 %v4279_v48  ;;  %v4282_v45 = vmul.f32 -0.5, %v9839_v10  ;;  %v4291_v34 = vmul.f32 -0.5, %v9847_v39 }
 0x36f   : > { %4377 = vst.msk [vmem:[%s9754_s17 + $0x18] sm:$0xff] %vm377_vm0, %v4363_v0  ;;  %6356 = vpow2.f32 %v4222_v60  ;;  %v4141_v20 = vmul.f32 %v9627_v17, %v4120_v44  ;;  %v9871_v25 = vadd.f32 %v6395_v62, %v4161_v53  ;;  %v4121_v30 = vadd.f32 %v4107_v7, %v3677_v5  ;;  %v6397_v60 = vld [vmem:[%s6593_s30 + $0x68] sm:$0xff] }
 0x370   : > { %6358 = vlog2.f32 %v4288_v6  ;;  %vm4277_vm9 = vcmp.lt.f32.partialorder %v4276_v52, 0.0004427343  ;;  %v4283_v35 = vadd.f32 1.0, %v4282_v45  ;;  %v4285_v2 = vand.u32 2147483647, %v9839_v10 }
 0x371   : > { %6360 = vpow2.f32 %v4224_v27  ;;  %v4162_v32 = vadd.f32 %v9637_v54, %v4141_v20  ;;  %v4203_v40 = vmin.f32 %v9871_v25, 20.0  ;;  %v4142_v14 = vmul.f32 %v9627_v17, %v4121_v30 }
 0x372   : > { %6362 = vpow2.f32 %v4226_v47  ;;  %v4292_v8 = vadd.f32 1.0, %v4291_v34  ;;  %v4284_v17 = vmul.f32 %v9839_v10, %v4283_v35  ;;  %v4294_v56 = vand.u32 2147483647, %v9847_v39 }
 0x373   : > { %v6351_v19 = vpop.eup %6350  ;;  %v4228_v31 = vmul.f32 1.442695, %v4203_v40  ;;  %v9884_v3 = vadd.f32 %v6396_v33, %v4162_v32  ;;  %v4163_v21 = vadd.f32 %v9637_v54, %v4142_v14  ;;  %vm4286_vm10 = vcmp.lt.f32.partialorder %v4285_v2, 0.0004427343 }
 0x374   : > { %v9868_v59 = vpop.eup %6352  ;;  %v4272_v9 = vmul.f32 0.6931472, %v6351_v19  ;;  %vm4183_vm11 = vcmp.gt.f32.partialorder %v9761_v18, 20.0  ;;  %v4293_v10 = vmul.f32 %v9847_v39, %v4292_v8  ;;  %vm4295_vm12 = vcmp.lt.f32.partialorder %v4294_v56, 0.0004427343 }
 0x375   : > { %v4297_v28 = vadd.f32 1.0, %v9868_v59  ;;  %v4204_v63 = vmin.f32 %v9884_v3, 20.0  ;;  %v9897_v29 = vadd.f32 %v6397_v60, %v4163_v21  ;;  %vm4184_vm13 = vcmp.gt.f32.partialorder %v9775_v57, 20.0 }
 0x376   : > { %v4278_v37 = vsel %vm4277_vm9, %v4275_v46, %v4272_v9  ;;  %v4303_v12 = vand.u32 2147483647, %v9868_v59  ;;  %vm4185_vm15 = vcmp.gt.f32.partialorder %v9799_v38, 20.0  ;;  %vm4186_vm2 = vcmp.gt.f32.partialorder %v9821_v36, 20.0 }
 0x377   : > { %v4364_v43 = vsel %vm4182_vm8, %v9731_v11, %v4278_v37  ;;  %6364 = vlog2.f32 %v4297_v28  ;;  %v4300_v11 = vmul.f32 -0.5, %v9868_v59  ;;  %v4230_v0 = vmul.f32 1.442695, %v4204_v63 }
 0x378   : > { %v6355_v55 = vpop.eup %6354  ;;  %4378 = vst.msk [vmem:[%s9754_s17 + $0x20] sm:$0xff] %vm377_vm0, %v4364_v43  ;;  %6366 = vpow2.f32 %v4228_v31  ;;  %v4205_v23 = vmin.f32 %v9897_v29, 20.0  ;;  %vm4304_vm14 = vcmp.lt.f32.partialorder %v4303_v12, 0.0004427343  ;;  %vm4187_vm4 = vcmp.gt.f32.partialorder %v9837_v42, 20.0 }
 0x379   : > { %v6357_v16 = vpop.eup %6356  ;;  %v4281_v51 = vmul.f32 0.6931472, %v6355_v55  ;;  %v4301_v41 = vadd.f32 1.0, %v4300_v11  ;;  %vm4188_vm6 = vcmp.gt.f32.partialorder %v9845_v49, 20.0  ;;  %vm4189_vm8 = vcmp.gt.f32.partialorder %v9871_v25, 20.0 }
 0x37a   : > { %v4306_v26 = vadd.f32 1.0, %v6357_v16  ;;  %v6359_v15 = vpop.eup %6358  ;;  %v4309_v39 = vmul.f32 -0.5, %v6357_v16  ;;  %v4312_v44 = vand.u32 2147483647, %v6357_v16 }
 0x37b   : > { %v4287_v61 = vsel %vm4286_vm10, %v4284_v17, %v4281_v51  ;;  %v6361_v54 = vpop.eup %6360  ;;  %v4290_v50 = vmul.f32 0.6931472, %v6359_v15  ;;  %v4302_v27 = vmul.f32 %v9868_v59, %v4301_v41  ;;  %vm4190_vm10 = vcmp.gt.f32.partialorder %v9884_v3, 20.0 }
 0x37c   : > { %v4365_v1 = vsel %vm4183_vm11, %v9761_v18, %v4287_v61  ;;  %6368 = vlog2.f32 %v4306_v26  ;;  %v4315_v48 = vadd.f32 1.0, %v6361_v54  ;;  %v6363_v24 = vpop.eup %6362  ;;  %v4318_v4 = vmul.f32 -0.5, %v6361_v54 }
 0x37d   : > { %4379 = vst.msk [vmem:[%s9754_s17 + $0x28] sm:$0xff] %vm377_vm0, %v4365_v1  ;;  %v4296_v22 = vsel %vm4295_vm12, %v4293_v10, %v4290_v50  ;;  %v4324_v58 = vadd.f32 1.0, %v6363_v24  ;;  %v4310_v13 = vadd.f32 1.0, %v4309_v39  ;;  %v4327_v53 = vmul.f32 -0.5, %v6363_v24 }
 0x37e   : > { %v4366_v18 = vsel %vm4184_vm13, %v9775_v57, %v4296_v22  ;;  %6370 = vlog2.f32 %v4315_v48  ;;  %v4232_v57 = vmul.f32 1.442695, %v4205_v23  ;;  %v4319_v46 = vadd.f32 1.0, %v4318_v4 }
 0x37f   : > { %4380 = vst.msk [vmem:[%s9754_s17 + $0x30] sm:$0xff] %vm377_vm0, %v4366_v18  ;;  %6372 = vpow2.f32 %v4230_v0  ;;  %v4311_v20 = vmul.f32 %v6357_v16, %v4310_v13  ;;  %v4321_v59 = vand.u32 2147483647, %v6361_v54  ;;  %vm4313_vm1 = vcmp.lt.f32.partialorder %v4312_v44, 0.0004427343 }
 0x380   : > { %6374 = vlog2.f32 %v4324_v58  ;;  %v4328_v30 = vadd.f32 1.0, %v4327_v53  ;;  %v4330_v35 = vand.u32 2147483647, %v6363_v24  ;;  %v4320_v37 = vmul.f32 %v6361_v54, %v4319_v46 }
 0x381   : > { %v6365_v6 = vpop.eup %6364  ;;  %6376 = vpow2.f32 %v4232_v57  ;;  %vm4322_vm3 = vcmp.lt.f32.partialorder %v4321_v59, 0.0004427343  ;;  %vm4191_vm12 = vcmp.gt.f32.partialorder %v9897_v29, 20.0 }
 0x382   : > { %v4299_v5 = vmul.f32 0.6931472, %v6365_v6  ;;  %v6367_v52 = vpop.eup %6366  ;;  %v4329_v31 = vmul.f32 %v6363_v24, %v4328_v30  ;;  %vm4331_vm5 = vcmp.lt.f32.partialorder %v4330_v35, 0.0004427343 }
 0x383   : > { %v4333_v7 = vadd.f32 1.0, %v6367_v52  ;;  %v4336_v2 = vmul.f32 -0.5, %v6367_v52  ;;  %v4339_v21 = vand.u32 2147483647, %v6367_v52 }
 0x384   : > { %v4305_v45 = vsel %vm4304_vm14, %v4302_v27, %v4299_v5 }
 0x385   : > { %v4367_v47 = vsel %vm4185_vm15, %v9799_v38, %v4305_v45  ;;  %6378 = vlog2.f32 %v4333_v7  ;;  %vm4340_vm7 = vcmp.lt.f32.partialorder %v4339_v21, 0.0004427343 }
 0x386   : > { %v6369_v19 = vpop.eup %6368  ;;  %4381 = vst.msk [vmem:[%s9754_s17 + $0x38] sm:$0xff] %vm377_vm0, %v4367_v47 }
 0x387   : > { %v4308_v34 = vmul.f32 0.6931472, %v6369_v19 }
 0x388   : > { %v6371_v9 = vpop.eup %6370 }
 0x389   : > { %v4314_v62 = vsel %vm4313_vm1, %v4311_v20, %v4308_v34  ;;  %v6373_v38 = vpop.eup %6372  ;;  %v4317_v32 = vmul.f32 0.6931472, %v6371_v9 }
 0x38a   : > { %v4368_v28 = vsel %vm4186_vm2, %v9821_v36, %v4314_v62  ;;  %v4342_v40 = vadd.f32 1.0, %v6373_v38  ;;  %v6375_v14 = vpop.eup %6374  ;;  %v4337_v36 = vadd.f32 1.0, %v4336_v2  ;;  %v4345_v17 = vmul.f32 -0.5, %v6373_v38 }
 0x38b   : > { %4382 = vst.msk [vmem:[%s9754_s17 + $0x40] sm:$0xff] %vm377_vm0, %v4368_v28  ;;  %v4323_v43 = vsel %vm4322_vm3, %v4320_v37, %v4317_v32  ;;  %v4326_v8 = vmul.f32 0.6931472, %v6375_v14  ;;  %v6377_v16 = vpop.eup %6376  ;;  %v4348_v54 = vand.u32 2147483647, %v6373_v38 }
 0x38c   : > { %v4369_v55 = vsel %vm4187_vm4, %v9837_v42, %v4323_v43  ;;  %6380 = vlog2.f32 %v4342_v40  ;;  %v4351_v42 = vadd.f32 1.0, %v6377_v16  ;;  %v4338_v26 = vmul.f32 %v6367_v52, %v4337_v36 }
 0x38d   : > { %4383 = vst.msk [vmem:[%s9754_s17 + $0x48] sm:$0xff] %vm377_vm0, %v4369_v55  ;;  %v4332_v33 = vsel %vm4331_vm5, %v4329_v31, %v4326_v8  ;;  %v4346_v61 = vadd.f32 1.0, %v4345_v17  ;;  %vm4349_vm9 = vcmp.lt.f32.partialorder %v4348_v54, 0.0004427343  ;;  %v4357_v22 = vand.u32 2147483647, %v6377_v16 }
 0x38e   : > { %v4370_v51 = vsel %vm4188_vm6, %v9845_v49, %v4332_v33  ;;  %6382 = vlog2.f32 %v4351_v42  ;;  %v4354_v49 = vmul.f32 -0.5, %v6377_v16 }
 0x38f   : > { %v6379_v56 = vpop.eup %6378  ;;  %4384 = vst.msk [vmem:[%s9754_s17 + $0x50] sm:$0xff] %vm377_vm0, %v4370_v51  ;;  %v4347_v10 = vmul.f32 %v6373_v38, %v4346_v61  ;;  %vm4358_vm11 = vcmp.lt.f32.partialorder %v4357_v22, 0.0004427343 }
 0x390   : > { %v4335_v11 = vmul.f32 0.6931472, %v6379_v56  ;;  %v4355_v60 = vadd.f32 1.0, %v4354_v49 }
 0x392   : > { %v4341_v15 = vsel %vm4340_vm7, %v4338_v26, %v4335_v11  ;;  %v4356_v0 = vmul.f32 %v6377_v16, %v4355_v60 }
 0x393   : > { %v4371_v63 = vsel %vm4189_vm8, %v9871_v25, %v4341_v15 }
 0x394   : > { %4385 = vst.msk [vmem:[%s9754_s17 + $0x58] sm:$0xff] %vm377_vm0, %v4371_v63 }
 0x396   : > { %v6381_v1 = vpop.eup %6380 }
 0x397   : > { %v4344_v50 = vmul.f32 0.6931472, %v6381_v1 }
 0x398   : > { %v6383_v41 = vpop.eup %6382 }
 0x399   : > { %v4350_v48 = vsel %vm4349_vm9, %v4347_v10, %v4344_v50  ;;  %v4353_v25 = vmul.f32 0.6931472, %v6383_v41 }
 0x39a   : > { %v4372_v24 = vsel %vm4190_vm10, %v9884_v3, %v4350_v48 }
 0x39b   : > { %4386 = vst.msk [vmem:[%s9754_s17 + $0x60] sm:$0xff] %vm377_vm0, %v4372_v24  ;;  %v4359_v18 = vsel %vm4358_vm11, %v4356_v0, %v4353_v25 }
 0x39c   : > { %v4373_v12 = vsel %vm4191_vm12, %v9897_v29, %v4359_v18 }
 0x39d   : > { %4387 = vst.msk [vmem:[%s9754_s17 + $0x68] sm:$0xff] %vm377_vm0, %v4373_v12 }
 0x39e PF: > { %p17_p12 = scmp.ge.s32.totalorder %s6501_s29, 4   ;;  %s10990_s24 = smov %s6424_s25 }
 0x39f   : > { %s10991_s25 = smov %s6428_s26  ;;  %s10992_s26 = smov %s6511_s9 }
 0x3a0   : > { %s10993_s27 = smov %s6501_s29  ;;  %19 = sbr.rel (!%p17_p12) target bundleno = 3 (0x3), region = 103 }
 0x3a7   :  { %4410 = vsyncpa [#allocation3], 1 }
 0x3a8   :  { %4412 = vsyncpa [#allocation3 + $0x1], 1 }

</bundles_post_ra>
